<compile_context>
chip_gen: v6e
topology: v6e:2x2x1
jax: 0.10.0
libtpu: 0.0.40
codegen_flags: <defaults>
</compile_context>

<pallas_src>
import numpy as np
import jax
import jax.numpy as jnp
from jax.experimental import pallas as pl
from jax.experimental.pallas import tpu as pltpu

MAX_LV = 3  # cmd_args.max_lv


# ----------------------------------------------------------------------------
# Fused kernel: s2v mean-field message passing + graph pooling + MLP head
# grid = (MAX_LV + 1, num_node_tiles)
#   phase 0          : edge embedding (tile 0) + input message / level-0
#                      potential per node tile
#   phase 1..MAX_LV  : one message-passing level per phase (ping-pong buffers);
#                      on the LAST level each tile also does out-linear + relu
#                      + subg pooling, accumulated into the y_potential scratch
#   last grid step   : tiny MLP head, log_softmax, nll_loss, accuracy
# ----------------------------------------------------------------------------
def _classifier_kernel(node_feat_ref, edge_feat_ref, n2n_ref, e2n_ref, subg_ref,
                       labels_onehot_ref,
                       w_n2l_ref, b_n2l_ref, w_e2l_ref, b_e2l_ref,
                       w_conv_ref, b_conv_ref, w_out_ref, b_out_ref,
                       w1_ref, b1_ref, w2_ref, b2_ref,
                       logp_ref, loss_ref, acc_ref,
                       edge_lin_ref, base_ref, cur0_ref, cur1_ref, ypot_ref):
    f32 = jnp.float32
    bf16 = jnp.bfloat16

    p = pl.program_id(0)                 # phase: 0 = input, 1..MAX_LV = levels
    t = pl.program_id(1)                 # node row tile
    nt = pl.num_programs(1)
    last_p = pl.num_programs(0) - 1
    tile_n = n2n_ref.shape[0]
    row = pl.multiple_of(t * tile_n, tile_n)

    # --- phase 0, tile 0: edge embedding (shared by every node tile) + init --
    @pl.when(jnp.logical_and(p == 0, t == 0))
    def _():
        edge_lin = (jnp.dot(edge_feat_ref[...], w_e2l_ref[...],
                            preferred_element_type=f32) + b_e2l_ref[...])
        edge_lin_ref[...] = edge_lin.astype(bf16)          # cast once at store
        ypot_ref[...] = jnp.zeros_like(ypot_ref)

    # --- phase 0: input message + level-0 potential for this node tile -------
    @pl.when(p == 0)
    def _():
        node_lin = (jnp.dot(node_feat_ref[...], w_n2l_ref[...],
                            preferred_element_type=f32) + b_n2l_ref[...])
        e2npool = jnp.dot(e2n_ref[...], edge_lin_ref[...],
                          preferred_element_type=f32)
        msg = node_lin + e2npool
        cur0_ref[pl.ds(row, tile_n), :] = jnp.maximum(msg, 0.0).astype(bf16)
        # hoisted out of the level loop: input_message + b_conv
        base_ref[pl.ds(row, tile_n), :] = msg + b_conv_ref[...]

    # --- one message-passing level for this node tile (ping-pong buffers) ----
    def conv_level(src_ref, dst_ref):
        n2npool = jnp.dot(n2n_ref[...], src_ref[...],           # bf16 x bf16
                          preferred_element_type=f32)
        node_linear = jnp.dot(n2npool.astype(bf16), w_conv_ref[...],
                              preferred_element_type=f32)
        new_cur = jnp.maximum(node_linear + base_ref[pl.ds(row, tile_n), :], 0.0)
        dst_ref[pl.ds(row, tile_n), :] = new_cur.astype(bf16)

        # last level: fold out-linear + relu + graph pooling into this tile so
        # it overlaps the pipeline instead of running as a serialized tail.
        @pl.when(p == last_p)
        def _():
            relu_fp = jnp.maximum(
                jnp.dot(new_cur.astype(bf16), w_out_ref[...],
                        preferred_element_type=f32) + b_out_ref[...], 0.0)
            contrib = jnp.dot(subg_ref[...], relu_fp.astype(bf16),
                              preferred_element_type=f32)
            ypot_ref[...] = ypot_ref[...] + contrib

    @pl.when(p % 2 == 1)                            # levels 1, 3, ...
    def _():
        conv_level(cur0_ref, cur1_ref)

    @pl.when(jnp.logical_and(p >= 2, p % 2 == 0))   # levels 2, 4, ...
    def _():
        conv_level(cur1_ref, cur0_ref)

    # --- final grid step: tiny MLP head + loss + accuracy --------------------
    @pl.when(jnp.logical_and(p == last_p, t == nt - 1))
    def _():
        # embed = relu(y_potential)
        embed = jnp.maximum(ypot_ref[...], 0.0)

        # MLPClassifier
        h1 = jnp.maximum(
            jnp.dot(embed.astype(bf16), w1_ref[...],
                    preferred_element_type=f32) + b1_ref[...], 0.0)
        logits = jnp.dot(h1, w2_ref[...], preferred_element_type=f32) + b2_ref[...]

        # log_softmax along the class axis (dim=1)
        m = jnp.max(logits, axis=1, keepdims=True)
        z = logits - m
        lse = jnp.log(jnp.sum(jnp.exp(z), axis=1, keepdims=True))
        logp = z - lse
        logp_ref[...] = logp

        onehot = labels_onehot_ref[...]
        g = logp.shape[0]
        c = logp.shape[1]

        # F.nll_loss (mean reduction): -mean(logp[i, y_i])
        loss_ref[...] = -jnp.sum(logp * onehot, axis=(0, 1), keepdims=True) / g

        # accuracy: pred = argmax(logp, dim=1) (first max index) vs labels
        col = jax.lax.broadcasted_iota(jnp.int32, logp.shape, 1).astype(f32)
        maxv = jnp.max(logp, axis=1, keepdims=True)
        pred = jnp.min(jnp.where(logp >= maxv, col, jnp.float32(c)),
                       axis=1, keepdims=True)
        label = jnp.sum(onehot * col, axis=1, keepdims=True)
        correct = (pred == label).astype(f32)
        acc_ref[...] = jnp.sum(correct, axis=0, keepdims=True) / g


def _vmem_limit_bytes():
    # Per-generation budget: ~75% of physical VMEM (128 MiB on v5e/v6e,
    # 64 MiB on v7x), capped at 96 MiB; falls back to a v7x-safe 48 MiB.
    try:
        cap = int(pltpu.get_tpu_info().vmem_capacity_bytes)
    except Exception:
        cap = 64 * 1024 * 1024
    return int(min(cap * 3 // 4, 96 * 1024 * 1024))


# ----------------------------------------------------------------------------
# Wrapper
# ----------------------------------------------------------------------------
def classifier_forward(node_feat, edge_feat, n2n, e2n, subg, labels_onehot,
                       s2v_params, mlp_params, *, tile_n=None):
    assert MAX_LV >= 1
    N, feat_dim = node_feat.shape
    E2 = edge_feat.shape[0]
    G, num_class = labels_onehot.shape
    w_n2l, b_n2l, w_e2l, b_e2l, w_conv, b_conv, w_out, b_out = s2v_params
    w1, b1, w2, b2 = mlp_params
    latent_dim = w_n2l.shape[1]
    out_dim = w_out.shape[1]
    bf16 = jnp.bfloat16

    if tile_n is None:
        tile_n = N if N <= 256 else 256
    # tile_n must keep the (G, tile_n) subg block lane-legal.
    assert N % tile_n == 0 and (tile_n % 128 == 0 or tile_n == N)
    assert tile_n % 8 == 0
    nt = N // tile_n
    phases = MAX_LV + 1
    last_p = phases - 1

    # 0/1 structure matrices (exact in bf16) and dense MXU weights in bf16.
    n2n = n2n.astype(bf16)
    e2n = e2n.astype(bf16)
    subg = subg.astype(bf16)
    w_conv_bf = w_conv.astype(bf16)
    w_out_bf = w_out.astype(bf16)
    w1_bf = w1.astype(bf16)

    def whole(arr):
        return pl.BlockSpec(arr.shape, lambda p, t: (0, 0))

    # Phase-aware streaming: only advance a block index in phases that read it.
    def rows_phase0(cols):   # node_feat / e2n: read only in phase 0
        return pl.BlockSpec((tile_n, cols),
                            lambda p, t: (jnp.where(p == 0, t, 0), 0))

    def rows_levels(cols):   # n2n: read only in phases 1..MAX_LV
        return pl.BlockSpec((tile_n, cols),
                            lambda p, t: (jnp.where(p > 0, t, 0), 0))

    subg_spec = pl.BlockSpec((G, tile_n),   # read only in the last phase
                             lambda p, t: (0, jnp.where(p == last_p, t, 0)))

    inputs = (node_feat, edge_feat, n2n, e2n, subg, labels_onehot,
              w_n2l, b_n2l, w_e2l, b_e2l, w_conv_bf, b_conv, w_out_bf, b_out,
              w1_bf, b1, w2, b2)

    in_specs = [
        rows_phase0(feat_dim),    # node_feat row tile (phase 0 only)
        whole(edge_feat),         # edge_feat (resident, fetched once)
        rows_levels(N),           # n2n row tile (streamed each level)
        rows_phase0(E2),          # e2n row tile (phase 0 only)
        subg_spec,                # subg column tile (last phase only)
        whole(labels_onehot),
        whole(w_n2l), whole(b_n2l), whole(w_e2l), whole(b_e2l),
        whole(w_conv_bf), whole(b_conv), whole(w_out_bf), whole(b_out),
        whole(w1_bf), whole(b1), whole(w2), whole(b2),
    ]

    out_shape = (jax.ShapeDtypeStruct((G, num_class), jnp.float32),   # logp
                 jax.ShapeDtypeStruct((1, 1), jnp.float32),           # loss
                 jax.ShapeDtypeStruct((1, 1), jnp.float32))           # acc
    out_specs = (pl.BlockSpec((G, num_class), lambda p, t: (0, 0)),
                 pl.BlockSpec((1, 1), lambda p, t: (0, 0)),
                 pl.BlockSpec((1, 1), lambda p, t: (0, 0)))

    scratch_shapes = [
        pltpu.VMEM((E2, latent_dim), bf16),          # edge_lin (bf16, MXU-ready)
        pltpu.VMEM((N, latent_dim), jnp.float32),    # base = input_message + b_conv
        pltpu.VMEM((N, latent_dim), bf16),           # cur (ping)
        pltpu.VMEM((N, latent_dim), bf16),           # cur (pong)
        pltpu.VMEM((G, out_dim), jnp.float32),       # y_potential accumulator
    ]

    grid_spec = pltpu.PrefetchScalarGridSpec(
        num_scalar_prefetch=0,
        grid=(phases, nt),
        in_specs=in_specs,
        out_specs=out_specs,
        scratch_shapes=scratch_shapes)

    logp, loss, acc = pl.pallas_call(
        _classifier_kernel,
        out_shape=out_shape,
        grid_spec=grid_spec,
        compiler_params=pltpu.CompilerParams(
            # Both axes carry scratch-mediated dependencies (each level reads
            # the previous level's full `cur`, ypot accumulates across tiles),
            # so keep them sequential.
            dimension_semantics=("arbitrary", "arbitrary"),
            vmem_limit_bytes=_vmem_limit_bytes()),
    )(*inputs)
    return logp, loss[0, 0], acc[0, 0]


# ----------------------------------------------------------------------------
# Deterministic parameter init (torch.nn.Linear-style uniform)
# ----------------------------------------------------------------------------
def linear_init(key, fan_in, fan_out):
    k1, k2 = jax.random.split(key)
    bound = 1.0 / np.sqrt(fan_in)
    w = jax.random.uniform(k1, (fan_in, fan_out), jnp.float32, -bound, bound)
    b = jax.random.uniform(k2, (1, fan_out), jnp.float32, -bound, bound)
    return w, b


if __name__ == "__main__":
    # hyperparameters (cmd_args analogue); latent/out/hidden lane-dense (128)
    num_graphs = 2
    nodes_per_graph = 128
    feat_dim = 8          # cmd_args.feat_dim
    edge_feat_dim = 4     # cmd_args.edge_feat_dim
    latent_dim = 128      # cmd_args.latent_dim
    out_dim = 128         # cmd_args.out_dim (> 0 -> out_params branch is used)
    hidden = 128          # cmd_args.hidden
    num_class = 2         # cmd_args.num_class

    N = num_graphs * nodes_per_graph
    E_dir = 2 * nodes_per_graph * num_graphs   # ring graphs

    key = jax.random.PRNGKey(0)
    keys = jax.random.split(key, 10)

    # ---- synthetic batch of ring graphs (PrepareFeatureLabel equivalent) ----
    n2n_np = np.zeros((N, N), np.float32)
    e2n_np = np.zeros((N, E_dir), np.float32)
    subg_np = np.zeros((num_graphs, N), np.float32)
    e_idx = 0
    for g in range(num_graphs):
        base = g * nodes_per_graph
        subg_np[g, base:base + nodes_per_graph] = 1.0
        for i in range(nodes_per_graph):
            u = base + i
            v = base + (i + 1) % nodes_per_graph
            n2n_np[u, v] = 1.0
            n2n_np[v, u] = 1.0
            e2n_np[v, e_idx] = 1.0       # directed edge u->v pools into v
            e2n_np[u, e_idx + 1] = 1.0   # directed edge v->u pools into u
            e_idx += 2

    node_tags = jax.random.randint(keys[0], (N,), 0, feat_dim)
    node_feat = jax.nn.one_hot(node_tags, feat_dim, dtype=jnp.float32)
    edge_tags = jax.random.randint(keys[1], (E_dir,), 0, edge_feat_dim)
    edge_feat = jax.nn.one_hot(edge_tags, edge_feat_dim, dtype=jnp.float32)
    labels = jax.random.randint(keys[2], (num_graphs,), 0, num_class)
    labels_onehot = jax.nn.one_hot(labels, num_class, dtype=jnp.float32)

    # 0/1 structure matrices in bf16 (exact representation of 0/1 values)
    n2n = jnp.asarray(n2n_np, dtype=jnp.bfloat16)
    e2n = jnp.asarray(e2n_np, dtype=jnp.bfloat16)
    subg = jnp.asarray(subg_np, dtype=jnp.bfloat16)

    # ---- parameters ----
    w_n2l, b_n2l = linear_init(keys[3], feat_dim, latent_dim)
    w_e2l, b_e2l = linear_init(keys[4], edge_feat_dim, latent_dim)
    w_conv, b_conv = linear_init(keys[5], latent_dim, latent_dim)
    w_out, b_out = linear_init(keys[6], latent_dim, out_dim)
    s2v_params = (w_n2l, b_n2l, w_e2l, b_e2l, w_conv, b_conv, w_out, b_out)

    w1, b1 = linear_init(keys[7], out_dim, hidden)
    w2, b2 = linear_init(keys[8], hidden, num_class)
    mlp_params = (w1, b1, w2, b2)

    # ---- run (single fused kernel, tile_n=128 -> 2 node tiles) ----
    logp, loss, acc = classifier_forward(node_feat, edge_feat, n2n, e2n, subg,
                                         labels_onehot, s2v_params, mlp_params,
                                         tile_n=128)
    jax.block_until_ready((logp, loss, acc))
    print("KERNEL_OK")
</pallas_src>

<mosaic_0001>
module attributes {stable_mosaic.version = 11 : i64} {
  func.func @_classifier_kernel(%arg0: i32, %arg1: i32, %arg2: memref<128x8xf32, #tpu.memory_space<vmem>>, %arg3: memref<512x4xf32, #tpu.memory_space<vmem>>, %arg4: memref<128x256xbf16, #tpu.memory_space<vmem>>, %arg5: memref<128x512xbf16, #tpu.memory_space<vmem>>, %arg6: memref<2x128xbf16, #tpu.memory_space<vmem>>, %arg7: memref<2x2xf32, #tpu.memory_space<vmem>>, %arg8: memref<8x128xf32, #tpu.memory_space<vmem>>, %arg9: memref<1x128xf32, #tpu.memory_space<vmem>>, %arg10: memref<4x128xf32, #tpu.memory_space<vmem>>, %arg11: memref<1x128xf32, #tpu.memory_space<vmem>>, %arg12: memref<128x128xbf16, #tpu.memory_space<vmem>>, %arg13: memref<1x128xf32, #tpu.memory_space<vmem>>, %arg14: memref<128x128xbf16, #tpu.memory_space<vmem>>, %arg15: memref<1x128xf32, #tpu.memory_space<vmem>>, %arg16: memref<128x128xbf16, #tpu.memory_space<vmem>>, %arg17: memref<1x128xf32, #tpu.memory_space<vmem>>, %arg18: memref<128x2xf32, #tpu.memory_space<vmem>>, %arg19: memref<1x2xf32, #tpu.memory_space<vmem>>, %arg20: memref<2x2xf32, #tpu.memory_space<vmem>>, %arg21: memref<1x1xf32, #tpu.memory_space<vmem>>, %arg22: memref<1x1xf32, #tpu.memory_space<vmem>>, %arg23: memref<512x128xbf16, #tpu.memory_space<vmem>>, %arg24: memref<256x128xf32, #tpu.memory_space<vmem>>, %arg25: memref<256x128xbf16, #tpu.memory_space<vmem>>, %arg26: memref<256x128xbf16, #tpu.memory_space<vmem>>, %arg27: memref<2x128xf32, #tpu.memory_space<vmem>>) attributes {dimension_semantics = [#tpu.dimension_semantics<arbitrary>, #tpu.dimension_semantics<arbitrary>], iteration_bounds = array<i64: 4, 2>, scalar_prefetch = 0 : i64, scratch_operands = 5 : i64, tpu.core_type = #tpu.core_type<tc>, window_params = [{transform_indices = @transform_0, window_bounds = array<i64: 128, 8>}, {pipeline_mode = #tpu.pipeline_mode<synchronous>, transform_indices = @transform_1, window_bounds = array<i64: 512, 4>}, {transform_indices = @transform_2, window_bounds = array<i64: 128, 256>}, {transform_indices = @transform_3, window_bounds = array<i64: 128, 512>}, {transform_indices = @transform_4, window_bounds = array<i64: 2, 128>}, {pipeline_mode = #tpu.pipeline_mode<synchronous>, transform_indices = @transform_5, window_bounds = array<i64: 2, 2>}, {pipeline_mode = #tpu.pipeline_mode<synchronous>, transform_indices = @transform_6, window_bounds = array<i64: 8, 128>}, {pipeline_mode = #tpu.pipeline_mode<synchronous>, transform_indices = @transform_7, window_bounds = array<i64: 1, 128>}, {pipeline_mode = #tpu.pipeline_mode<synchronous>, transform_indices = @transform_8, window_bounds = array<i64: 4, 128>}, {pipeline_mode = #tpu.pipeline_mode<synchronous>, transform_indices = @transform_9, window_bounds = array<i64: 1, 128>}, {pipeline_mode = #tpu.pipeline_mode<synchronous>, transform_indices = @transform_10, window_bounds = array<i64: 128, 128>}, {pipeline_mode = #tpu.pipeline_mode<synchronous>, transform_indices = @transform_11, window_bounds = array<i64: 1, 128>}, {pipeline_mode = #tpu.pipeline_mode<synchronous>, transform_indices = @transform_12, window_bounds = array<i64: 128, 128>}, {pipeline_mode = #tpu.pipeline_mode<synchronous>, transform_indices = @transform_13, window_bounds = array<i64: 1, 128>}, {pipeline_mode = #tpu.pipeline_mode<synchronous>, transform_indices = @transform_14, window_bounds = array<i64: 128, 128>}, {pipeline_mode = #tpu.pipeline_mode<synchronous>, transform_indices = @transform_15, window_bounds = array<i64: 1, 128>}, {pipeline_mode = #tpu.pipeline_mode<synchronous>, transform_indices = @transform_16, window_bounds = array<i64: 128, 2>}, {pipeline_mode = #tpu.pipeline_mode<synchronous>, transform_indices = @transform_17, window_bounds = array<i64: 1, 2>}, {pipeline_mode = #tpu.pipeline_mode<synchronous>, transform_indices = @transform_18, window_bounds = array<i64: 2, 2>}, {pipeline_mode = #tpu.pipeline_mode<synchronous>, transform_indices = @transform_19, window_bounds = array<i64: 1, 1>}, {pipeline_mode = #tpu.pipeline_mode<synchronous>, transform_indices = @transform_20, window_bounds = array<i64: 1, 1>}]} {
    %c128_i32 = arith.constant 128 : i32
    %0 = arith.muli %arg1, %c128_i32 : i32
    %1 = tpu.assume_multiple %0, 128 : i32
    %c0_i32 = arith.constant 0 : i32
    %2 = arith.cmpi eq, %arg0, %c0_i32 : i32
    %c0_i32_0 = arith.constant 0 : i32
    %3 = arith.cmpi eq, %arg1, %c0_i32_0 : i32
    %4 = arith.andi %2, %3 : i1
    %5 = arith.extui %4 : i1 to i32
    %c0_i32_1 = arith.constant 0 : i32
    %6 = arith.cmpi ne, %5, %c0_i32_1 : i32
    scf.if %6 {
      %c0 = arith.constant 0 : index
      %c0_21 = arith.constant 0 : index
      %43 = vector.load %arg3[%c0, %c0_21] : memref<512x4xf32, #tpu.memory_space<vmem>>, vector<512x4xf32>
      %c0_22 = arith.constant 0 : index
      %c0_23 = arith.constant 0 : index
      %44 = vector.load %arg10[%c0_22, %c0_23] : memref<4x128xf32, #tpu.memory_space<vmem>>, vector<4x128xf32>
      %cst = arith.constant dense<0.000000e+00> : vector<512x128xf32>
      %45 = tpu.matmul %43, %44, %cst {dimension_numbers = #tpu.dot_dimension_numbers<[1], [0], [0], [1], [0, 0, 1, 1], [], []>} : vector<512x4xf32>, vector<4x128xf32>, vector<512x128xf32> -> vector<512x128xf32>
      %c0_24 = arith.constant 0 : index
      %c0_25 = arith.constant 0 : index
      %46 = vector.load %arg11[%c0_24, %c0_25] : memref<1x128xf32, #tpu.memory_space<vmem>>, vector<1x128xf32>
      %47 = vector.broadcast %46 : vector<1x128xf32> to vector<512x128xf32>
      %48 = arith.addf %45, %47 : vector<512x128xf32>
      %49 = arith.truncf %48 : vector<512x128xf32> to vector<512x128xbf16>
      %c0_26 = arith.constant 0 : index
      %c0_27 = arith.constant 0 : index
      %50 = vector.load %arg23[%c0_26, %c0_27] : memref<512x128xbf16, #tpu.memory_space<vmem>>, vector<512x128xbf16>
      tpu.vector_store %arg23[%c0_26, %c0_27], %49 {strides = array<i32>} : memref<512x128xbf16, #tpu.memory_space<vmem>>, vector<512x128xbf16>,
      %cst_28 = arith.constant 0.000000e+00 : f32
      %51 = vector.broadcast %cst_28 : f32 to vector<2x128xf32>
      %c0_29 = arith.constant 0 : index
      %c0_30 = arith.constant 0 : index
      %52 = vector.load %arg27[%c0_29, %c0_30] : memref<2x128xf32, #tpu.memory_space<vmem>>, vector<2x128xf32>
      tpu.vector_store %arg27[%c0_29, %c0_30], %51 {strides = array<i32>} : memref<2x128xf32, #tpu.memory_space<vmem>>, vector<2x128xf32>,
    } else {
    }
    %c0_i32_2 = arith.constant 0 : i32
    %7 = arith.cmpi eq, %arg0, %c0_i32_2 : i32
    %8 = arith.extui %7 : i1 to i32
    %c0_i32_3 = arith.constant 0 : i32
    %9 = arith.cmpi ne, %8, %c0_i32_3 : i32
    scf.if %9 {
      %c0 = arith.constant 0 : index
      %c0_21 = arith.constant 0 : index
      %43 = vector.load %arg2[%c0, %c0_21] : memref<128x8xf32, #tpu.memory_space<vmem>>, vector<128x8xf32>
      %c0_22 = arith.constant 0 : index
      %c0_23 = arith.constant 0 : index
      %44 = vector.load %arg8[%c0_22, %c0_23] : memref<8x128xf32, #tpu.memory_space<vmem>>, vector<8x128xf32>
      %cst = arith.constant dense<0.000000e+00> : vector<128x128xf32>
      %45 = tpu.matmul %43, %44, %cst {dimension_numbers = #tpu.dot_dimension_numbers<[1], [0], [0], [1], [0, 0, 1, 1], [], []>} : vector<128x8xf32>, vector<8x128xf32>, vector<128x128xf32> -> vector<128x128xf32>
      %c0_24 = arith.constant 0 : index
      %c0_25 = arith.constant 0 : index
      %46 = vector.load %arg9[%c0_24, %c0_25] : memref<1x128xf32, #tpu.memory_space<vmem>>, vector<1x128xf32>
      %47 = vector.broadcast %46 : vector<1x128xf32> to vector<128x128xf32>
      %48 = arith.addf %45, %47 : vector<128x128xf32>
      %c0_26 = arith.constant 0 : index
      %c0_27 = arith.constant 0 : index
      %49 = vector.load %arg5[%c0_26, %c0_27] : memref<128x512xbf16, #tpu.memory_space<vmem>>, vector<128x512xbf16>
      %c0_28 = arith.constant 0 : index
      %c0_29 = arith.constant 0 : index
      %50 = vector.load %arg23[%c0_28, %c0_29] : memref<512x128xbf16, #tpu.memory_space<vmem>>, vector<512x128xbf16>
      %cst_30 = arith.constant dense<0.000000e+00> : vector<128x128xf32>
      %51 = tpu.matmul %49, %50, %cst_30 {dimension_numbers = #tpu.dot_dimension_numbers<[1], [0], [0], [1], [0, 0, 1, 1], [], []>} : vector<128x512xbf16>, vector<512x128xbf16>, vector<128x128xf32> -> vector<128x128xf32>
      %52 = arith.addf %48, %51 : vector<128x128xf32>
      %cst_31 = arith.constant 0.000000e+00 : f32
      %53 = vector.broadcast %cst_31 : f32 to vector<128x128xf32>
      %54 = arith.maximumf %52, %53 : vector<128x128xf32>
      %55 = arith.truncf %54 : vector<128x128xf32> to vector<128x128xbf16>
      %56 = arith.index_cast %1 : i32 to index
      %c0_32 = arith.constant 0 : index
      %57 = vector.load %arg25[%56, %c0_32] : memref<256x128xbf16, #tpu.memory_space<vmem>>, vector<128x128xbf16>
      tpu.vector_store %arg25[%56, %c0_32], %55 {strides = array<i32>} : memref<256x128xbf16, #tpu.memory_space<vmem>>, vector<128x128xbf16>,
      %c0_33 = arith.constant 0 : index
      %c0_34 = arith.constant 0 : index
      %58 = vector.load %arg13[%c0_33, %c0_34] : memref<1x128xf32, #tpu.memory_space<vmem>>, vector<1x128xf32>
      %59 = vector.broadcast %58 : vector<1x128xf32> to vector<128x128xf32>
      %60 = arith.addf %52, %59 : vector<128x128xf32>
      %61 = arith.index_cast %1 : i32 to index
      %c0_35 = arith.constant 0 : index
      %62 = vector.load %arg24[%61, %c0_35] : memref<256x128xf32, #tpu.memory_space<vmem>>, vector<128x128xf32>
      tpu.vector_store %arg24[%61, %c0_35], %60 {strides = array<i32>} : memref<256x128xf32, #tpu.memory_space<vmem>>, vector<128x128xf32>,
    } else {
    }
    %c2_i32 = arith.constant 2 : i32
    %c0_i32_4 = arith.constant 0 : i32
    %10 = arith.cmpi eq, %c2_i32, %c0_i32_4 : i32
    %c1_i32 = arith.constant 1 : i32
    %11 = arith.select %10, %c1_i32, %c2_i32 : i32
    %12 = arith.remsi %arg0, %11 : i32
    %c0_i32_5 = arith.constant 0 : i32
    %13 = arith.cmpi ne, %12, %c0_i32_5 : i32
    %c0_i32_6 = arith.constant 0 : i32
    %14 = arith.cmpi slt, %12, %c0_i32_6 : i32
    %c0_i32_7 = arith.constant 0 : i32
    %15 = arith.cmpi slt, %11, %c0_i32_7 : i32
    %16 = arith.xori %14, %15 : i1
    %17 = arith.andi %16, %13 : i1
    %18 = arith.addi %12, %11 : i32
    %19 = arith.select %17, %18, %12 : i32
    %c1_i32_8 = arith.constant 1 : i32
    %20 = arith.cmpi eq, %19, %c1_i32_8 : i32
    %21 = arith.extui %20 : i1 to i32
    %c0_i32_9 = arith.constant 0 : i32
    %22 = arith.cmpi ne, %21, %c0_i32_9 : i32
    scf.if %22 {
      %c0 = arith.constant 0 : index
      %c0_21 = arith.constant 0 : index
      %43 = vector.load %arg4[%c0, %c0_21] : memref<128x256xbf16, #tpu.memory_space<vmem>>, vector<128x256xbf16>
      %c0_22 = arith.constant 0 : index
      %c0_23 = arith.constant 0 : index
      %44 = vector.load %arg25[%c0_22, %c0_23] : memref<256x128xbf16, #tpu.memory_space<vmem>>, vector<256x128xbf16>
      %cst = arith.constant dense<0.000000e+00> : vector<128x128xf32>
      %45 = tpu.matmul %43, %44, %cst {dimension_numbers = #tpu.dot_dimension_numbers<[1], [0], [0], [1], [0, 0, 1, 1], [], []>} : vector<128x256xbf16>, vector<256x128xbf16>, vector<128x128xf32> -> vector<128x128xf32>
      %46 = arith.truncf %45 : vector<128x128xf32> to vector<128x128xbf16>
      %c0_24 = arith.constant 0 : index
      %c0_25 = arith.constant 0 : index
      %47 = vector.load %arg12[%c0_24, %c0_25] : memref<128x128xbf16, #tpu.memory_space<vmem>>, vector<128x128xbf16>
      %cst_26 = arith.constant dense<0.000000e+00> : vector<128x128xf32>
      %48 = tpu.matmul %46, %47, %cst_26 {dimension_numbers = #tpu.dot_dimension_numbers<[1], [0], [0], [1], [0, 0, 1, 1], [], []>} : vector<128x128xbf16>, vector<128x128xbf16>, vector<128x128xf32> -> vector<128x128xf32>
      %49 = arith.index_cast %1 : i32 to index
      %c0_27 = arith.constant 0 : index
      %50 = vector.load %arg24[%49, %c0_27] : memref<256x128xf32, #tpu.memory_space<vmem>>, vector<128x128xf32>
      %51 = arith.addf %48, %50 : vector<128x128xf32>
      %cst_28 = arith.constant 0.000000e+00 : f32
      %52 = vector.broadcast %cst_28 : f32 to vector<128x128xf32>
      %53 = arith.maximumf %51, %52 : vector<128x128xf32>
      %54 = arith.truncf %53 : vector<128x128xf32> to vector<128x128xbf16>
      %55 = arith.index_cast %1 : i32 to index
      %c0_29 = arith.constant 0 : index
      %56 = vector.load %arg26[%55, %c0_29] : memref<256x128xbf16, #tpu.memory_space<vmem>>, vector<128x128xbf16>
      tpu.vector_store %arg26[%55, %c0_29], %54 {strides = array<i32>} : memref<256x128xbf16, #tpu.memory_space<vmem>>, vector<128x128xbf16>,
      %c3_i32_30 = arith.constant 3 : i32
      %57 = arith.cmpi eq, %arg0, %c3_i32_30 : i32
      %58 = arith.extui %57 : i1 to i32
      %c0_i32_31 = arith.constant 0 : i32
      %59 = arith.cmpi ne, %58, %c0_i32_31 : i32
      scf.if %59 {
        %60 = arith.truncf %53 : vector<128x128xf32> to vector<128x128xbf16>
        %c0_32 = arith.constant 0 : index
        %c0_33 = arith.constant 0 : index
        %61 = vector.load %arg14[%c0_32, %c0_33] : memref<128x128xbf16, #tpu.memory_space<vmem>>, vector<128x128xbf16>
        %cst_34 = arith.constant dense<0.000000e+00> : vector<128x128xf32>
        %62 = tpu.matmul %60, %61, %cst_34 {dimension_numbers = #tpu.dot_dimension_numbers<[1], [0], [0], [1], [0, 0, 1, 1], [], []>} : vector<128x128xbf16>, vector<128x128xbf16>, vector<128x128xf32> -> vector<128x128xf32>
        %c0_35 = arith.constant 0 : index
        %c0_36 = arith.constant 0 : index
        %63 = vector.load %arg15[%c0_35, %c0_36] : memref<1x128xf32, #tpu.memory_space<vmem>>, vector<1x128xf32>
        %64 = vector.broadcast %63 : vector<1x128xf32> to vector<128x128xf32>
        %65 = arith.addf %62, %64 : vector<128x128xf32>
        %cst_37 = arith.constant 0.000000e+00 : f32
        %66 = vector.broadcast %cst_37 : f32 to vector<128x128xf32>
        %67 = arith.maximumf %65, %66 : vector<128x128xf32>
        %c0_38 = arith.constant 0 : index
        %c0_39 = arith.constant 0 : index
        %68 = vector.load %arg6[%c0_38, %c0_39] : memref<2x128xbf16, #tpu.memory_space<vmem>>, vector<2x128xbf16>
        %69 = arith.truncf %67 : vector<128x128xf32> to vector<128x128xbf16>
        %cst_40 = arith.constant dense<0.000000e+00> : vector<2x128xf32>
        %70 = tpu.matmul %68, %69, %cst_40 {dimension_numbers = #tpu.dot_dimension_numbers<[1], [0], [0], [1], [0, 0, 1, 1], [], []>} : vector<2x128xbf16>, vector<128x128xbf16>, vector<2x128xf32> -> vector<2x128xf32>
        %c0_41 = arith.constant 0 : index
        %c0_42 = arith.constant 0 : index
        %71 = vector.load %arg27[%c0_41, %c0_42] : memref<2x128xf32, #tpu.memory_space<vmem>>, vector<2x128xf32>
        %72 = arith.addf %71, %70 : vector<2x128xf32>
        %c0_43 = arith.constant 0 : index
        %c0_44 = arith.constant 0 : index
        %73 = vector.load %arg27[%c0_43, %c0_44] : memref<2x128xf32, #tpu.memory_space<vmem>>, vector<2x128xf32>
        tpu.vector_store %arg27[%c0_43, %c0_44], %72 {strides = array<i32>} : memref<2x128xf32, #tpu.memory_space<vmem>>, vector<2x128xf32>,
      } else {
      }
    } else {
    }
    %c2_i32_10 = arith.constant 2 : i32
    %23 = arith.cmpi sge, %arg0, %c2_i32_10 : i32
    %c2_i32_11 = arith.constant 2 : i32
    %c0_i32_12 = arith.constant 0 : i32
    %24 = arith.cmpi eq, %c2_i32_11, %c0_i32_12 : i32
    %c1_i32_13 = arith.constant 1 : i32
    %25 = arith.select %24, %c1_i32_13, %c2_i32_11 : i32
    %26 = arith.remsi %arg0, %25 : i32
    %c0_i32_14 = arith.constant 0 : i32
    %27 = arith.cmpi ne, %26, %c0_i32_14 : i32
    %c0_i32_15 = arith.constant 0 : i32
    %28 = arith.cmpi slt, %26, %c0_i32_15 : i32
    %c0_i32_16 = arith.constant 0 : i32
    %29 = arith.cmpi slt, %25, %c0_i32_16 : i32
    %30 = arith.xori %28, %29 : i1
    %31 = arith.andi %30, %27 : i1
    %32 = arith.addi %26, %25 : i32
    %33 = arith.select %31, %32, %26 : i32
    %c0_i32_17 = arith.constant 0 : i32
    %34 = arith.cmpi eq, %33, %c0_i32_17 : i32
    %35 = arith.andi %23, %34 : i1
    %36 = arith.extui %35 : i1 to i32
    %c0_i32_18 = arith.constant 0 : i32
    %37 = arith.cmpi ne, %36, %c0_i32_18 : i32
    scf.if %37 {
      %c0 = arith.constant 0 : index
      %c0_21 = arith.constant 0 : index
      %43 = vector.load %arg4[%c0, %c0_21] : memref<128x256xbf16, #tpu.memory_space<vmem>>, vector<128x256xbf16>
      %c0_22 = arith.constant 0 : index
      %c0_23 = arith.constant 0 : index
      %44 = vector.load %arg26[%c0_22, %c0_23] : memref<256x128xbf16, #tpu.memory_space<vmem>>, vector<256x128xbf16>
      %cst = arith.constant dense<0.000000e+00> : vector<128x128xf32>
      %45 = tpu.matmul %43, %44, %cst {dimension_numbers = #tpu.dot_dimension_numbers<[1], [0], [0], [1], [0, 0, 1, 1], [], []>} : vector<128x256xbf16>, vector<256x128xbf16>, vector<128x128xf32> -> vector<128x128xf32>
      %46 = arith.truncf %45 : vector<128x128xf32> to vector<128x128xbf16>
      %c0_24 = arith.constant 0 : index
      %c0_25 = arith.constant 0 : index
      %47 = vector.load %arg12[%c0_24, %c0_25] : memref<128x128xbf16, #tpu.memory_space<vmem>>, vector<128x128xbf16>
      %cst_26 = arith.constant dense<0.000000e+00> : vector<128x128xf32>
      %48 = tpu.matmul %46, %47, %cst_26 {dimension_numbers = #tpu.dot_dimension_numbers<[1], [0], [0], [1], [0, 0, 1, 1], [], []>} : vector<128x128xbf16>, vector<128x128xbf16>, vector<128x128xf32> -> vector<128x128xf32>
      %49 = arith.index_cast %1 : i32 to index
      %c0_27 = arith.constant 0 : index
      %50 = vector.load %arg24[%49, %c0_27] : memref<256x128xf32, #tpu.memory_space<vmem>>, vector<128x128xf32>
      %51 = arith.addf %48, %50 : vector<128x128xf32>
      %cst_28 = arith.constant 0.000000e+00 : f32
      %52 = vector.broadcast %cst_28 : f32 to vector<128x128xf32>
      %53 = arith.maximumf %51, %52 : vector<128x128xf32>
      %54 = arith.truncf %53 : vector<128x128xf32> to vector<128x128xbf16>
      %55 = arith.index_cast %1 : i32 to index
      %c0_29 = arith.constant 0 : index
      %56 = vector.load %arg25[%55, %c0_29] : memref<256x128xbf16, #tpu.memory_space<vmem>>, vector<128x128xbf16>
      tpu.vector_store %arg25[%55, %c0_29], %54 {strides = array<i32>} : memref<256x128xbf16, #tpu.memory_space<vmem>>, vector<128x128xbf16>,
      %c3_i32_30 = arith.constant 3 : i32
      %57 = arith.cmpi eq, %arg0, %c3_i32_30 : i32
      %58 = arith.extui %57 : i1 to i32
      %c0_i32_31 = arith.constant 0 : i32
      %59 = arith.cmpi ne, %58, %c0_i32_31 : i32
      scf.if %59 {
        %60 = arith.truncf %53 : vector<128x128xf32> to vector<128x128xbf16>
        %c0_32 = arith.constant 0 : index
        %c0_33 = arith.constant 0 : index
        %61 = vector.load %arg14[%c0_32, %c0_33] : memref<128x128xbf16, #tpu.memory_space<vmem>>, vector<128x128xbf16>
        %cst_34 = arith.constant dense<0.000000e+00> : vector<128x128xf32>
        %62 = tpu.matmul %60, %61, %cst_34 {dimension_numbers = #tpu.dot_dimension_numbers<[1], [0], [0], [1], [0, 0, 1, 1], [], []>} : vector<128x128xbf16>, vector<128x128xbf16>, vector<128x128xf32> -> vector<128x128xf32>
        %c0_35 = arith.constant 0 : index
        %c0_36 = arith.constant 0 : index
        %63 = vector.load %arg15[%c0_35, %c0_36] : memref<1x128xf32, #tpu.memory_space<vmem>>, vector<1x128xf32>
        %64 = vector.broadcast %63 : vector<1x128xf32> to vector<128x128xf32>
        %65 = arith.addf %62, %64 : vector<128x128xf32>
        %cst_37 = arith.constant 0.000000e+00 : f32
        %66 = vector.broadcast %cst_37 : f32 to vector<128x128xf32>
        %67 = arith.maximumf %65, %66 : vector<128x128xf32>
        %c0_38 = arith.constant 0 : index
        %c0_39 = arith.constant 0 : index
        %68 = vector.load %arg6[%c0_38, %c0_39] : memref<2x128xbf16, #tpu.memory_space<vmem>>, vector<2x128xbf16>
        %69 = arith.truncf %67 : vector<128x128xf32> to vector<128x128xbf16>
        %cst_40 = arith.constant dense<0.000000e+00> : vector<2x128xf32>
        %70 = tpu.matmul %68, %69, %cst_40 {dimension_numbers = #tpu.dot_dimension_numbers<[1], [0], [0], [1], [0, 0, 1, 1], [], []>} : vector<2x128xbf16>, vector<128x128xbf16>, vector<2x128xf32> -> vector<2x128xf32>
        %c0_41 = arith.constant 0 : index
        %c0_42 = arith.constant 0 : index
        %71 = vector.load %arg27[%c0_41, %c0_42] : memref<2x128xf32, #tpu.memory_space<vmem>>, vector<2x128xf32>
        %72 = arith.addf %71, %70 : vector<2x128xf32>
        %c0_43 = arith.constant 0 : index
        %c0_44 = arith.constant 0 : index
        %73 = vector.load %arg27[%c0_43, %c0_44] : memref<2x128xf32, #tpu.memory_space<vmem>>, vector<2x128xf32>
        tpu.vector_store %arg27[%c0_43, %c0_44], %72 {strides = array<i32>} : memref<2x128xf32, #tpu.memory_space<vmem>>, vector<2x128xf32>,
      } else {
      }
    } else {
    }
    %c3_i32 = arith.constant 3 : i32
    %38 = arith.cmpi eq, %arg0, %c3_i32 : i32
    %c1_i32_19 = arith.constant 1 : i32
    %39 = arith.cmpi eq, %arg1, %c1_i32_19 : i32
    %40 = arith.andi %38, %39 : i1
    %41 = arith.extui %40 : i1 to i32
    %c0_i32_20 = arith.constant 0 : i32
    %42 = arith.cmpi ne, %41, %c0_i32_20 : i32
    scf.if %42 {
      %c0 = arith.constant 0 : index
      %c0_21 = arith.constant 0 : index
      %43 = vector.load %arg27[%c0, %c0_21] : memref<2x128xf32, #tpu.memory_space<vmem>>, vector<2x128xf32>
      %cst = arith.constant 0.000000e+00 : f32
      %44 = vector.broadcast %cst : f32 to vector<2x128xf32>
      %45 = arith.maximumf %43, %44 : vector<2x128xf32>
      %46 = arith.truncf %45 : vector<2x128xf32> to vector<2x128xbf16>
      %c0_22 = arith.constant 0 : index
      %c0_23 = arith.constant 0 : index
      %47 = vector.load %arg16[%c0_22, %c0_23] : memref<128x128xbf16, #tpu.memory_space<vmem>>, vector<128x128xbf16>
      %cst_24 = arith.constant dense<0.000000e+00> : vector<2x128xf32>
      %48 = tpu.matmul %46, %47, %cst_24 {dimension_numbers = #tpu.dot_dimension_numbers<[1], [0], [0], [1], [0, 0, 1, 1], [], []>} : vector<2x128xbf16>, vector<128x128xbf16>, vector<2x128xf32> -> vector<2x128xf32>
      %c0_25 = arith.constant 0 : index
      %c0_26 = arith.constant 0 : index
      %49 = vector.load %arg17[%c0_25, %c0_26] : memref<1x128xf32, #tpu.memory_space<vmem>>, vector<1x128xf32>
      %50 = vector.broadcast %49 : vector<1x128xf32> to vector<2x128xf32>
      %51 = arith.addf %48, %50 : vector<2x128xf32>
      %cst_27 = arith.constant 0.000000e+00 : f32
      %52 = vector.broadcast %cst_27 : f32 to vector<2x128xf32>
      %53 = arith.maximumf %51, %52 : vector<2x128xf32>
      %c0_28 = arith.constant 0 : index
      %c0_29 = arith.constant 0 : index
      %54 = vector.load %arg18[%c0_28, %c0_29] : memref<128x2xf32, #tpu.memory_space<vmem>>, vector<128x2xf32>
      %cst_30 = arith.constant dense<0.000000e+00> : vector<2x2xf32>
      %55 = tpu.matmul %53, %54, %cst_30 {dimension_numbers = #tpu.dot_dimension_numbers<[1], [0], [0], [1], [0, 0, 1, 1], [], []>} : vector<2x128xf32>, vector<128x2xf32>, vector<2x2xf32> -> vector<2x2xf32>
      %c0_31 = arith.constant 0 : index
      %c0_32 = arith.constant 0 : index
      %56 = vector.load %arg19[%c0_31, %c0_32] : memref<1x2xf32, #tpu.memory_space<vmem>>, vector<1x2xf32>
      %57 = vector.broadcast %56 : vector<1x2xf32> to vector<2x2xf32>
      %58 = arith.addf %55, %57 : vector<2x2xf32>
      %cst_33 = arith.constant dense<0xFF800000> : vector<2xf32>
      %59 = vector.multi_reduction <maximumf>, %58, %cst_33 [1] : vector<2x2xf32> to vector<2xf32>
      %60 = vector.shape_cast %59 : vector<2xf32> to vector<2x1xf32>
      %61 = vector.broadcast %60 : vector<2x1xf32> to vector<2x2xf32>
      %62 = arith.subf %58, %61 : vector<2x2xf32>
      %63 = math.exp %62 : vector<2x2xf32>
      %cst_34 = arith.constant dense<0.000000e+00> : vector<2xf32>
      %64 = vector.multi_reduction <add>, %63, %cst_34 [1] : vector<2x2xf32> to vector<2xf32>
      %65 = vector.shape_cast %64 : vector<2xf32> to vector<2x1xf32>
      %66 = math.log %65 : vector<2x1xf32>
      %67 = vector.broadcast %66 : vector<2x1xf32> to vector<2x2xf32>
      %68 = arith.subf %62, %67 : vector<2x2xf32>
      %c0_35 = arith.constant 0 : index
      %c0_36 = arith.constant 0 : index
      %69 = vector.load %arg20[%c0_35, %c0_36] : memref<2x2xf32, #tpu.memory_space<vmem>>, vector<2x2xf32>
      tpu.vector_store %arg20[%c0_35, %c0_36], %68 {strides = array<i32>} : memref<2x2xf32, #tpu.memory_space<vmem>>, vector<2x2xf32>,
      %c0_37 = arith.constant 0 : index
      %c0_38 = arith.constant 0 : index
      %70 = vector.load %arg7[%c0_37, %c0_38] : memref<2x2xf32, #tpu.memory_space<vmem>>, vector<2x2xf32>
      %71 = arith.mulf %68, %70 : vector<2x2xf32>
      %72 = vector.shape_cast %71 : vector<2x2xf32> to vector<1x2x2xf32>
      %cst_39 = arith.constant dense<0.000000e+00> : vector<1xf32>
      %73 = vector.multi_reduction <add>, %72, %cst_39 [1, 2] : vector<1x2x2xf32> to vector<1xf32>
      %74 = vector.shape_cast %73 : vector<1xf32> to vector<1x1x1xf32>
      %75 = vector.extract %74[0, 0, 0] : f32 from vector<1x1x1xf32>
      %76 = vector.broadcast %75 : f32 to vector<1x1xf32>
      %cst_40 = arith.constant 0.000000e+00 : f32
      %77 = vector.broadcast %cst_40 : f32 to vector<1x1xf32>
      %78 = arith.subf %77, %76 : vector<1x1xf32>
      %cst_41 = arith.constant 2.000000e+00 : f32
      %79 = vector.broadcast %cst_41 : f32 to vector<1x1xf32>
      %80 = arith.divf %78, %79 : vector<1x1xf32>
      %c0_42 = arith.constant 0 : index
      %c0_43 = arith.constant 0 : index
      %81 = vector.load %arg21[%c0_42, %c0_43] : memref<1x1xf32, #tpu.memory_space<vmem>>, vector<1x1xf32>
      tpu.vector_store %arg21[%c0_42, %c0_43], %80 {strides = array<i32>} : memref<1x1xf32, #tpu.memory_space<vmem>>, vector<1x1xf32>,
      %82 = tpu.iota {dimensions = array<i32: 1>} : vector<2x2xi32>
      %83 = arith.sitofp %82 : vector<2x2xi32> to vector<2x2xf32>
      %cst_44 = arith.constant dense<0xFF800000> : vector<2xf32>
      %84 = vector.multi_reduction <maximumf>, %68, %cst_44 [1] : vector<2x2xf32> to vector<2xf32>
      %85 = vector.shape_cast %84 : vector<2xf32> to vector<2x1xf32>
      %86 = vector.broadcast %85 : vector<2x1xf32> to vector<2x2xf32>
      %87 = arith.cmpf oge, %68, %86 : vector<2x2xf32>
      %cst_45 = arith.constant 2.000000e+00 : f32
      %88 = vector.broadcast %cst_45 : f32 to vector<2x2xf32>
      %89 = arith.select %87, %83, %88 : vector<2x2xi1>, vector<2x2xf32>
      %cst_46 = arith.constant dense<0x7F800000> : vector<2xf32>
      %90 = vector.multi_reduction <minimumf>, %89, %cst_46 [1] : vector<2x2xf32> to vector<2xf32>
      %91 = vector.shape_cast %90 : vector<2xf32> to vector<2x1xf32>
      %92 = arith.mulf %70, %83 : vector<2x2xf32>
      %cst_47 = arith.constant dense<0.000000e+00> : vector<2xf32>
      %93 = vector.multi_reduction <add>, %92, %cst_47 [1] : vector<2x2xf32> to vector<2xf32>
      %94 = vector.shape_cast %93 : vector<2xf32> to vector<2x1xf32>
      %95 = arith.cmpf oeq, %91, %94 : vector<2x1xf32>
      %96 = arith.extui %95 : vector<2x1xi1> to vector<2x1xi32>
      %97 = arith.sitofp %96 : vector<2x1xi32> to vector<2x1xf32>
      %cst_48 = arith.constant dense<0.000000e+00> : vector<1xf32>
      %98 = vector.multi_reduction <add>, %97, %cst_48 [0] : vector<2x1xf32> to vector<1xf32>
      %99 = vector.shape_cast %98 : vector<1xf32> to vector<1x1xf32>
      %cst_49 = arith.constant 2.000000e+00 : f32
      %100 = vector.broadcast %cst_49 : f32 to vector<1x1xf32>
      %101 = arith.divf %99, %100 : vector<1x1xf32>
      %c0_50 = arith.constant 0 : index
      %c0_51 = arith.constant 0 : index
      %102 = vector.load %arg22[%c0_50, %c0_51] : memref<1x1xf32, #tpu.memory_space<vmem>>, vector<1x1xf32>
      tpu.vector_store %arg22[%c0_50, %c0_51], %101 {strides = array<i32>} : memref<1x1xf32, #tpu.memory_space<vmem>>, vector<1x1xf32>,
    } else {
    }
    return
  }
  func.func @transform_0(%arg0: i32, %arg1: i32) -> (i32, i32) {
    %c0_i32 = arith.constant 0 : i32
    %0 = arith.cmpi eq, %arg0, %c0_i32 : i32
    %c0_i32_0 = arith.constant 0 : i32
    %1 = arith.select %0, %arg1, %c0_i32_0 : i32
    %c0_i32_1 = arith.constant 0 : i32
    %c0_i32_2 = arith.constant 0 : i32
    return %1, %c0_i32_1 : i32, i32
  }
  func.func @transform_1(%arg0: i32, %arg1: i32) -> (i32, i32) {
    %c0_i32 = arith.constant 0 : i32
    %c0_i32_0 = arith.constant 0 : i32
    %c0_i32_1 = arith.constant 0 : i32
    return %c0_i32, %c0_i32_0 : i32, i32
  }
  func.func @transform_2(%arg0: i32, %arg1: i32) -> (i32, i32) {
    %c0_i32 = arith.constant 0 : i32
    %0 = arith.cmpi sgt, %arg0, %c0_i32 : i32
    %c0_i32_0 = arith.constant 0 : i32
    %1 = arith.select %0, %arg1, %c0_i32_0 : i32
    %c0_i32_1 = arith.constant 0 : i32
    %c0_i32_2 = arith.constant 0 : i32
    return %1, %c0_i32_1 : i32, i32
  }
  func.func @transform_3(%arg0: i32, %arg1: i32) -> (i32, i32) {
    %c0_i32 = arith.constant 0 : i32
    %0 = arith.cmpi eq, %arg0, %c0_i32 : i32
    %c0_i32_0 = arith.constant 0 : i32
    %1 = arith.select %0, %arg1, %c0_i32_0 : i32
    %c0_i32_1 = arith.constant 0 : i32
    %c0_i32_2 = arith.constant 0 : i32
    return %1, %c0_i32_1 : i32, i32
  }
  func.func @transform_4(%arg0: i32, %arg1: i32) -> (i32, i32) {
    %c3_i32 = arith.constant 3 : i32
    %0 = arith.cmpi eq, %arg0, %c3_i32 : i32
    %c0_i32 = arith.constant 0 : i32
    %1 = arith.select %0, %arg1, %c0_i32 : i32
    %c0_i32_0 = arith.constant 0 : i32
    %c0_i32_1 = arith.constant 0 : i32
    return %c0_i32_0, %1 : i32, i32
  }
  func.func @transform_5(%arg0: i32, %arg1: i32) -> (i32, i32) {
    %c0_i32 = arith.constant 0 : i32
    %c0_i32_0 = arith.constant 0 : i32
    %c0_i32_1 = arith.constant 0 : i32
    return %c0_i32, %c0_i32_0 : i32, i32
  }
  func.func @transform_6(%arg0: i32, %arg1: i32) -> (i32, i32) {
    %c0_i32 = arith.constant 0 : i32
    %c0_i32_0 = arith.constant 0 : i32
    %c0_i32_1 = arith.constant 0 : i32
    return %c0_i32, %c0_i32_0 : i32, i32
  }
  func.func @transform_7(%arg0: i32, %arg1: i32) -> (i32, i32) {
    %c0_i32 = arith.constant 0 : i32
    %c0_i32_0 = arith.constant 0 : i32
    %c0_i32_1 = arith.constant 0 : i32
    return %c0_i32, %c0_i32_0 : i32, i32
  }
  func.func @transform_8(%arg0: i32, %arg1: i32) -> (i32, i32) {
    %c0_i32 = arith.constant 0 : i32
    %c0_i32_0 = arith.constant 0 : i32
    %c0_i32_1 = arith.constant 0 : i32
    return %c0_i32, %c0_i32_0 : i32, i32
  }
  func.func @transform_9(%arg0: i32, %arg1: i32) -> (i32, i32) {
    %c0_i32 = arith.constant 0 : i32
    %c0_i32_0 = arith.constant 0 : i32
    %c0_i32_1 = arith.constant 0 : i32
    return %c0_i32, %c0_i32_0 : i32, i32
  }
  func.func @transform_10(%arg0: i32, %arg1: i32) -> (i32, i32) {
    %c0_i32 = arith.constant 0 : i32
    %c0_i32_0 = arith.constant 0 : i32
    %c0_i32_1 = arith.constant 0 : i32
    return %c0_i32, %c0_i32_0 : i32, i32
  }
  func.func @transform_11(%arg0: i32, %arg1: i32) -> (i32, i32) {
    %c0_i32 = arith.constant 0 : i32
    %c0_i32_0 = arith.constant 0 : i32
    %c0_i32_1 = arith.constant 0 : i32
    return %c0_i32, %c0_i32_0 : i32, i32
  }
  func.func @transform_12(%arg0: i32, %arg1: i32) -> (i32, i32) {
    %c0_i32 = arith.constant 0 : i32
    %c0_i32_0 = arith.constant 0 : i32
    %c0_i32_1 = arith.constant 0 : i32
    return %c0_i32, %c0_i32_0 : i32, i32
  }
  func.func @transform_13(%arg0: i32, %arg1: i32) -> (i32, i32) {
    %c0_i32 = arith.constant 0 : i32
    %c0_i32_0 = arith.constant 0 : i32
    %c0_i32_1 = arith.constant 0 : i32
    return %c0_i32, %c0_i32_0 : i32, i32
  }
  func.func @transform_14(%arg0: i32, %arg1: i32) -> (i32, i32) {
    %c0_i32 = arith.constant 0 : i32
    %c0_i32_0 = arith.constant 0 : i32
    %c0_i32_1 = arith.constant 0 : i32
    return %c0_i32, %c0_i32_0 : i32, i32
  }
  func.func @transform_15(%arg0: i32, %arg1: i32) -> (i32, i32) {
    %c0_i32 = arith.constant 0 : i32
    %c0_i32_0 = arith.constant 0 : i32
    %c0_i32_1 = arith.constant 0 : i32
    return %c0_i32, %c0_i32_0 : i32, i32
  }
  func.func @transform_16(%arg0: i32, %arg1: i32) -> (i32, i32) {
    %c0_i32 = arith.constant 0 : i32
    %c0_i32_0 = arith.constant 0 : i32
    %c0_i32_1 = arith.constant 0 : i32
    return %c0_i32, %c0_i32_0 : i32, i32
  }
  func.func @transform_17(%arg0: i32, %arg1: i32) -> (i32, i32) {
    %c0_i32 = arith.constant 0 : i32
    %c0_i32_0 = arith.constant 0 : i32
    %c0_i32_1 = arith.constant 0 : i32
    return %c0_i32, %c0_i32_0 : i32, i32
  }
  func.func @transform_18(%arg0: i32, %arg1: i32) -> (i32, i32) {
    %c0_i32 = arith.constant 0 : i32
    %c0_i32_0 = arith.constant 0 : i32
    %c0_i32_1 = arith.constant 0 : i32
    return %c0_i32, %c0_i32_0 : i32, i32
  }
  func.func @transform_19(%arg0: i32, %arg1: i32) -> (i32, i32) {
    %c0_i32 = arith.constant 0 : i32
    %c0_i32_0 = arith.constant 0 : i32
    %c0_i32_1 = arith.constant 0 : i32
    return %c0_i32, %c0_i32_0 : i32, i32
  }
  func.func @transform_20(%arg0: i32, %arg1: i32) -> (i32, i32) {
    %c0_i32 = arith.constant 0 : i32
    %c0_i32_0 = arith.constant 0 : i32
    %c0_i32_1 = arith.constant 0 : i32
    return %c0_i32, %c0_i32_0 : i32, i32
  }
}

</mosaic_0001>

<bundles_post_ra>
// kernel: tpu_custom_call.1
= control target key start
LH: loop header
LB: loop body
LE: loop exit
PB: predicated region body
PF: predicated region fallthrough
CT: control target
= control target key end

     0   :  { %s8113_s0 = inlined_call_operand.vmem [shape: f32[256,8], index: 0, kind: input, shape index: {}]   ;;  %s8114_s1 = inlined_call_operand.vmem [shape: f32[512,4], index: 1, kind: input, shape index: {}]   ;;  %s8115_s2 = inlined_call_operand.vmem [shape: bf16[256,256], index: 2, kind: input, shape index: {}]   ;;  %s8116_s3 = inlined_call_operand.vmem [shape: bf16[256,512], index: 3, kind: input, shape index: {}]   ;;  %s8117_s4 = inlined_call_operand.vmem [shape: bf16[2,256], index: 4, kind: input, shape index: {}]   ;;  %s8118_s5 = inlined_call_operand.vmem [shape: f32[2,2], index: 5, kind: input, shape index: {}]   ;;  %s8119_s6 = inlined_call_operand.vmem [shape: f32[8,128], index: 6, kind: input, shape index: {}]   ;;  %s8120_s7 = inlined_call_operand.vmem [shape: f32[1,128], index: 7, kind: input, shape index: {}]   ;;  %s8121_s8 = inlined_call_operand.vmem [shape: f32[4,128], index: 8, kind: input, shape index: {}]   ;;  %s8122_s9 = inlined_call_operand.vmem [shape: f32[1,128], index: 9, kind: input, shape index: {}]   ;;  %s8123_s10 = inlined_call_operand.vmem [shape: bf16[128,128], index: 10, kind: input, shape index: {}]   ;;  %s8124_s11 = inlined_call_operand.vmem [shape: f32[1,128], index: 11, kind: input, shape index: {}]   ;;  %s8125_s12 = inlined_call_operand.vmem [shape: bf16[128,128], index: 12, kind: input, shape index: {}]   ;;  %s8126_s13 = inlined_call_operand.vmem [shape: f32[1,128], index: 13, kind: input, shape index: {}]   ;;  %s8127_s14 = inlined_call_operand.hbm [shape: bf16[128,128], index: 14, kind: input, shape index: {}]   ;;  %s8128_s15 = inlined_call_operand.vmem [shape: f32[1,128], index: 15, kind: input, shape index: {}]   ;;  %s8129_s16 = inlined_call_operand.vmem [shape: f32[128,2], index: 16, kind: input, shape index: {}]   ;;  %s8130_s17 = inlined_call_operand.vmem [shape: f32[1,2], index: 17, kind: input, shape index: {}]   ;;  %s8131_s18 = inlined_call_operand.hbm [shape: f32[2,2], index: 18, kind: output, shape index: {0}]   ;;  %s8132_s19 = inlined_call_operand.hbm [shape: f32[1,1], index: 19, kind: output, shape index: {1}]   ;;  %s8133_s20 = inlined_call_operand.hbm [shape: f32[1,1], index: 20, kind: output, shape index: {2}]  }
   0x1   :  { %8139 = sst [smem:[#allocation22_spill]] %s8113_s0 }
   0x2   :  { %8140 = sst [smem:[#allocation23_spill]] %s8114_s1 }
   0x3   :  { %8141 = sst [smem:[#allocation24_spill]] %s8115_s2 }
   0x4   :  { %8142 = sst [smem:[#allocation25_spill]] %s8116_s3 }
   0x5   :  { %8143 = sst [smem:[#allocation26_spill]] %s8117_s4 }
   0x6   :  { %8144 = sst [smem:[#allocation27_spill]] %s8118_s5 }
   0x7   :  { %8145 = sst [smem:[#allocation28_spill]] %s8127_s14 }
   0x8   :  { %8146 = sst [smem:[#allocation29_spill]] %s8128_s15 }
   0x9   :  { %8147 = sst [smem:[#allocation30_spill]] %s8130_s17 }
   0xa   :  { %8148 = sst [smem:[#allocation31_spill]] %s8131_s18 }
   0xb   :  { %8149 = sst [smem:[#allocation32_spill]] %s8132_s19 }
   0xc   :  { %8150 = sst [smem:[#allocation33_spill]] %s8133_s20 }
   0xd   :  { %26 = vsyncpa [#allocation8], 0 }
   0xe   :  { %27 = vsyncpa [#allocation9], 0 }
   0xf   :  { %28 = vsyncpa [#allocation12], 0  ;;  %s7109_s1 = smov 0   ;;  %s7111_s22 = smov 0  }
  0x10   :  { %s7113_s23 = smov 0   ;;  %s7115_s24 = smov 0  }
  0x11   :  { %s7117_s2 = smov 0  }
  0x12 LB: > { %8151 = sst [smem:[#allocation17_spill]] %s6981_s23  ;;  %s8135_s25 = sadd.s32 4294967295, %s6989_s2   ;;  %s6989_s2 = sphi %s7117_s2, %s34_s2   ;;  %s6985_s24 = sphi %s7115_s24, %s8179_s24   ;;  %s6981_s23 = sphi %s7113_s23, %s8178_s23   ;;  %s6977_s22 = sphi %s7111_s22, %s8177_s22   ;;  %s6973_s1 = sphi %s7109_s1, %s8176_s1  }
  0x13   : > { %8152 = sst [smem:[#allocation18_spill]] %s6985_s24  ;;  %s43_s3 = sadd.s32 1, %s6981_s23 }
  0x14   : > { %8153 = sst [smem:[#allocation19_spill]] %s6989_s2  ;;  %p44_p0 = scmp.ge.s32.totalorder %s43_s3, 2 }
  0x15   : > { %s46_s26 = sadd.s32 1, %s6985_s24  ;;  %p4912_p1 = scmp.ge.s32.totalorder %s6989_s2, 1 }
  0x16   : > { %p528_p2 = scmp.lt.s32.totalorder %s6989_s2, 9  ;;  %s8181_s3 = smov (%p44_p0, %s43_s3), 0 }
  0x17   : > { %8154 = sst [smem:[#allocation20_spill]] %s8181_s3  ;;  %s8183_s26 = smov (!%p44_p0, %s46_s26), %s6985_s24 }
  0x18   : > { %p7142_p3 = pnand %p4912_p1, %p528_p2  ;;  %p48_p4 = scmp.ge.s32.totalorder %s8183_s26, 4 }
  0x19   : > { %p7148_p5 = scmp.eq.s32.totalorder %s8135_s25, 0  ;;  %s6991_s4 = smov [#allocation7]  }
  0x1a   : > { %p6572_p6 = pneg %p7142_p3  ;;  %s8185_s26 = smov (%p48_p4, %s8183_s26), 0 }
  0x1b   : > { %8157 = sst [smem:[#allocation21_spill]] %s8185_s26  ;;  %s570_s29 = sshll.u32 %s6991_s4, 4  ;;  %s571_s29 = int_to_ptr.vmem [resolvable:$true] %s570_s29 }
  0x1c   : > { %p7158_p7 = pnand %p7148_p5, %p6572_p6  ;;  %s6852_s0 = scalar_lea.vmem %s571_s29, 1024 }
  0x1d   : > { %p6853_p9 = scmp.ne.s32.totalorder %s571_s29, %s6852_s0  ;;  %p6860_p12 = scmp.lt.s32.totalorder %s571_s29, %s571_s29 }
  0x1e   : > { %p6843_p8 = pneg %p7158_p7  ;;  %p6861_p13 = scmp.lt.s32.totalorder %s6852_s0, %s6852_s0 }
  0x20   : > { %p6855_p10 = pnand %p6853_p9, %p6843_p8  ;;  %p6862_p0 = por %p6861_p13, %p6860_p12 }
  0x22   : > { %p6856_p11 = pneg %p6855_p10 }
  0x24   : > { %p6863_p1 = pnand %p6862_p0, %p6856_p11 }
  0x26   : > { %6866 = shalt.err (!%p6863_p1)
}
  0x27   : > { %s6992_s21 = smov 64   ;;  %s6993_s4 = smov 4  }
  0x28   : > { %s8159_s14 = sld [smem:[#allocation28_spill]] }
  0x2a   : > { %646 = sbr.rel (%p7142_p3) target bundleno = 3736 (0xe98), region = 92 }
  0x2e   : > { %6575 = dma.hbm_to_vmem [thread:$0]  (!%p7158_p7), %s8159_s14, 1024, %s571_s29, [#allocation8], %s6992_s21, %s6992_s21, %s6993_s4  }
  0x2f   : > { %6960 = dma.done.wait (%p7148_p5), [#allocation8], 1024  }
  0x30   : > { %6962 = vsyncadd (%p7148_p5), [#allocation8], 4294966272  ;;  %p722_p2 = scmp.eq.s32.totalorder %s6977_s22, 0  ;;  %p732_p4 = scmp.gt.s32.totalorder %s6977_s22, 0 }
  0x31   : > { %p754_p6 = scmp.eq.s32.totalorder %s6977_s22, 3  ;;  %s7179_s25 = sshll.u32 %s6973_s1, 7 }
  0x32   : > { %s723_s26 = scalar_select %p722_p2, %s6973_s1, 0 }
  0x33   : > { %s733_s27 = scalar_select %p732_p4, %s6973_s1, 0 }
  0x34   : > { %s4917_s29 = sshll.u32 %s723_s26, 4  ;;  %p764_p3 = scmp.eq.s32.totalorder %s6973_s1, 0 }
  0x35   : > { %p725_p7 = scmp.lt.s32.totalorder %s4917_s29, 31  ;;  %s4919_s28 = sshll.u32 %s733_s27, 4 }
  0x36   : > { %p735_p5 = scmp.lt.s32.totalorder %s4919_s28, 31  ;;  %p765_p8 = pnand %p764_p3, %p722_p2 }
  0x37   : > { %s8187_s29 = smov (!%p725_p7, %s4917_s29), 31  ;;  %s8160_s14 = sld [smem:[#allocation22_spill]] }
  0x38   : > { %s8189_s28 = smov (!%p735_p5, %s4919_s28), 31  ;;  %s4918_s30 = sshll.u32 %s8187_s29, 3 }
  0x39   : > { %s5314_s0 = sshll.u32 %s8187_s29, 4  ;;  %s5313_s24 = sshll.u32 %s8189_s28, 3 }
  0x3a   : > { %s8161_s18 = sld [smem:[#allocation24_spill]] }
  0x3b   : > { %s8162_s27 = sld [smem:[#allocation25_spill]] }
  0x3c   : > { %s755_s17 = scalar_select %p754_p6, %s6973_s1, 0 }
  0x3d   : > { %s7187_s3 = scalar_lea.vmem %s8160_s14, %s4918_s30  ;;  %s8163_s21 = sld [smem:[#allocation26_spill]] }
  0x3e   : > { %p756_p9 = scmp.lt.s32.totalorder %s755_s17, 1  ;;  %s8164_s23 = sld [smem:[#allocation23_spill]] (!%p765_p8) }
  0x3f   : > { %768 = sbr.rel (%p765_p8) target bundleno = 332 (0x14c), region = 100 }
  0x40   : > { %s7192_s19 = scalar_lea.vmem %s8161_s18, %s5313_s24  ;;  %s8191_s17 = smov (!%p756_p9, %s755_s17), 1 }
  0x41   : > { %s7197_s5 = scalar_lea.vmem %s8162_s27, %s5314_s0 }
  0x43   : > { %s7205_s14 = scalar_lea.vmem %s8163_s21, %s8191_s17 }
  0x44   : > { %v833_v0 = vld [vmem:[%s8121_s8] sm:$0xf]  ;;  %vm1034_vm0 = vcmask 1043456   ;;  %s8165_s4 = smov %s8164_s23  ;;  %vm841_vm1 = vcmask 31744  }
  0x45   : > { %v769_v1 = vld [vmem:[%s8164_s23] sm:$0xff]  ;;  %6205 = vmatprep.subr.msk.mxu0 %vm1034_vm0, %v833_v0  ;;  %6552 = vmatprep.subr.msk.mxu1 %vm1034_vm0, %v833_v0  ;;  %v770_v3 = vld [vmem:[%s8165_s4 + $0x8] sm:$0xff]  ;;  %v771_v5 = vld [vmem:[%s8165_s4 + $0x10] sm:$0xff] }
  0x46   : > { %v801_v2 = vld [vmem:[%s8165_s4 + $0x100] sm:$0xff]  ;;  %v802_v4 = vld [vmem:[%s8165_s4 + $0x108] sm:$0xff]  ;;  %6206 = vmatpush3.msk.msra.mxu0 %vm1034_vm0, %v833_v0  ;;  %6553 = vmatpush3.msk.msra.mxu1 %vm1034_vm0, %v833_v0  ;;  %v803_v6 = vld [vmem:[%s8165_s4 + $0x110] sm:$0xff] }
  0x47   : > { %6207 = vmatprep.mubr.msk.f32.mxu0 %vm841_vm1, %v769_v1  ;;  %6255 = vmatprep.mubr.msk.f32.mxu1 %vm841_vm1, %v801_v2  ;;  %v772_v7 = vld [vmem:[%s8165_s4 + $0x18] sm:$0xff]  ;;  %v773_v9 = vld [vmem:[%s8165_s4 + $0x20] sm:$0xff]  ;;  %v774_v11 = vld [vmem:[%s8165_s4 + $0x28] sm:$0xff]  ;;  %v6994_v1 = vmov 0.0  }
  0x48   : > { %6208 = vmatmul.mubr.msk.f32.vlgmr.msra.gmra.mxu0 %vm841_vm1, %v770_v3  ;;  %6256 = vmatmul.mubr.msk.f32.vlgmr.msra.gmra.mxu1 %vm841_vm1, %v802_v4  ;;  %v804_v8 = vld [vmem:[%s8165_s4 + $0x118] sm:$0xff]  ;;  %v805_v10 = vld [vmem:[%s8165_s4 + $0x120] sm:$0xff]  ;;  %v806_v12 = vld [vmem:[%s8165_s4 + $0x128] sm:$0xff]  ;;  %1743 = vst [vmem:[#allocation6] sm:$0x3] %v6994_v1 }
  0x49   : > { %6210 = vmatprep.mubr.msk.f32.mxu0 %vm841_vm1, %v771_v5  ;;  %6258 = vmatprep.mubr.msk.f32.mxu1 %vm841_vm1, %v803_v6  ;;  %v775_v13 = vld [vmem:[%s8165_s4 + $0x30] sm:$0xff]  ;;  %v776_v15 = vld [vmem:[%s8165_s4 + $0x38] sm:$0xff]  ;;  %v777_v17 = vld [vmem:[%s8165_s4 + $0x40] sm:$0xff] }
  0x4a   : > { %v807_v14 = vld [vmem:[%s8165_s4 + $0x130] sm:$0xff]  ;;  %v808_v16 = vld [vmem:[%s8165_s4 + $0x138] sm:$0xff]  ;;  %v809_v18 = vld [vmem:[%s8165_s4 + $0x140] sm:$0xff] }
  0x4b   : > { %v778_v19 = vld [vmem:[%s8165_s4 + $0x48] sm:$0xff]  ;;  %v779_v21 = vld [vmem:[%s8165_s4 + $0x50] sm:$0xff]  ;;  %v780_v23 = vld [vmem:[%s8165_s4 + $0x58] sm:$0xff] }
  0x4c   : > { %6211 = vmatmul.mubr.msk.f32.gmra.mxu0 %vm841_vm1, %v772_v7  ;;  %6259 = vmatmul.mubr.msk.f32.gmra.mxu1 %vm841_vm1, %v804_v8  ;;  %v810_v20 = vld [vmem:[%s8165_s4 + $0x148] sm:$0xff]  ;;  %v811_v22 = vld [vmem:[%s8165_s4 + $0x150] sm:$0xff]  ;;  %v812_v24 = vld [vmem:[%s8165_s4 + $0x158] sm:$0xff] }
  0x4d   : > { %6213 = vmatprep.mubr.msk.f32.mxu0 %vm841_vm1, %v773_v9  ;;  %6261 = vmatprep.mubr.msk.f32.mxu1 %vm841_vm1, %v805_v10  ;;  %v781_v25 = vld [vmem:[%s8165_s4 + $0x60] sm:$0xff]  ;;  %v782_v27 = vld [vmem:[%s8165_s4 + $0x68] sm:$0xff]  ;;  %v783_v29 = vld [vmem:[%s8165_s4 + $0x70] sm:$0xff] }
  0x4e   : > { %v813_v26 = vld [vmem:[%s8165_s4 + $0x160] sm:$0xff]  ;;  %v814_v28 = vld [vmem:[%s8165_s4 + $0x168] sm:$0xff]  ;;  %v815_v30 = vld [vmem:[%s8165_s4 + $0x170] sm:$0xff] }
  0x4f   : > { %v784_v31 = vld [vmem:[%s8165_s4 + $0x78] sm:$0xff]  ;;  %v785_v33 = vld [vmem:[%s8165_s4 + $0x80] sm:$0xff]  ;;  %v786_v35 = vld [vmem:[%s8165_s4 + $0x88] sm:$0xff] }
  0x50   : > { %6214 = vmatmul.mubr.msk.f32.gmra.mxu0 %vm841_vm1, %v774_v11  ;;  %6262 = vmatmul.mubr.msk.f32.gmra.mxu1 %vm841_vm1, %v806_v12  ;;  %v816_v32 = vld [vmem:[%s8165_s4 + $0x178] sm:$0xff]  ;;  %v817_v34 = vld [vmem:[%s8165_s4 + $0x180] sm:$0xff]  ;;  %v818_v36 = vld [vmem:[%s8165_s4 + $0x188] sm:$0xff] }
  0x51   : > { %6216 = vmatprep.mubr.msk.f32.mxu0 %vm841_vm1, %v775_v13  ;;  %6264 = vmatprep.mubr.msk.f32.mxu1 %vm841_vm1, %v807_v14  ;;  %v787_v37 = vld [vmem:[%s8165_s4 + $0x90] sm:$0xff]  ;;  %v788_v39 = vld [vmem:[%s8165_s4 + $0x98] sm:$0xff]  ;;  %v789_v41 = vld [vmem:[%s8165_s4 + $0xa0] sm:$0xff] }
  0x52   : > { %v819_v38 = vld [vmem:[%s8165_s4 + $0x190] sm:$0xff]  ;;  %v820_v40 = vld [vmem:[%s8165_s4 + $0x198] sm:$0xff]  ;;  %v821_v42 = vld [vmem:[%s8165_s4 + $0x1a0] sm:$0xff] }
  0x53   : > { %v790_v43 = vld [vmem:[%s8165_s4 + $0xa8] sm:$0xff]  ;;  %v791_v45 = vld [vmem:[%s8165_s4 + $0xb0] sm:$0xff]  ;;  %v792_v47 = vld [vmem:[%s8165_s4 + $0xb8] sm:$0xff] }
  0x54   : > { %6217 = vmatmul.mubr.msk.f32.gmra.mxu0 %vm841_vm1, %v776_v15  ;;  %6265 = vmatmul.mubr.msk.f32.gmra.mxu1 %vm841_vm1, %v808_v16  ;;  %v822_v44 = vld [vmem:[%s8165_s4 + $0x1a8] sm:$0xff]  ;;  %v823_v46 = vld [vmem:[%s8165_s4 + $0x1b0] sm:$0xff]  ;;  %v824_v48 = vld [vmem:[%s8165_s4 + $0x1b8] sm:$0xff] }
  0x55   : > { %6219 = vmatprep.mubr.msk.f32.mxu0 %vm841_vm1, %v777_v17  ;;  %6267 = vmatprep.mubr.msk.f32.mxu1 %vm841_vm1, %v809_v18  ;;  %v793_v49 = vld [vmem:[%s8165_s4 + $0xc0] sm:$0xff]  ;;  %v794_v51 = vld [vmem:[%s8165_s4 + $0xc8] sm:$0xff]  ;;  %v795_v53 = vld [vmem:[%s8165_s4 + $0xd0] sm:$0xff] }
  0x56   : > { %v825_v50 = vld [vmem:[%s8165_s4 + $0x1c0] sm:$0xff]  ;;  %v826_v52 = vld [vmem:[%s8165_s4 + $0x1c8] sm:$0xff]  ;;  %v827_v54 = vld [vmem:[%s8165_s4 + $0x1d0] sm:$0xff] }
  0x57   : > { %v796_v55 = vld [vmem:[%s8165_s4 + $0xd8] sm:$0xff]  ;;  %v797_v57 = vld [vmem:[%s8165_s4 + $0xe0] sm:$0xff]  ;;  %v798_v59 = vld [vmem:[%s8165_s4 + $0xe8] sm:$0xff] }
  0x58   : > { %6220 = vmatmul.mubr.msk.f32.gmra.mxu0 %vm841_vm1, %v778_v19  ;;  %6268 = vmatmul.mubr.msk.f32.gmra.mxu1 %vm841_vm1, %v810_v20  ;;  %v828_v56 = vld [vmem:[%s8165_s4 + $0x1d8] sm:$0xff]  ;;  %v829_v58 = vld [vmem:[%s8165_s4 + $0x1e0] sm:$0xff]  ;;  %v830_v60 = vld [vmem:[%s8165_s4 + $0x1e8] sm:$0xff] }
  0x59   : > { %6222 = vmatprep.mubr.msk.f32.mxu0 %vm841_vm1, %v779_v21  ;;  %6270 = vmatprep.mubr.msk.f32.mxu1 %vm841_vm1, %v811_v22  ;;  %v799_v61 = vld [vmem:[%s8165_s4 + $0xf0] sm:$0xff]  ;;  %v800_v63 = vld [vmem:[%s8165_s4 + $0xf8] sm:$0xff]  ;;  %v7469_v3 = vld [vmem:[%s8122_s9] ss:$0 sm:$0xff] }
  0x5a   : > { %v831_v62 = vld [vmem:[%s8165_s4 + $0x1f0] sm:$0xff]  ;;  %v832_v0 = vld [vmem:[%s8165_s4 + $0x1f8] sm:$0xff] }
  0x5c   : > { %6223 = vmatmul.mubr.msk.f32.gmra.mxu0 %vm841_vm1, %v780_v23  ;;  %6271 = vmatmul.mubr.msk.f32.gmra.mxu1 %vm841_vm1, %v812_v24 }
  0x5d   : > { %6225 = vmatprep.mubr.msk.f32.mxu0 %vm841_vm1, %v781_v25  ;;  %6273 = vmatprep.mubr.msk.f32.mxu1 %vm841_vm1, %v813_v26 }
  0x60   : > { %6226 = vmatmul.mubr.msk.f32.gmra.mxu0 %vm841_vm1, %v782_v27  ;;  %6274 = vmatmul.mubr.msk.f32.gmra.mxu1 %vm841_vm1, %v814_v28 }
  0x61   : > { %6228 = vmatprep.mubr.msk.f32.mxu0 %vm841_vm1, %v783_v29  ;;  %6276 = vmatprep.mubr.msk.f32.mxu1 %vm841_vm1, %v815_v30 }
  0x64   : > { %6229 = vmatmul.mubr.msk.f32.gmra.mxu0 %vm841_vm1, %v784_v31  ;;  %6277 = vmatmul.mubr.msk.f32.gmra.mxu1 %vm841_vm1, %v816_v32 }
  0x65   : > { %6231 = vmatprep.mubr.msk.f32.mxu0 %vm841_vm1, %v785_v33  ;;  %6279 = vmatprep.mubr.msk.f32.mxu1 %vm841_vm1, %v817_v34 }
  0x68   : > { %6232 = vmatmul.mubr.msk.f32.gmra.mxu0 %vm841_vm1, %v786_v35  ;;  %6280 = vmatmul.mubr.msk.f32.gmra.mxu1 %vm841_vm1, %v818_v36 }
  0x69   : > { %6234 = vmatprep.mubr.msk.f32.mxu0 %vm841_vm1, %v787_v37  ;;  %6282 = vmatprep.mubr.msk.f32.mxu1 %vm841_vm1, %v819_v38 }
  0x6c   : > { %6235 = vmatmul.mubr.msk.f32.gmra.mxu0 %vm841_vm1, %v788_v39  ;;  %6283 = vmatmul.mubr.msk.f32.gmra.mxu1 %vm841_vm1, %v820_v40 }
  0x6d   : > { %6237 = vmatprep.mubr.msk.f32.mxu0 %vm841_vm1, %v789_v41  ;;  %6285 = vmatprep.mubr.msk.f32.mxu1 %vm841_vm1, %v821_v42 }
  0x70   : > { %6238 = vmatmul.mubr.msk.f32.gmra.mxu0 %vm841_vm1, %v790_v43  ;;  %6286 = vmatmul.mubr.msk.f32.gmra.mxu1 %vm841_vm1, %v822_v44 }
  0x71   : > { %6240 = vmatprep.mubr.msk.f32.mxu0 %vm841_vm1, %v791_v45  ;;  %6288 = vmatprep.mubr.msk.f32.mxu1 %vm841_vm1, %v823_v46 }
  0x74   : > { %6241 = vmatmul.mubr.msk.f32.gmra.mxu0 %vm841_vm1, %v792_v47  ;;  %6289 = vmatmul.mubr.msk.f32.gmra.mxu1 %vm841_vm1, %v824_v48 }
  0x75   : > { %6243 = vmatprep.mubr.msk.f32.mxu0 %vm841_vm1, %v793_v49  ;;  %6291 = vmatprep.mubr.msk.f32.mxu1 %vm841_vm1, %v825_v50 }
  0x78   : > { %6244 = vmatmul.mubr.msk.f32.gmra.mxu0 %vm841_vm1, %v794_v51  ;;  %6292 = vmatmul.mubr.msk.f32.gmra.mxu1 %vm841_vm1, %v826_v52 }
  0x79   : > { %6246 = vmatprep.mubr.msk.f32.mxu0 %vm841_vm1, %v795_v53  ;;  %6294 = vmatprep.mubr.msk.f32.mxu1 %vm841_vm1, %v827_v54 }
  0x7c   : > { %6247 = vmatmul.mubr.msk.f32.gmra.mxu0 %vm841_vm1, %v796_v55  ;;  %6295 = vmatmul.mubr.msk.f32.gmra.mxu1 %vm841_vm1, %v828_v56 }
  0x7d   : > { %6249 = vmatprep.mubr.msk.f32.mxu0 %vm841_vm1, %v797_v57  ;;  %6297 = vmatprep.mubr.msk.f32.mxu1 %vm841_vm1, %v829_v58 }
  0x80   : > { %6250 = vmatmul.mubr.msk.f32.gmra.mxu0 %vm841_vm1, %v798_v59  ;;  %6298 = vmatmul.mubr.msk.f32.gmra.mxu1 %vm841_vm1, %v830_v60 }
  0x81   : > { %6252 = vmatprep.mubr.msk.f32.mxu0 %vm841_vm1, %v799_v61  ;;  %6300 = vmatprep.mubr.msk.f32.mxu1 %vm841_vm1, %v831_v62 }
  0x84   : > { %6253 = vmatmul.mubr.msk.f32.gmra.mxu0 %vm841_vm1, %v800_v63  ;;  %6301 = vmatmul.mubr.msk.f32.gmra.mxu1 %vm841_vm1, %v832_v0 }
 0x108   : > { %v6209_v2 = vpop.f32.mrf.mxu0  ;;  %v6257_v4 = vpop.f32.mrf.mxu1 }
 0x109   : > { %v1110_v7 = vadd.f32 %v6209_v2, %v7469_v3  ;;  %v1270_v8 = vadd.f32 %v6257_v4, %v7469_v3 }
 0x10a   : > { %v1104_v5 = vpop.f32.mrf.mxu0  ;;  %v1264_v6 = vpop.f32.mrf.mxu1 }
 0x10b   : > { %v1105_v9 = vadd.f32 %v7469_v3, %v1104_v5  ;;  %v1265_v10 = vadd.f32 %v7469_v3, %v1264_v6 }
 0x10c   : > { %v6212_v11 = vpop.f32.mrf.mxu0  ;;  %v6260_v12 = vpop.f32.mrf.mxu1 }
 0x10d   : > { %v5430_v13 = vpack.c.bf16 %v1110_v7, %v1105_v9  ;;  %v5510_v14 = vpack.c.bf16 %v1270_v8, %v1265_v10  ;;  %v1120_v17 = vadd.f32 %v6212_v11, %v7469_v3  ;;  %v1280_v18 = vadd.f32 %v6260_v12, %v7469_v3 }
 0x10e   : > { %v1114_v15 = vpop.f32.mrf.mxu0  ;;  %v1274_v16 = vpop.f32.mrf.mxu1 }
 0x10f   : > { %5431 = vst [vmem:[#allocation2] sm:$0xff] %v5430_v13   ;;  %5722 = vst [vmem:[#allocation2 + $0x80] sm:$0xff] %v5510_v14   ;;  %v1115_v19 = vadd.f32 %v7469_v3, %v1114_v15  ;;  %v1275_v20 = vadd.f32 %v7469_v3, %v1274_v16 }
 0x110   : > { %v6215_v21 = vpop.f32.mrf.mxu0  ;;  %v6263_v22 = vpop.f32.mrf.mxu1 }
 0x111   : > { %v5435_v23 = vpack.c.bf16 %v1120_v17, %v1115_v19  ;;  %v5515_v24 = vpack.c.bf16 %v1280_v18, %v1275_v20  ;;  %v1130_v27 = vadd.f32 %v6215_v21, %v7469_v3  ;;  %v1290_v28 = vadd.f32 %v6263_v22, %v7469_v3 }
 0x112   : > { %v1124_v25 = vpop.f32.mrf.mxu0  ;;  %v1284_v26 = vpop.f32.mrf.mxu1 }
 0x113   : > { %5707 = vst [vmem:[#allocation2 + $0x8] sm:$0xff] %v5435_v23   ;;  %5723 = vst [vmem:[#allocation2 + $0x88] sm:$0xff] %v5515_v24   ;;  %v1125_v29 = vadd.f32 %v7469_v3, %v1124_v25  ;;  %v1285_v30 = vadd.f32 %v7469_v3, %v1284_v26 }
 0x114   : > { %v6218_v31 = vpop.f32.mrf.mxu0  ;;  %v6266_v32 = vpop.f32.mrf.mxu1 }
 0x115   : > { %v5440_v33 = vpack.c.bf16 %v1130_v27, %v1125_v29  ;;  %v5520_v34 = vpack.c.bf16 %v1290_v28, %v1285_v30  ;;  %v1140_v37 = vadd.f32 %v6218_v31, %v7469_v3  ;;  %v1300_v38 = vadd.f32 %v6266_v32, %v7469_v3 }
 0x116   : > { %v1134_v35 = vpop.f32.mrf.mxu0  ;;  %v1294_v36 = vpop.f32.mrf.mxu1 }
 0x117   : > { %5708 = vst [vmem:[#allocation2 + $0x10] sm:$0xff] %v5440_v33   ;;  %5724 = vst [vmem:[#allocation2 + $0x90] sm:$0xff] %v5520_v34   ;;  %v1135_v39 = vadd.f32 %v7469_v3, %v1134_v35  ;;  %v1295_v40 = vadd.f32 %v7469_v3, %v1294_v36 }
 0x118   : > { %v6221_v41 = vpop.f32.mrf.mxu0  ;;  %v6269_v42 = vpop.f32.mrf.mxu1 }
 0x119   : > { %v5445_v43 = vpack.c.bf16 %v1140_v37, %v1135_v39  ;;  %v5525_v44 = vpack.c.bf16 %v1300_v38, %v1295_v40  ;;  %v1150_v47 = vadd.f32 %v6221_v41, %v7469_v3  ;;  %v1310_v48 = vadd.f32 %v6269_v42, %v7469_v3 }
 0x11a   : > { %v1144_v45 = vpop.f32.mrf.mxu0  ;;  %v1304_v46 = vpop.f32.mrf.mxu1 }
 0x11b   : > { %5709 = vst [vmem:[#allocation2 + $0x18] sm:$0xff] %v5445_v43   ;;  %5725 = vst [vmem:[#allocation2 + $0x98] sm:$0xff] %v5525_v44   ;;  %v1145_v49 = vadd.f32 %v7469_v3, %v1144_v45  ;;  %v1305_v50 = vadd.f32 %v7469_v3, %v1304_v46 }
 0x11c   : > { %v6224_v51 = vpop.f32.mrf.mxu0  ;;  %v6272_v52 = vpop.f32.mrf.mxu1 }
 0x11d   : > { %v5450_v53 = vpack.c.bf16 %v1150_v47, %v1145_v49  ;;  %v5530_v54 = vpack.c.bf16 %v1310_v48, %v1305_v50  ;;  %v1160_v57 = vadd.f32 %v6224_v51, %v7469_v3  ;;  %v1320_v58 = vadd.f32 %v6272_v52, %v7469_v3 }
 0x11e   : > { %v1154_v55 = vpop.f32.mrf.mxu0  ;;  %v1314_v56 = vpop.f32.mrf.mxu1 }
 0x11f   : > { %5710 = vst [vmem:[#allocation2 + $0x20] sm:$0xff] %v5450_v53   ;;  %5726 = vst [vmem:[#allocation2 + $0xa0] sm:$0xff] %v5530_v54   ;;  %v1155_v59 = vadd.f32 %v7469_v3, %v1154_v55  ;;  %v1315_v60 = vadd.f32 %v7469_v3, %v1314_v56 }
 0x120   : > { %v6227_v61 = vpop.f32.mrf.mxu0  ;;  %v6275_v62 = vpop.f32.mrf.mxu1 }
 0x121   : > { %v5455_v63 = vpack.c.bf16 %v1160_v57, %v1155_v59  ;;  %v5535_v0 = vpack.c.bf16 %v1320_v58, %v1315_v60  ;;  %v1170_v4 = vadd.f32 %v6227_v61, %v7469_v3  ;;  %v1330_v5 = vadd.f32 %v6275_v62, %v7469_v3 }
 0x122   : > { %v1164_v1 = vpop.f32.mrf.mxu0  ;;  %v1324_v2 = vpop.f32.mrf.mxu1 }
 0x123   : > { %5711 = vst [vmem:[#allocation2 + $0x28] sm:$0xff] %v5455_v63   ;;  %5727 = vst [vmem:[#allocation2 + $0xa8] sm:$0xff] %v5535_v0   ;;  %v1165_v6 = vadd.f32 %v7469_v3, %v1164_v1  ;;  %v1325_v7 = vadd.f32 %v7469_v3, %v1324_v2 }
 0x124   : > { %v6230_v8 = vpop.f32.mrf.mxu0  ;;  %v6278_v9 = vpop.f32.mrf.mxu1 }
 0x125   : > { %v5460_v10 = vpack.c.bf16 %v1170_v4, %v1165_v6  ;;  %v5540_v11 = vpack.c.bf16 %v1330_v5, %v1325_v7  ;;  %v1180_v14 = vadd.f32 %v6230_v8, %v7469_v3  ;;  %v1340_v15 = vadd.f32 %v6278_v9, %v7469_v3 }
 0x126   : > { %v1174_v12 = vpop.f32.mrf.mxu0  ;;  %v1334_v13 = vpop.f32.mrf.mxu1 }
 0x127   : > { %5712 = vst [vmem:[#allocation2 + $0x30] sm:$0xff] %v5460_v10   ;;  %5728 = vst [vmem:[#allocation2 + $0xb0] sm:$0xff] %v5540_v11   ;;  %v1175_v16 = vadd.f32 %v7469_v3, %v1174_v12  ;;  %v1335_v17 = vadd.f32 %v7469_v3, %v1334_v13 }
 0x128   : > { %v6233_v18 = vpop.f32.mrf.mxu0  ;;  %v6281_v19 = vpop.f32.mrf.mxu1 }
 0x129   : > { %v5465_v20 = vpack.c.bf16 %v1180_v14, %v1175_v16  ;;  %v5545_v21 = vpack.c.bf16 %v1340_v15, %v1335_v17  ;;  %v1190_v24 = vadd.f32 %v6233_v18, %v7469_v3  ;;  %v1350_v25 = vadd.f32 %v6281_v19, %v7469_v3 }
 0x12a   : > { %v1184_v22 = vpop.f32.mrf.mxu0  ;;  %v1344_v23 = vpop.f32.mrf.mxu1 }
 0x12b   : > { %5713 = vst [vmem:[#allocation2 + $0x38] sm:$0xff] %v5465_v20   ;;  %5729 = vst [vmem:[#allocation2 + $0xb8] sm:$0xff] %v5545_v21   ;;  %v1185_v26 = vadd.f32 %v7469_v3, %v1184_v22  ;;  %v1345_v27 = vadd.f32 %v7469_v3, %v1344_v23 }
 0x12c   : > { %v6236_v28 = vpop.f32.mrf.mxu0  ;;  %v6284_v29 = vpop.f32.mrf.mxu1 }
 0x12d   : > { %v5470_v30 = vpack.c.bf16 %v1190_v24, %v1185_v26  ;;  %v5550_v31 = vpack.c.bf16 %v1350_v25, %v1345_v27  ;;  %v1200_v34 = vadd.f32 %v6236_v28, %v7469_v3  ;;  %v1360_v35 = vadd.f32 %v6284_v29, %v7469_v3 }
 0x12e   : > { %v1194_v32 = vpop.f32.mrf.mxu0  ;;  %v1354_v33 = vpop.f32.mrf.mxu1 }
 0x12f   : > { %5714 = vst [vmem:[#allocation2 + $0x40] sm:$0xff] %v5470_v30   ;;  %5730 = vst [vmem:[#allocation2 + $0xc0] sm:$0xff] %v5550_v31   ;;  %v1195_v36 = vadd.f32 %v7469_v3, %v1194_v32  ;;  %v1355_v37 = vadd.f32 %v7469_v3, %v1354_v33 }
 0x130   : > { %v6239_v38 = vpop.f32.mrf.mxu0  ;;  %v6287_v39 = vpop.f32.mrf.mxu1 }
 0x131   : > { %v5475_v40 = vpack.c.bf16 %v1200_v34, %v1195_v36  ;;  %v5555_v41 = vpack.c.bf16 %v1360_v35, %v1355_v37  ;;  %v1210_v44 = vadd.f32 %v6239_v38, %v7469_v3  ;;  %v1370_v45 = vadd.f32 %v6287_v39, %v7469_v3 }
 0x132   : > { %v1204_v42 = vpop.f32.mrf.mxu0  ;;  %v1364_v43 = vpop.f32.mrf.mxu1 }
 0x133   : > { %5715 = vst [vmem:[#allocation2 + $0x48] sm:$0xff] %v5475_v40   ;;  %5731 = vst [vmem:[#allocation2 + $0xc8] sm:$0xff] %v5555_v41   ;;  %v1205_v46 = vadd.f32 %v7469_v3, %v1204_v42  ;;  %v1365_v47 = vadd.f32 %v7469_v3, %v1364_v43 }
 0x134   : > { %v6242_v48 = vpop.f32.mrf.mxu0  ;;  %v6290_v49 = vpop.f32.mrf.mxu1 }
 0x135   : > { %v5480_v50 = vpack.c.bf16 %v1210_v44, %v1205_v46  ;;  %v5560_v51 = vpack.c.bf16 %v1370_v45, %v1365_v47  ;;  %v1220_v54 = vadd.f32 %v6242_v48, %v7469_v3  ;;  %v1380_v55 = vadd.f32 %v6290_v49, %v7469_v3 }
 0x136   : > { %v1214_v52 = vpop.f32.mrf.mxu0  ;;  %v1374_v53 = vpop.f32.mrf.mxu1 }
 0x137   : > { %5716 = vst [vmem:[#allocation2 + $0x50] sm:$0xff] %v5480_v50   ;;  %5732 = vst [vmem:[#allocation2 + $0xd0] sm:$0xff] %v5560_v51   ;;  %v1215_v56 = vadd.f32 %v7469_v3, %v1214_v52  ;;  %v1375_v57 = vadd.f32 %v7469_v3, %v1374_v53 }
 0x138   : > { %v6245_v58 = vpop.f32.mrf.mxu0  ;;  %v6293_v59 = vpop.f32.mrf.mxu1 }
 0x139   : > { %v5485_v60 = vpack.c.bf16 %v1220_v54, %v1215_v56  ;;  %v5565_v61 = vpack.c.bf16 %v1380_v55, %v1375_v57  ;;  %v1230_v0 = vadd.f32 %v6245_v58, %v7469_v3  ;;  %v1390_v1 = vadd.f32 %v6293_v59, %v7469_v3 }
 0x13a   : > { %v1224_v62 = vpop.f32.mrf.mxu0  ;;  %v1384_v63 = vpop.f32.mrf.mxu1 }
 0x13b   : > { %5717 = vst [vmem:[#allocation2 + $0x58] sm:$0xff] %v5485_v60   ;;  %5733 = vst [vmem:[#allocation2 + $0xd8] sm:$0xff] %v5565_v61   ;;  %v1225_v2 = vadd.f32 %v7469_v3, %v1224_v62  ;;  %v1385_v4 = vadd.f32 %v7469_v3, %v1384_v63 }
 0x13c   : > { %v6248_v5 = vpop.f32.mrf.mxu0  ;;  %v6296_v6 = vpop.f32.mrf.mxu1 }
 0x13d   : > { %v5490_v7 = vpack.c.bf16 %v1230_v0, %v1225_v2  ;;  %v5570_v8 = vpack.c.bf16 %v1390_v1, %v1385_v4  ;;  %v1240_v11 = vadd.f32 %v6248_v5, %v7469_v3  ;;  %v1400_v12 = vadd.f32 %v6296_v6, %v7469_v3 }
 0x13e   : > { %v1234_v9 = vpop.f32.mrf.mxu0  ;;  %v1394_v10 = vpop.f32.mrf.mxu1 }
 0x13f   : > { %5718 = vst [vmem:[#allocation2 + $0x60] sm:$0xff] %v5490_v7   ;;  %5734 = vst [vmem:[#allocation2 + $0xe0] sm:$0xff] %v5570_v8   ;;  %v1235_v13 = vadd.f32 %v7469_v3, %v1234_v9  ;;  %v1395_v14 = vadd.f32 %v7469_v3, %v1394_v10 }
 0x140   : > { %v6251_v15 = vpop.f32.mrf.mxu0  ;;  %v6299_v16 = vpop.f32.mrf.mxu1 }
 0x141   : > { %v5495_v17 = vpack.c.bf16 %v1240_v11, %v1235_v13  ;;  %v5575_v18 = vpack.c.bf16 %v1400_v12, %v1395_v14  ;;  %v1250_v21 = vadd.f32 %v6251_v15, %v7469_v3  ;;  %v1410_v22 = vadd.f32 %v6299_v16, %v7469_v3 }
 0x142   : > { %v1244_v19 = vpop.f32.mrf.mxu0  ;;  %v1404_v20 = vpop.f32.mrf.mxu1 }
 0x143   : > { %5719 = vst [vmem:[#allocation2 + $0x68] sm:$0xff] %v5495_v17   ;;  %5735 = vst [vmem:[#allocation2 + $0xe8] sm:$0xff] %v5575_v18   ;;  %v1245_v23 = vadd.f32 %v7469_v3, %v1244_v19  ;;  %v1405_v24 = vadd.f32 %v7469_v3, %v1404_v20 }
 0x144   : > { %v6254_v25 = vpop.f32.mrf.mxu0  ;;  %v6302_v26 = vpop.f32.mrf.mxu1 }
 0x145   : > { %v5500_v27 = vpack.c.bf16 %v1250_v21, %v1245_v23  ;;  %v5580_v28 = vpack.c.bf16 %v1410_v22, %v1405_v24  ;;  %v1260_v31 = vadd.f32 %v6254_v25, %v7469_v3  ;;  %v1420_v32 = vadd.f32 %v6302_v26, %v7469_v3 }
 0x146   : > { %v1254_v29 = vpop.f32.mrf.mxu0  ;;  %v1414_v30 = vpop.f32.mrf.mxu1 }
 0x147   : > { %5720 = vst [vmem:[#allocation2 + $0x70] sm:$0xff] %v5500_v27   ;;  %5736 = vst [vmem:[#allocation2 + $0xf0] sm:$0xff] %v5580_v28   ;;  %v1255_v33 = vadd.f32 %v7469_v3, %v1254_v29  ;;  %v1415_v34 = vadd.f32 %v7469_v3, %v1414_v30 }
 0x149   : > { %v5505_v35 = vpack.c.bf16 %v1260_v31, %v1255_v33  ;;  %v5585_v36 = vpack.c.bf16 %v1420_v32, %v1415_v34 }
 0x14b   : > { %5721 = vst [vmem:[#allocation2 + $0x78] sm:$0xff] %v5505_v35   ;;  %5737 = vst [vmem:[#allocation2 + $0xf8] sm:$0xff] %v5585_v36  }
 0x14c PF: > { %p5056_p10 = scmp.ne.s32.totalorder %s6977_s22, 0 }
 0x14d   : > { %s2703_s27 = sshra.s32 (!%p5056_p10), %s7179_s25, 3  ;;  %s7642_s29 = scalar_lea.vmem (!%p5056_p10), [#allocation3], %s7179_s25 }
 0x14e   : > { %1746 = sbr.rel (%p5056_p10) target bundleno = 641 (0x281), region = 104  ;;  %s5154_s21 = sshll.u32 (!%p5056_p10), %s2703_s27, 2 }
 0x14f   : > { %s7649_s28 = scalar_lea.vmem (!%p5056_p10), [#allocation4], %s5154_s21 }
 0x153   : > { %v1763_v37 = vld [vmem:[%s8119_s6] sm:$0xff]  ;;  %vm1771_vm2 = vcmask 64512   ;;  %v1748_v39 = vld [vmem:[%s7187_s3 + $0x8] sm:$0xff]  ;;  %v6637_v3 = vld [vmem:[#allocation2 + $0x78] sm:$0xff]  }
 0x154   : > { %v1747_v38 = vld [vmem:[%s7187_s3] sm:$0xff]  ;;  %6303 = vmatprep.subr.mxu0 %v1763_v37  ;;  %v6638_v40 = vld [vmem:[#allocation2 + $0xf8] sm:$0xff]   ;;  %5841 = vmatprep.subr.bf16.mxu1 %v6637_v3  ;;  %v1749_v43 = vld [vmem:[%s7187_s3 + $0x10] sm:$0xff] }
 0x155   : > { %6305 = vmatprep.mubr.msk.f32.mxu0 %vm1771_vm2, %v1747_v38  ;;  %6304 = vmatpush3.msra.mxu0 %v1763_v37  ;;  %v6639_v41 = vld [vmem:[#allocation2 + $0x38] sm:$0xff]   ;;  %v6641_v45 = vld [vmem:[#allocation2 + $0x70] sm:$0xff]   ;;  %v1751_v49 = vld [vmem:[%s7187_s3 + $0x20] sm:$0xff] }
 0x156   : > { %6306 = vmatmul.mubr.msk.f32.vlgmr.msra.gmra.mxu0 %vm1771_vm2, %v1748_v39  ;;  %5905 = vmatprep.subr.bf16.mxu0 %v6638_v40  ;;  %v6640_v42 = vld [vmem:[#allocation2 + $0xb8] sm:$0xff]   ;;  %v6642_v46 = vld [vmem:[#allocation2 + $0xf0] sm:$0xff]   ;;  %v1752_v50 = vld [vmem:[%s7187_s3 + $0x28] sm:$0xff] }
 0x157   : > { %5842 = vmatpush3.bf16.msra.mxu1 %v6639_v41  ;;  %v1750_v44 = vld [vmem:[%s7187_s3 + $0x18] sm:$0xff]  ;;  %5906 = vmatpush3.bf16.msra.mxu0 %v6640_v42  ;;  %v6643_v47 = vld [vmem:[#allocation2 + $0x30] sm:$0xff]   ;;  %v6645_v51 = vld [vmem:[#allocation2 + $0x68] sm:$0xff]  }
 0x158   : > { %6308 = vmatprep.mubr.msk.f32.mxu0 %vm1771_vm2, %v1749_v43  ;;  %5843 = vmatprep.subr.bf16.mxu1 %v6641_v45  ;;  %v6644_v48 = vld [vmem:[#allocation2 + $0xb0] sm:$0xff]   ;;  %v6646_v52 = vld [vmem:[#allocation2 + $0xe8] sm:$0xff]   ;;  %v1754_v56 = vld [vmem:[%s7187_s3 + $0x38] sm:$0xff] }
 0x159   : > { %5907 = vmatprep.subr.bf16.mxu0 %v6642_v46  ;;  %v6647_v53 = vld [vmem:[#allocation2 + $0x28] sm:$0xff]   ;;  %v1753_v55 = vld [vmem:[%s7187_s3 + $0x30] sm:$0xff]  ;;  %v6649_v57 = vld [vmem:[#allocation2 + $0x60] sm:$0xff]  }
 0x15a   : > { %6309 = vmatmul.mubr.msk.f32.gmra.mxu0 %vm1771_vm2, %v1750_v44  ;;  %v6648_v54 = vld [vmem:[#allocation2 + $0xa8] sm:$0xff]   ;;  %v6650_v58 = vld [vmem:[#allocation2 + $0xe0] sm:$0xff]   ;;  %v6653_v63 = vld [vmem:[#allocation2 + $0x58] sm:$0xff]  }
 0x15b   : > { %5844 = vmatpush3.bf16.msra.mxu1 %v6643_v47  ;;  %6311 = vmatprep.mubr.msk.f32.mxu0 %vm1771_vm2, %v1751_v49  ;;  %v6651_v59 = vld [vmem:[#allocation2 + $0x20] sm:$0xff]   ;;  %v1756_v62 = vld [vmem:[%s7187_s3 + $0x48] sm:$0xff]  ;;  %v6654_v0 = vld [vmem:[#allocation2 + $0xd8] sm:$0xff]  }
 0x15c   : > { %5908 = vmatpush3.bf16.msra.mxu0 %v6644_v48  ;;  %5845 = vmatprep.subr.bf16.mxu1 %v6645_v51  ;;  %v6652_v60 = vld [vmem:[#allocation2 + $0xa0] sm:$0xff]   ;;  %v6655_v1 = vld [vmem:[#allocation2 + $0x18] sm:$0xff]   ;;  %v1757_v4 = vld [vmem:[%s7187_s3 + $0x50] sm:$0xff] }
 0x15d   : > { %5909 = vmatprep.subr.bf16.mxu0 %v6646_v52  ;;  %v1755_v61 = vld [vmem:[%s7187_s3 + $0x40] sm:$0xff]  ;;  %v6656_v2 = vld [vmem:[#allocation2 + $0x98] sm:$0xff]   ;;  %v6657_v6 = vld [vmem:[#allocation2 + $0x50] sm:$0xff]  }
 0x15e   : > { %6312 = vmatmul.mubr.msk.f32.gmra.mxu0 %vm1771_vm2, %v1752_v50  ;;  %v1758_v5 = vld [vmem:[%s7187_s3 + $0x58] sm:$0xff]  ;;  %v6658_v7 = vld [vmem:[#allocation2 + $0xd0] sm:$0xff]   ;;  %v1759_v10 = vld [vmem:[%s7187_s3 + $0x60] sm:$0xff] }
 0x15f   : > { %5846 = vmatpush3.bf16.msra.mxu1 %v6647_v53  ;;  %6314 = vmatprep.mubr.msk.f32.mxu0 %vm1771_vm2, %v1753_v55  ;;  %v6659_v8 = vld [vmem:[#allocation2 + $0x10] sm:$0xff]   ;;  %v1760_v11 = vld [vmem:[%s7187_s3 + $0x68] sm:$0xff]  ;;  %v1762_v17 = vld [vmem:[%s7187_s3 + $0x78] sm:$0xff] }
 0x160   : > { %5910 = vmatpush3.bf16.msra.mxu0 %v6648_v54  ;;  %5847 = vmatprep.subr.bf16.mxu1 %v6649_v57  ;;  %v6660_v9 = vld [vmem:[#allocation2 + $0x90] sm:$0xff]   ;;  %v6661_v12 = vld [vmem:[#allocation2 + $0x48] sm:$0xff]   ;;  %v6665_v18 = vld [vmem:[#allocation2 + $0x40] sm:$0xff]  }
 0x161   : > { %5911 = vmatprep.subr.bf16.mxu0 %v6650_v58  ;;  %v6662_v13 = vld [vmem:[#allocation2 + $0xc8] sm:$0xff]   ;;  %v1761_v16 = vld [vmem:[%s7187_s3 + $0x70] sm:$0xff]  ;;  %v6666_v19 = vld [vmem:[#allocation2 + $0xc0] sm:$0xff]  }
 0x162   : > { %6315 = vmatmul.mubr.msk.f32.gmra.mxu0 %vm1771_vm2, %v1754_v56  ;;  %v6663_v14 = vld [vmem:[#allocation2 + $0x8] sm:$0xff]   ;;  %v6667_v20 = vld [vmem:[#allocation2] sm:$0xff]  }
 0x163   : > { %5848 = vmatpush3.bf16.msra.mxu1 %v6651_v59  ;;  %6317 = vmatprep.mubr.msk.f32.mxu0 %vm1771_vm2, %v1755_v61  ;;  %v6664_v15 = vld [vmem:[#allocation2 + $0x88] sm:$0xff]   ;;  %v6668_v21 = vld [vmem:[#allocation2 + $0x80] sm:$0xff]  }
 0x164   : > { %5912 = vmatpush3.bf16.msra.mxu0 %v6652_v60  ;;  %5849 = vmatprep.subr.bf16.mxu1 %v6653_v63  ;;  %v6669_v22 = vld [vmem:[%s7197_s5] ss:$16 sps:$4 sm:$0xff]   ;;  %v6671_v23 = vld [vmem:[%s7197_s5 + $0x4] ss:$16 sps:$4 sm:$0xff]   ;;  %v6672_v24 = vld [vmem:[%s7197_s5 + $0x8] ss:$16 sps:$4 sm:$0xff]  }
 0x165   : > { %5913 = vmatprep.subr.bf16.mxu0 %v6654_v0  ;;  %2445 = vmatprep.mubr.bf16.mxu1 %v6671_v23  ;;  %v6674_v25 = vld [vmem:[%s7197_s5 + $0xc] ss:$16 sps:$4 sm:$0xff]   ;;  %v6675_v26 = vld [vmem:[%s7197_s5 + $0x24] ss:$16 sps:$4 sm:$0xff]   ;;  %v6679_v28 = vld [vmem:[%s7197_s5 + $0x20] ss:$16 sps:$4 sm:$0xff]  }
 0x166   : > { %6318 = vmatmul.mubr.msk.f32.gmra.mxu0 %vm1771_vm2, %v1756_v62  ;;  %v6677_v27 = vld [vmem:[%s7197_s5 + $0x2c] ss:$16 sps:$4 sm:$0xff]   ;;  %v6681_v29 = vld [vmem:[%s7197_s5 + $0x44] ss:$16 sps:$4 sm:$0xff]   ;;  %v6680_v30 = vld [vmem:[%s7197_s5 + $0x28] ss:$16 sps:$4 sm:$0xff]  }
 0x167   : > { %5850 = vmatpush3.bf16.msra.mxu1 %v6655_v1  ;;  %6320 = vmatprep.mubr.msk.f32.mxu0 %vm1771_vm2, %v1757_v4  ;;  %v6683_v31 = vld [vmem:[%s7197_s5 + $0x4c] ss:$16 sps:$4 sm:$0xff]   ;;  %v6685_v32 = vld [vmem:[%s7197_s5 + $0x40] ss:$16 sps:$4 sm:$0xff]   ;;  %v6687_v33 = vld [vmem:[%s7197_s5 + $0x64] ss:$16 sps:$4 sm:$0xff]  }
 0x168   : > { %5914 = vmatpush3.bf16.msra.mxu0 %v6656_v2  ;;  %5851 = vmatprep.subr.bf16.mxu1 %v6657_v6  ;;  %v6686_v34 = vld [vmem:[%s7197_s5 + $0x48] ss:$16 sps:$4 sm:$0xff]   ;;  %v6689_v35 = vld [vmem:[%s7197_s5 + $0x6c] ss:$16 sps:$4 sm:$0xff]   ;;  %v6691_v36 = vld [vmem:[%s7197_s5 + $0x60] ss:$16 sps:$4 sm:$0xff]  }
 0x169   : > { %5915 = vmatprep.subr.bf16.mxu0 %v6658_v7  ;;  %v6693_v37 = vld [vmem:[%s7197_s5 + $0x84] ss:$16 sps:$4 sm:$0xff]   ;;  %v6692_v38 = vld [vmem:[%s7197_s5 + $0x68] ss:$16 sps:$4 sm:$0xff]   ;;  %v6695_v39 = vld [vmem:[%s7197_s5 + $0x8c] ss:$16 sps:$4 sm:$0xff]  }
 0x16a   : > { %6321 = vmatmul.mubr.msk.f32.gmra.mxu0 %vm1771_vm2, %v1758_v5  ;;  %v6697_v3 = vld [vmem:[%s7197_s5 + $0x80] ss:$16 sps:$4 sm:$0xff]   ;;  %v6699_v40 = vld [vmem:[%s7197_s5 + $0xa4] ss:$16 sps:$4 sm:$0xff]   ;;  %v6698_v41 = vld [vmem:[%s7197_s5 + $0x88] ss:$16 sps:$4 sm:$0xff]  }
 0x16b   : > { %5852 = vmatpush3.bf16.msra.mxu1 %v6659_v8  ;;  %6323 = vmatprep.mubr.msk.f32.mxu0 %vm1771_vm2, %v1759_v10  ;;  %v6701_v42 = vld [vmem:[%s7197_s5 + $0xac] ss:$16 sps:$4 sm:$0xff]   ;;  %v6703_v43 = vld [vmem:[%s7197_s5 + $0xa0] ss:$16 sps:$4 sm:$0xff]   ;;  %v6705_v44 = vld [vmem:[%s7197_s5 + $0xc4] ss:$16 sps:$4 sm:$0xff]  }
 0x16c   : > { %5916 = vmatpush3.bf16.msra.mxu0 %v6660_v9  ;;  %5853 = vmatprep.subr.bf16.mxu1 %v6661_v12  ;;  %v6704_v45 = vld [vmem:[%s7197_s5 + $0xa8] ss:$16 sps:$4 sm:$0xff]   ;;  %v6707_v46 = vld [vmem:[%s7197_s5 + $0xcc] ss:$16 sps:$4 sm:$0xff]   ;;  %v6709_v47 = vld [vmem:[%s7197_s5 + $0xc0] ss:$16 sps:$4 sm:$0xff]  }
 0x16d   : > { %5917 = vmatprep.subr.bf16.mxu0 %v6662_v13  ;;  %v6711_v48 = vld [vmem:[%s7197_s5 + $0xe4] ss:$16 sps:$4 sm:$0xff]   ;;  %v6710_v49 = vld [vmem:[%s7197_s5 + $0xc8] ss:$16 sps:$4 sm:$0xff]   ;;  %v6713_v50 = vld [vmem:[%s7197_s5 + $0xec] ss:$16 sps:$4 sm:$0xff]  }
 0x16e   : > { %6324 = vmatmul.mubr.msk.f32.gmra.mxu0 %vm1771_vm2, %v1760_v11  ;;  %v6715_v51 = vld [vmem:[%s7197_s5 + $0xe0] ss:$16 sps:$4 sm:$0xff]   ;;  %v6716_v52 = vld [vmem:[%s7197_s5 + $0xe8] ss:$16 sps:$4 sm:$0xff]  }
 0x16f   : > { %5854 = vmatpush3.bf16.msra.mxu1 %v6663_v14  ;;  %6326 = vmatprep.mubr.msk.f32.mxu0 %vm1771_vm2, %v1761_v16  ;;  %v7630_v13 = vld [vmem:[%s8120_s7] ss:$0 sm:$0xff] }
 0x170   : > { %5918 = vmatpush3.bf16.msra.mxu0 %v6664_v15  ;;  %5855 = vmatprep.subr.bf16.mxu1 %v6665_v18 }
 0x171   : > { %5919 = vmatprep.subr.bf16.mxu0 %v6666_v19  ;;  %v7636_v19 = vld [vmem:[%s8124_s11] ss:$0 sm:$0xff] }
 0x172   : > { %6327 = vmatmul.mubr.msk.f32.gmra.mxu0 %vm1771_vm2, %v1762_v17 }
 0x173   : > { %5856 = vmatpush3.bf16.msra.mxu1 %v6667_v20  ;;  %2542 = vmatprep.mubr.bf16.mxu0 %v6674_v25 }
 0x174   : > { %5920 = vmatpush3.bf16.msra.mxu0 %v6668_v21 }
 0x176   : > { %2446 = vmatmul.mubr.bf16.vlgmr.msra.gmra.mxu1 %v6669_v22 }
 0x177   : > { %2543 = vmatmul.mubr.bf16.vlgmr.msra.gmra.mxu0 %v6672_v24  ;;  %2453 = vmatprep.mubr.bf16.mxu1 %v6675_v26 }
 0x178   : > { %2550 = vmatprep.mubr.bf16.mxu0 %v6677_v27 }
 0x17e   : > { %2454 = vmatmul.mubr.bf16.gmra.mxu1 %v6679_v28 }
 0x17f   : > { %2461 = vmatprep.mubr.bf16.mxu1 %v6681_v29  ;;  %2551 = vmatmul.mubr.bf16.gmra.mxu0 %v6680_v30 }
 0x180   : > { %2558 = vmatprep.mubr.bf16.mxu0 %v6683_v31 }
 0x186   : > { %2462 = vmatmul.mubr.bf16.gmra.mxu1 %v6685_v32 }
 0x187   : > { %2469 = vmatprep.mubr.bf16.mxu1 %v6687_v33  ;;  %2559 = vmatmul.mubr.bf16.gmra.mxu0 %v6686_v34 }
 0x188   : > { %2566 = vmatprep.mubr.bf16.mxu0 %v6689_v35 }
 0x18e   : > { %2470 = vmatmul.mubr.bf16.gmra.mxu1 %v6691_v36 }
 0x18f   : > { %2477 = vmatprep.mubr.bf16.mxu1 %v6693_v37  ;;  %2567 = vmatmul.mubr.bf16.gmra.mxu0 %v6692_v38 }
 0x190   : > { %2574 = vmatprep.mubr.bf16.mxu0 %v6695_v39 }
 0x196   : > { %2478 = vmatmul.mubr.bf16.gmra.mxu1 %v6697_v3 }
 0x197   : > { %2485 = vmatprep.mubr.bf16.mxu1 %v6699_v40  ;;  %2575 = vmatmul.mubr.bf16.gmra.mxu0 %v6698_v41 }
 0x198   : > { %2582 = vmatprep.mubr.bf16.mxu0 %v6701_v42 }
 0x19e   : > { %2486 = vmatmul.mubr.bf16.gmra.mxu1 %v6703_v43 }
 0x19f   : > { %2493 = vmatprep.mubr.bf16.mxu1 %v6705_v44  ;;  %2583 = vmatmul.mubr.bf16.gmra.mxu0 %v6704_v45 }
 0x1a0   : > { %2590 = vmatprep.mubr.bf16.mxu0 %v6707_v46 }
 0x1a6   : > { %2494 = vmatmul.mubr.bf16.gmra.mxu1 %v6709_v47 }
 0x1a7   : > { %2501 = vmatprep.mubr.bf16.mxu1 %v6711_v48  ;;  %2591 = vmatmul.mubr.bf16.gmra.mxu0 %v6710_v49 }
 0x1a8   : > { %2598 = vmatprep.mubr.bf16.mxu0 %v6713_v50 }
 0x1ae   : > { %2502 = vmatmul.mubr.bf16.gmra.mxu1 %v6715_v51 }
 0x1af   : > { %2599 = vmatmul.mubr.bf16.gmra.mxu0 %v6716_v52 }
 0x216   : > { %v6307_v53 = vpop.f32.mrf.mxu0 }
 0x217   : > { %v1892_v26 = vadd.f32 %v6307_v53, %v7630_v13 }
 0x218   : > { %v1886_v54 = vpop.f32.mrf.mxu0 }
 0x219   : > { %v1887_v16 = vadd.f32 %v7630_v13, %v1886_v54 }
 0x21a   : > { %v6310_v55 = vpop.f32.mrf.mxu0 }
 0x21b   : > { %v1902_v48 = vadd.f32 %v6310_v55, %v7630_v13 }
 0x21c   : > { %v1896_v56 = vpop.f32.mrf.mxu0 }
 0x21d   : > { %v1897_v34 = vadd.f32 %v7630_v13, %v1896_v56 }
 0x21e   : > { %v7603_v57 = vpop.f32.mrf.mxu0 }
 0x220   : > { %v7605_v58 = vpop.f32.mrf.mxu0 }
 0x222   : > { %v7607_v59 = vpop.f32.mrf.mxu0 }
 0x224   : > { %v7609_v60 = vpop.f32.mrf.mxu0 }
 0x226   : > { %v7611_v61 = vpop.f32.mrf.mxu0 }
 0x228   : > { %v7613_v62 = vpop.f32.mrf.mxu0 }
 0x22a   : > { %v7615_v63 = vpop.f32.mrf.mxu0 }
 0x22c   : > { %v7617_v0 = vpop.f32.mrf.mxu0 }
 0x22e   : > { %v7619_v1 = vpop.f32.mrf.mxu0 }
 0x230   : > { %v7621_v2 = vpop.f32.mrf.mxu0 }
 0x232   : > { %v7623_v4 = vpop.f32.mrf.mxu0 }
 0x234   : > { %v7625_v5 = vpop.f32.mrf.mxu0 }
 0x236   : > { %v5857_v6 = vpop.f32.mrf.mxu1 }
 0x237   : > { %v5921_v7 = vpop.f32.mrf.mxu0 }
 0x238   : > { %v5858_v8 = vpop.f32.mrf.mxu1 }
 0x239   : > { %v5859_v9 = vadd.f32 %v5858_v8, %v5857_v6  ;;  %v5922_v10 = vpop.f32.mrf.mxu0  ;;  %v1907_v6 = vadd.f32 %v7630_v13, %v7605_v58  ;;  %v1912_v58 = vadd.f32 %v7603_v57, %v7630_v13 }
 0x23a   : > { %v5860_v11 = vpop.f32.mrf.mxu1  ;;  %v5923_v12 = vadd.f32 %v5922_v10, %v5921_v7 }
 0x23b   : > { %v5924_v14 = vpop.f32.mrf.mxu0 }
 0x23c   : > { %v5861_v15 = vpop.f32.mrf.mxu1  ;;  %v2545_v17 = vadd.f32 %v5923_v12, %v5859_v9 }
 0x23d   : > { %v5862_v18 = vadd.f32 %v5861_v15, %v5860_v11  ;;  %v5925_v20 = vpop.f32.mrf.mxu0 }
 0x23e   : > { %v5863_v21 = vpop.f32.mrf.mxu1  ;;  %v2607_v22 = vadd.f32 %v2545_v17, %v1887_v16  ;;  %v5926_v23 = vadd.f32 %v5925_v20, %v5924_v14 }
 0x23f   : > { %v5927_v24 = vpop.f32.mrf.mxu0 }
 0x240   : > { %v5864_v25 = vpop.f32.mrf.mxu1  ;;  %v2730_v27 = vadd.f32 %v7636_v19, %v2607_v22  ;;  %v2548_v28 = vadd.f32 %v5926_v23, %v5862_v18  ;;  %v2623_v35 = vmax.f32 %v2607_v22, 0.0 }
 0x241   : > { %v5865_v29 = vadd.f32 %v5864_v25, %v5863_v21  ;;  %v5928_v30 = vpop.f32.mrf.mxu0 }
 0x242   : > { %v5866_v31 = vpop.f32.mrf.mxu1  ;;  %2747 = vst [vmem:[%s7642_s29] sm:$0xff] %v2730_v27  ;;  %v2608_v32 = vadd.f32 %v2548_v28, %v1892_v26  ;;  %v5929_v33 = vadd.f32 %v5928_v30, %v5927_v24 }
 0x243   : > { %v5930_v36 = vpop.f32.mrf.mxu0 }
 0x244   : > { %v5867_v37 = vpop.f32.mrf.mxu1  ;;  %v2624_v38 = vmax.f32 %v2608_v32, 0.0  ;;  %v2731_v39 = vadd.f32 %v7636_v19, %v2608_v32  ;;  %v2553_v3 = vadd.f32 %v5929_v33, %v5865_v29  ;;  %v1917_v29 = vadd.f32 %v7630_v13, %v7609_v60 }
 0x245   : > { %v5868_v40 = vadd.f32 %v5867_v37, %v5866_v31  ;;  %v5931_v41 = vpop.f32.mrf.mxu0  ;;  %v1922_v60 = vadd.f32 %v7607_v59, %v7630_v13 }
 0x246   : > { %v5869_v42 = vpop.f32.mrf.mxu1  ;;  %v5590_v43 = vpack.c.bf16 %v2624_v38, %v2623_v35  ;;  %2748 = vst [vmem:[%s7642_s29 + $0x8] sm:$0xff] %v2731_v39  ;;  %v2609_v44 = vadd.f32 %v2553_v3, %v1897_v34  ;;  %v5932_v45 = vadd.f32 %v5931_v41, %v5930_v36 }
 0x247   : > { %v5933_v46 = vpop.f32.mrf.mxu0 }
 0x248   : > { %v5870_v47 = vpop.f32.mrf.mxu1  ;;  %5591 = vst [vmem:[%s7649_s28] sm:$0xff] %v5590_v43   ;;  %v2732_v49 = vadd.f32 %v7636_v19, %v2609_v44  ;;  %v2556_v50 = vadd.f32 %v5932_v45, %v5868_v40  ;;  %v2625_v7 = vmax.f32 %v2609_v44, 0.0 }
 0x249   : > { %v5871_v51 = vadd.f32 %v5870_v47, %v5869_v42  ;;  %v5934_v52 = vpop.f32.mrf.mxu0 }
 0x24a   : > { %v5872_v53 = vpop.f32.mrf.mxu1  ;;  %2749 = vst [vmem:[%s7642_s29 + $0x10] sm:$0xff] %v2732_v49  ;;  %v2610_v54 = vadd.f32 %v2556_v50, %v1902_v48  ;;  %v5935_v56 = vadd.f32 %v5934_v52, %v5933_v46  ;;  %v1927_v49 = vadd.f32 %v7630_v13, %v7613_v62  ;;  %v1932_v62 = vadd.f32 %v7611_v61, %v7630_v13 }
 0x24b   : > { %v5936_v55 = vpop.f32.mrf.mxu0 }
 0x24c   : > { %v5873_v8 = vpop.f32.mrf.mxu1  ;;  %v2626_v9 = vmax.f32 %v2610_v54, 0.0  ;;  %v2733_v10 = vadd.f32 %v7636_v19, %v2610_v54  ;;  %v2561_v11 = vadd.f32 %v5935_v56, %v5871_v51 }
 0x24d   : > { %v5874_v12 = vadd.f32 %v5873_v8, %v5872_v53  ;;  %v5937_v14 = vpop.f32.mrf.mxu0 }
 0x24e   : > { %v5875_v15 = vpop.f32.mrf.mxu1  ;;  %v5595_v16 = vpack.c.bf16 %v2626_v9, %v2625_v7  ;;  %2750 = vst [vmem:[%s7642_s29 + $0x18] sm:$0xff] %v2733_v10  ;;  %v2611_v17 = vadd.f32 %v2561_v11, %v1907_v6  ;;  %v5938_v18 = vadd.f32 %v5937_v14, %v5936_v55 }
 0x24f   : > { %v5939_v20 = vpop.f32.mrf.mxu0 }
 0x250   : > { %v5876_v21 = vpop.f32.mrf.mxu1  ;;  %5738 = vst [vmem:[%s7649_s28 + $0x8] sm:$0xff] %v5595_v16   ;;  %v2734_v22 = vadd.f32 %v7636_v19, %v2611_v17  ;;  %v2564_v23 = vadd.f32 %v5938_v18, %v5874_v12  ;;  %v2627_v30 = vmax.f32 %v2611_v17, 0.0 }
 0x251   : > { %v5877_v24 = vadd.f32 %v5876_v21, %v5875_v15  ;;  %v5940_v25 = vpop.f32.mrf.mxu0  ;;  %v1937_v21 = vadd.f32 %v7630_v13, %v7617_v0  ;;  %v1942_v0 = vadd.f32 %v7615_v63, %v7630_v13 }
 0x252   : > { %v5878_v26 = vpop.f32.mrf.mxu1  ;;  %2751 = vst [vmem:[%s7642_s29 + $0x20] sm:$0xff] %v2734_v22  ;;  %v2612_v27 = vadd.f32 %v2564_v23, %v1912_v58  ;;  %v5941_v28 = vadd.f32 %v5940_v25, %v5939_v20 }
 0x253   : > { %v5942_v31 = vpop.f32.mrf.mxu0 }
 0x254   : > { %v5879_v32 = vpop.f32.mrf.mxu1  ;;  %v2628_v33 = vmax.f32 %v2612_v27, 0.0  ;;  %v2735_v57 = vadd.f32 %v7636_v19, %v2612_v27  ;;  %v2569_v34 = vadd.f32 %v5941_v28, %v5877_v24 }
 0x255   : > { %v5880_v35 = vadd.f32 %v5879_v32, %v5878_v26  ;;  %v5943_v36 = vpop.f32.mrf.mxu0 }
 0x256   : > { %v5881_v37 = vpop.f32.mrf.mxu1  ;;  %v5600_v38 = vpack.c.bf16 %v2628_v33, %v2627_v30  ;;  %2752 = vst [vmem:[%s7642_s29 + $0x28] sm:$0xff] %v2735_v57  ;;  %v2613_v39 = vadd.f32 %v2569_v34, %v1917_v29  ;;  %v5944_v3 = vadd.f32 %v5943_v36, %v5942_v31 }
 0x257   : > { %v5945_v40 = vpop.f32.mrf.mxu0 }
 0x258   : > { %v5882_v41 = vpop.f32.mrf.mxu1  ;;  %5739 = vst [vmem:[%s7649_s28 + $0x10] sm:$0xff] %v5600_v38   ;;  %v2736_v42 = vadd.f32 %v7636_v19, %v2613_v39  ;;  %v2572_v43 = vadd.f32 %v5944_v3, %v5880_v35  ;;  %v2629_v50 = vmax.f32 %v2613_v39, 0.0  ;;  %v1947_v3 = vadd.f32 %v7630_v13, %v7621_v2 }
 0x259   : > { %v5883_v44 = vadd.f32 %v5882_v41, %v5881_v37  ;;  %v5946_v45 = vpop.f32.mrf.mxu0  ;;  %v1952_v2 = vadd.f32 %v7619_v1, %v7630_v13 }
 0x25a   : > { %v5884_v46 = vpop.f32.mrf.mxu1  ;;  %2753 = vst [vmem:[%s7642_s29 + $0x30] sm:$0xff] %v2736_v42  ;;  %v2614_v47 = vadd.f32 %v2572_v43, %v1922_v60  ;;  %v5947_v48 = vadd.f32 %v5946_v45, %v5945_v40 }
 0x25b   : > { %v5948_v51 = vpop.f32.mrf.mxu0 }
 0x25c   : > { %v5885_v52 = vpop.f32.mrf.mxu1  ;;  %v2630_v53 = vmax.f32 %v2614_v47, 0.0  ;;  %v2737_v59 = vadd.f32 %v7636_v19, %v2614_v47  ;;  %v2577_v54 = vadd.f32 %v5947_v48, %v5883_v44 }
 0x25d   : > { %v5886_v56 = vadd.f32 %v5885_v52, %v5884_v46  ;;  %v5949_v6 = vpop.f32.mrf.mxu0 }
 0x25e   : > { %v5887_v7 = vpop.f32.mrf.mxu1  ;;  %v5605_v55 = vpack.c.bf16 %v2630_v53, %v2629_v50  ;;  %2754 = vst [vmem:[%s7642_s29 + $0x38] sm:$0xff] %v2737_v59  ;;  %v2615_v8 = vadd.f32 %v2577_v54, %v1927_v49  ;;  %v5950_v9 = vadd.f32 %v5949_v6, %v5948_v51 }
 0x25f   : > { %v5951_v10 = vpop.f32.mrf.mxu0 }
 0x260   : > { %v5888_v11 = vpop.f32.mrf.mxu1  ;;  %5740 = vst [vmem:[%s7649_s28 + $0x18] sm:$0xff] %v5605_v55   ;;  %v2738_v12 = vadd.f32 %v7636_v19, %v2615_v8  ;;  %v2580_v14 = vadd.f32 %v5950_v9, %v5886_v56  ;;  %v2631_v58 = vmax.f32 %v2615_v8, 0.0  ;;  %v1957_v55 = vadd.f32 %v7630_v13, %v7625_v5 }
 0x261   : > { %v5889_v15 = vadd.f32 %v5888_v11, %v5887_v7  ;;  %v5952_v16 = vpop.f32.mrf.mxu0 }
 0x262   : > { %v5890_v17 = vpop.f32.mrf.mxu1  ;;  %2755 = vst [vmem:[%s7642_s29 + $0x40] sm:$0xff] %v2738_v12  ;;  %v2616_v18 = vadd.f32 %v2580_v14, %v1932_v62  ;;  %v5953_v20 = vadd.f32 %v5952_v16, %v5951_v10 }
 0x263   : > { %v5954_v22 = vpop.f32.mrf.mxu0 }
 0x264   : > { %v5891_v23 = vpop.f32.mrf.mxu1  ;;  %v2632_v24 = vmax.f32 %v2616_v18, 0.0  ;;  %v2739_v61 = vadd.f32 %v7636_v19, %v2616_v18  ;;  %v2585_v25 = vadd.f32 %v5953_v20, %v5889_v15  ;;  %v1962_v18 = vadd.f32 %v7623_v4, %v7630_v13 }
 0x265   : > { %v5892_v26 = vadd.f32 %v5891_v23, %v5890_v17  ;;  %v5955_v27 = vpop.f32.mrf.mxu0 }
 0x266   : > { %v5893_v28 = vpop.f32.mrf.mxu1  ;;  %v5610_v29 = vpack.c.bf16 %v2632_v24, %v2631_v58  ;;  %2756 = vst [vmem:[%s7642_s29 + $0x48] sm:$0xff] %v2739_v61  ;;  %v2617_v30 = vadd.f32 %v2585_v25, %v1937_v21  ;;  %v5956_v31 = vadd.f32 %v5955_v27, %v5954_v22 }
 0x267   : > { %v5957_v32 = vpop.f32.mrf.mxu0 }
 0x268   : > { %v5894_v33 = vpop.f32.mrf.mxu1  ;;  %5741 = vst [vmem:[%s7649_s28 + $0x20] sm:$0xff] %v5610_v29   ;;  %v2740_v57 = vadd.f32 %v7636_v19, %v2617_v30  ;;  %v2588_v34 = vadd.f32 %v5956_v31, %v5892_v26  ;;  %v2633_v40 = vmax.f32 %v2617_v30, 0.0 }
 0x269   : > { %v5895_v35 = vadd.f32 %v5894_v33, %v5893_v28  ;;  %v5958_v36 = vpop.f32.mrf.mxu0 }
 0x26a   : > { %v5896_v37 = vpop.f32.mrf.mxu1  ;;  %2757 = vst [vmem:[%s7642_s29 + $0x50] sm:$0xff] %v2740_v57  ;;  %v2618_v38 = vadd.f32 %v2588_v34, %v1942_v0  ;;  %v5959_v39 = vadd.f32 %v5958_v36, %v5957_v32 }
 0x26b   : > { %v5960_v41 = vpop.f32.mrf.mxu0 }
 0x26c   : > { %v5897_v60 = vpop.f32.mrf.mxu1  ;;  %v2634_v42 = vmax.f32 %v2618_v38, 0.0  ;;  %v2741_v63 = vadd.f32 %v7636_v19, %v2618_v38  ;;  %v2593_v43 = vadd.f32 %v5959_v39, %v5895_v35 }
 0x26d   : > { %v5898_v44 = vadd.f32 %v5897_v60, %v5896_v37  ;;  %v5961_v45 = vpop.f32.mrf.mxu0 }
 0x26e   : > { %v5899_v46 = vpop.f32.mrf.mxu1  ;;  %v5615_v47 = vpack.c.bf16 %v2634_v42, %v2633_v40  ;;  %2758 = vst [vmem:[%s7642_s29 + $0x58] sm:$0xff] %v2741_v63  ;;  %v2619_v48 = vadd.f32 %v2593_v43, %v1947_v3  ;;  %v5962_v49 = vadd.f32 %v5961_v45, %v5960_v41 }
 0x26f   : > { %v5963_v50 = vpop.f32.mrf.mxu0 }
 0x270   : > { %v5900_v51 = vpop.f32.mrf.mxu1  ;;  %5742 = vst [vmem:[%s7649_s28 + $0x28] sm:$0xff] %v5615_v47   ;;  %v2742_v52 = vadd.f32 %v7636_v19, %v2619_v48  ;;  %v2596_v53 = vadd.f32 %v5962_v49, %v5898_v44  ;;  %v2635_v8 = vmax.f32 %v2619_v48, 0.0 }
 0x271   : > { %v5901_v59 = vadd.f32 %v5900_v51, %v5899_v46  ;;  %v5964_v54 = vpop.f32.mrf.mxu0 }
 0x272   : > { %v5902_v56 = vpop.f32.mrf.mxu1  ;;  %2759 = vst [vmem:[%s7642_s29 + $0x60] sm:$0xff] %v2742_v52  ;;  %v2620_v6 = vadd.f32 %v2596_v53, %v1952_v2  ;;  %v5965_v7 = vadd.f32 %v5964_v54, %v5963_v50 }
 0x273   : > { %v5966_v9 = vpop.f32.mrf.mxu0 }
 0x274   : > { %v5903_v10 = vpop.f32.mrf.mxu1  ;;  %v2636_v1 = vmax.f32 %v2620_v6, 0.0  ;;  %v2743_v11 = vadd.f32 %v7636_v19, %v2620_v6  ;;  %v2601_v62 = vadd.f32 %v5965_v7, %v5901_v59 }
 0x275   : > { %v5904_v12 = vadd.f32 %v5903_v10, %v5902_v56  ;;  %v5967_v14 = vpop.f32.mrf.mxu0 }
 0x276   : > { %v5620_v15 = vpack.c.bf16 %v2636_v1, %v2635_v8  ;;  %2760 = vst [vmem:[%s7642_s29 + $0x68] sm:$0xff] %v2743_v11  ;;  %v2621_v16 = vadd.f32 %v2601_v62, %v1957_v55  ;;  %v5968_v17 = vadd.f32 %v5967_v14, %v5966_v9 }
 0x278   : > { %5743 = vst [vmem:[%s7649_s28 + $0x30] sm:$0xff] %v5620_v15   ;;  %v2744_v5 = vadd.f32 %v7636_v19, %v2621_v16  ;;  %v2604_v20 = vadd.f32 %v5968_v17, %v5904_v12  ;;  %v2637_v58 = vmax.f32 %v2621_v16, 0.0 }
 0x27a   : > { %2761 = vst [vmem:[%s7642_s29 + $0x70] sm:$0xff] %v2744_v5  ;;  %v2622_v21 = vadd.f32 %v2604_v20, %v1962_v18 }
 0x27c   : > { %v2638_v22 = vmax.f32 %v2622_v21, 0.0  ;;  %v2745_v23 = vadd.f32 %v7636_v19, %v2622_v21 }
 0x27e   : > { %v5625_v24 = vpack.c.bf16 %v2638_v22, %v2637_v58  ;;  %2762 = vst [vmem:[%s7642_s29 + $0x78] sm:$0xff] %v2745_v23 }
 0x280   : > { %5744 = vst [vmem:[%s7649_s28 + $0x38] sm:$0xff] %v5625_v24  }
 0x281 PF: > { %p2763_p11 = scmp.lt.s32.totalorder %s6977_s22, 0  ;;  %s2764_s30 = ssub.s32 0, %s6977_s22 }
 0x282   : > { %s5156_s18 = smin.u32 %s6977_s22, %s2764_s30 }
 0x283   : > { %s2766_s20 = sand.u32 1, %s5156_s18  }
 0x284   : > { %s2767_s23 = ssub.s32 0, %s2766_s20 }
 0x285   : > { %s8193_s23 = smov (!%p2763_p11, %s2767_s23), %s2766_s20 }
 0x286   : > { %p5158_p12 = scmp.lt.s32.totalorder %s8193_s23, 0  ;;  %s2773_s24 = sadd.s32 2, %s8193_s23 }
 0x288   : > { %s8195_s24 = smov (!%p5158_p12, %s2773_s24), %s8193_s23 }
 0x289   : > { %p5159_p13 = scmp.ne.s32.totalorder %s8195_s24, 1 }
 0x28a   : > { %s7758_s15 = scalar_lea.vmem (!%p5159_p13), [#allocation3], %s7179_s25  ;;  %s3366_s17 = sshra.s32 (!%p5159_p13), %s7179_s25, 3 }
 0x28b   : > { %2778 = sbr.rel (%p5159_p13) target bundleno = 1644 (0x66c), region = 108  ;;  %s5216_s5 = sshll.u32 (!%p5159_p13), %s3366_s17, 2 }
 0x28c   : > { %s7767_s3 = scalar_lea.vmem (!%p5159_p13), [#allocation5], %s5216_s5  ;;  %p5217_p0 = scmp.ne.s32.totalorder (!%p5159_p13), %s6977_s22, 3 }
 0x290   : > { %v6717_v4 = vld [vmem:[#allocation4 + $0x78] sm:$0xff]   ;;  %v6719_v19 = vld [vmem:[#allocation4 + $0x70] sm:$0xff]   ;;  %v6721_v25 = vld [vmem:[#allocation4 + $0x68] sm:$0xff]  }
 0x291   : > { %v6718_v13 = vld [vmem:[#allocation4 + $0x38] sm:$0xff]   ;;  %5969 = vmatprep.subr.bf16.mxu0 %v6717_v4  ;;  %v6720_v61 = vld [vmem:[#allocation4 + $0x30] sm:$0xff]   ;;  %v6722_v26 = vld [vmem:[#allocation4 + $0x28] sm:$0xff]  }
 0x292   : > { %5970 = vmatpush3.bf16.msra.mxu0 %v6718_v13  ;;  %v6723_v27 = vld [vmem:[#allocation4 + $0x60] sm:$0xff]   ;;  %v6725_v29 = vld [vmem:[#allocation4 + $0x58] sm:$0xff]   ;;  %v6727_v31 = vld [vmem:[#allocation4 + $0x50] sm:$0xff]  }
 0x293   : > { %5971 = vmatprep.subr.bf16.mxu0 %v6719_v19  ;;  %v6724_v28 = vld [vmem:[#allocation4 + $0x20] sm:$0xff]   ;;  %v6726_v30 = vld [vmem:[#allocation4 + $0x18] sm:$0xff]   ;;  %v6728_v33 = vld [vmem:[#allocation4 + $0x10] sm:$0xff]  }
 0x294   : > { %v6735_v32 = vld [vmem:[%s7192_s19 + $0x4] ss:$8 sps:$4 sm:$0xff]   ;;  %v6757_v36 = vld [vmem:[%s8123_s10 + $0x38] sm:$0xff]   ;;  %v6733_v37 = vld [vmem:[%s7192_s19] ss:$8 sps:$4 sm:$0xff]  }
 0x295   : > { %3035 = vmatprep.mubr.bf16.mxu0 %v6735_v32  ;;  %v6729_v0 = vld [vmem:[#allocation4 + $0x48] sm:$0xff]   ;;  %v6731_v34 = vld [vmem:[#allocation4 + $0x40] sm:$0xff]   ;;  %v6758_v38 = vld [vmem:[%s8123_s10 + $0x30] sm:$0xff]   ;;  %6329 = vmatprep.subr.bf16.mxu1 %v6757_v36 }
 0x296   : > { %5972 = vmatpush3.bf16.msra.mxu0 %v6720_v61  ;;  %v6730_v57 = vld [vmem:[#allocation4 + $0x8] sm:$0xff]   ;;  %v6732_v35 = vld [vmem:[#allocation4] sm:$0xff]   ;;  %v6736_v39 = vld [vmem:[%s7192_s19 + $0x14] ss:$8 sps:$4 sm:$0xff]   ;;  %6330 = vmatpush3.bf16.msra.mxu1 %v6757_v36 }
 0x297   : > { %5973 = vmatprep.subr.bf16.mxu0 %v6721_v25  ;;  %v6759_v3 = vld [vmem:[%s8123_s10 + $0x28] sm:$0xff]   ;;  %6331 = vmatprep.subr.bf16.mxu1 %v6758_v38  ;;  %v6760_v40 = vld [vmem:[%s8123_s10 + $0x20] sm:$0xff]   ;;  %v6738_v41 = vld [vmem:[%s7192_s19 + $0x10] ss:$8 sps:$4 sm:$0xff]  }
 0x298   : > { %v6739_v60 = vld [vmem:[%s7192_s19 + $0x24] ss:$8 sps:$4 sm:$0xff]   ;;  %v6741_v42 = vld [vmem:[%s7192_s19 + $0x20] ss:$8 sps:$4 sm:$0xff]   ;;  %v6742_v63 = vld [vmem:[%s7192_s19 + $0x34] ss:$8 sps:$4 sm:$0xff]  }
 0x299   : > { %v6744_v43 = vld [vmem:[%s7192_s19 + $0x30] ss:$8 sps:$4 sm:$0xff]   ;;  %v6745_v44 = vld [vmem:[%s7192_s19 + $0x44] ss:$8 sps:$4 sm:$0xff]   ;;  %v6747_v45 = vld [vmem:[%s7192_s19 + $0x40] ss:$8 sps:$4 sm:$0xff]  }
 0x29a   : > { %5974 = vmatpush3.bf16.msra.mxu0 %v6722_v26  ;;  %6332 = vmatpush3.bf16.msra.mxu1 %v6758_v38  ;;  %v6748_v46 = vld [vmem:[%s7192_s19 + $0x54] ss:$8 sps:$4 sm:$0xff]   ;;  %v6750_v47 = vld [vmem:[%s7192_s19 + $0x50] ss:$8 sps:$4 sm:$0xff]   ;;  %v6751_v48 = vld [vmem:[%s7192_s19 + $0x64] ss:$8 sps:$4 sm:$0xff]  }
 0x29b   : > { %5975 = vmatprep.subr.bf16.mxu0 %v6723_v27  ;;  %6333 = vmatprep.subr.bf16.mxu1 %v6759_v3  ;;  %v6753_v49 = vld [vmem:[%s7192_s19 + $0x60] ss:$8 sps:$4 sm:$0xff]   ;;  %v6754_v50 = vld [vmem:[%s7192_s19 + $0x74] ss:$8 sps:$4 sm:$0xff]   ;;  %v6756_v51 = vld [vmem:[%s7192_s19 + $0x70] ss:$8 sps:$4 sm:$0xff]  }
 0x29c   : > { %v6761_v2 = vld [vmem:[%s8123_s10 + $0x18] sm:$0xff]   ;;  %v6762_v52 = vld [vmem:[%s8123_s10 + $0x10] sm:$0xff]   ;;  %v6763_v53 = vld [vmem:[%s8123_s10 + $0x8] sm:$0xff]  }
 0x29d   : > { %v6764_v59 = vld [vmem:[%s8123_s10] sm:$0xff]  }
 0x29e   : > { %5976 = vmatpush3.bf16.msra.mxu0 %v6724_v28  ;;  %6334 = vmatpush3.bf16.msra.mxu1 %v6759_v3 }
 0x29f   : > { %5977 = vmatprep.subr.bf16.mxu0 %v6725_v29  ;;  %6335 = vmatprep.subr.bf16.mxu1 %v6760_v40 }
 0x2a2   : > { %5978 = vmatpush3.bf16.msra.mxu0 %v6726_v30  ;;  %6336 = vmatpush3.bf16.msra.mxu1 %v6760_v40 }
 0x2a3   : > { %5979 = vmatprep.subr.bf16.mxu0 %v6727_v31  ;;  %6337 = vmatprep.subr.bf16.mxu1 %v6761_v2 }
 0x2a6   : > { %5980 = vmatpush3.bf16.msra.mxu0 %v6728_v33  ;;  %6338 = vmatpush3.bf16.msra.mxu1 %v6761_v2  ;;  %v3128_v2 = vld [vmem:[%s7758_s15 + $0x18] sm:$0xff] }
 0x2a7   : > { %5981 = vmatprep.subr.bf16.mxu0 %v6729_v0  ;;  %6339 = vmatprep.subr.bf16.mxu1 %v6762_v52 }
 0x2aa   : > { %5982 = vmatpush3.bf16.msra.mxu0 %v6730_v57  ;;  %6340 = vmatpush3.bf16.msra.mxu1 %v6762_v52 }
 0x2ab   : > { %5983 = vmatprep.subr.bf16.mxu0 %v6731_v34  ;;  %6341 = vmatprep.subr.bf16.mxu1 %v6763_v53 }
 0x2ae   : > { %5984 = vmatpush3.bf16.msra.mxu0 %v6732_v35  ;;  %6342 = vmatpush3.bf16.msra.mxu1 %v6763_v53 }
 0x2af   : > { %6343 = vmatprep.subr.bf16.mxu1 %v6764_v59 }
 0x2b1   : > { %3036 = vmatmul.mubr.bf16.vlgmr.msra.gmra.mxu0 %v6733_v37 }
 0x2b2   : > { %3043 = vmatprep.mubr.bf16.mxu0 %v6736_v39  ;;  %6344 = vmatpush3.bf16.msra.mxu1 %v6764_v59  ;;  %v3126_v59 = vld [vmem:[%s7758_s15 + $0x8] sm:$0xff] }
 0x2b9   : > { %3044 = vmatmul.mubr.bf16.gmra.mxu0 %v6738_v41 }
 0x2ba   : > { %3051 = vmatprep.mubr.bf16.mxu0 %v6739_v60 }
 0x2c1   : > { %3052 = vmatmul.mubr.bf16.gmra.mxu0 %v6741_v42 }
 0x2c2   : > { %3059 = vmatprep.mubr.bf16.mxu0 %v6742_v63 }
 0x2c9   : > { %3060 = vmatmul.mubr.bf16.gmra.mxu0 %v6744_v43 }
 0x2ca   : > { %3067 = vmatprep.mubr.bf16.mxu0 %v6745_v44 }
 0x2d1   : > { %3068 = vmatmul.mubr.bf16.gmra.mxu0 %v6747_v45 }
 0x2d2   : > { %3075 = vmatprep.mubr.bf16.mxu0 %v6748_v46 }
 0x2d9   : > { %3076 = vmatmul.mubr.bf16.gmra.mxu0 %v6750_v47 }
 0x2da   : > { %3083 = vmatprep.mubr.bf16.mxu0 %v6751_v48  ;;  %v3127_v48 = vld [vmem:[%s7758_s15 + $0x10] sm:$0xff] }
 0x2e1   : > { %3084 = vmatmul.mubr.bf16.gmra.mxu0 %v6753_v49 }
 0x2e2   : > { %3091 = vmatprep.mubr.bf16.mxu0 %v6754_v50 }
 0x2e9   : > { %3092 = vmatmul.mubr.bf16.gmra.mxu0 %v6756_v51  ;;  %v3125_v51 = vld [vmem:[%s7758_s15] sm:$0xff] }
 0x371   : > { %v5985_v54 = vpop.f32.mrf.mxu0 }
 0x373   : > { %v5986_v56 = vpop.f32.mrf.mxu0 }
 0x374   : > { %v5987_v55 = vadd.f32 %v5986_v56, %v5985_v54 }
 0x375   : > { %v5988_v6 = vpop.f32.mrf.mxu0 }
 0x377   : > { %v5989_v7 = vpop.f32.mrf.mxu0 }
 0x378   : > { %v5990_v8 = vadd.f32 %v5989_v7, %v5988_v6 }
 0x379   : > { %v5991_v9 = vpop.f32.mrf.mxu0 }
 0x37a   : > { %v3100_v10 = vpack.c.bf16 %v5990_v8, %v5987_v55 }
 0x37b   : > { %v5992_v1 = vpop.f32.mrf.mxu0 }
 0x37c   : > { %6345 = vmatprep.mubr.bf16.mxu1 %v3100_v10  ;;  %v5993_v12 = vadd.f32 %v5992_v1, %v5991_v9 }
 0x37d   : > { %v5994_v11 = vpop.f32.mrf.mxu0 }
 0x37f   : > { %v5995_v62 = vpop.f32.mrf.mxu0 }
 0x380   : > { %v5996_v14 = vadd.f32 %v5995_v62, %v5994_v11  ;;  %v3131_v62 = vld [vmem:[%s7758_s15 + $0x30] sm:$0xff] }
 0x381   : > { %v5997_v15 = vpop.f32.mrf.mxu0 }
 0x382   : > { %v3101_v16 = vpack.c.bf16 %v5996_v14, %v5993_v12 }
 0x383   : > { %v5998_v17 = vpop.f32.mrf.mxu0 }
 0x384   : > { %6346 = vmatmul.mubr.bf16.vlgmr.msra.gmra.mxu1 %v3101_v16  ;;  %v5999_v20 = vadd.f32 %v5998_v17, %v5997_v15  ;;  %v3129_v15 = vld [vmem:[%s7758_s15 + $0x20] sm:$0xff]  ;;  %v3132_v16 = vld [vmem:[%s7758_s15 + $0x38] sm:$0xff] }
 0x385   : > { %v6000_v18 = vpop.f32.mrf.mxu0 }
 0x387   : > { %v6001_v5 = vpop.f32.mrf.mxu0 }
 0x388   : > { %v6002_v21 = vadd.f32 %v6001_v5, %v6000_v18  ;;  %v3130_v5 = vld [vmem:[%s7758_s15 + $0x28] sm:$0xff] }
 0x389   : > { %v6003_v58 = vpop.f32.mrf.mxu0 }
 0x38a   : > { %v3102_v22 = vpack.c.bf16 %v6002_v21, %v5999_v20 }
 0x38b   : > { %v6004_v23 = vpop.f32.mrf.mxu0 }
 0x38c   : > { %6349 = vmatprep.mubr.bf16.mxu1 %v3102_v22  ;;  %v6005_v13 = vadd.f32 %v6004_v23, %v6003_v58 }
 0x38d   : > { %v6006_v24 = vpop.f32.mrf.mxu0 }
 0x38f   : > { %v6007_v4 = vpop.f32.mrf.mxu0 }
 0x390   : > { %v6008_v19 = vadd.f32 %v6007_v4, %v6006_v24 }
 0x391   : > { %v6009_v61 = vpop.f32.mrf.mxu0 }
 0x392   : > { %v3103_v25 = vpack.c.bf16 %v6008_v19, %v6005_v13 }
 0x393   : > { %v6010_v26 = vpop.f32.mrf.mxu0 }
 0x394   : > { %6350 = vmatmul.mubr.bf16.gmra.mxu1 %v3103_v25  ;;  %v6011_v29 = vadd.f32 %v6010_v26, %v6009_v61  ;;  %v3135_v25 = vld [vmem:[%s7758_s15 + $0x50] sm:$0xff] }
 0x395   : > { %v6012_v27 = vpop.f32.mrf.mxu0 }
 0x397   : > { %v6013_v28 = vpop.f32.mrf.mxu0 }
 0x398   : > { %v6014_v30 = vadd.f32 %v6013_v28, %v6012_v27  ;;  %v3133_v28 = vld [vmem:[%s7758_s15 + $0x40] sm:$0xff] }
 0x399   : > { %v6015_v31 = vpop.f32.mrf.mxu0 }
 0x39a   : > { %v3104_v32 = vpack.c.bf16 %v6014_v30, %v6011_v29  ;;  %v3136_v29 = vld [vmem:[%s7758_s15 + $0x58] sm:$0xff] }
 0x39b   : > { %v6016_v33 = vpop.f32.mrf.mxu0 }
 0x39c   : > { %6353 = vmatprep.mubr.bf16.mxu1 %v3104_v32  ;;  %v6017_v34 = vadd.f32 %v6016_v33, %v6015_v31  ;;  %v3134_v32 = vld [vmem:[%s7758_s15 + $0x48] sm:$0xff] }
 0x39d   : > { %v6018_v0 = vpop.f32.mrf.mxu0 }
 0x39f   : > { %v6019_v57 = vpop.f32.mrf.mxu0 }
 0x3a0   : > { %v6020_v35 = vadd.f32 %v6019_v57, %v6018_v0 }
 0x3a1   : > { %v6021_v36 = vpop.f32.mrf.mxu0 }
 0x3a2   : > { %v3105_v37 = vpack.c.bf16 %v6020_v35, %v6017_v34 }
 0x3a3   : > { %v6022_v38 = vpop.f32.mrf.mxu0 }
 0x3a4   : > { %6354 = vmatmul.mubr.bf16.gmra.mxu1 %v3105_v37  ;;  %v6023_v40 = vadd.f32 %v6022_v38, %v6021_v36 }
 0x3a5   : > { %v6024_v39 = vpop.f32.mrf.mxu0 }
 0x3a7   : > { %v6025_v3 = vpop.f32.mrf.mxu0 }
 0x3a8   : > { %v6026_v41 = vadd.f32 %v6025_v3, %v6024_v39 }
 0x3a9   : > { %v6027_v60 = vpop.f32.mrf.mxu0 }
 0x3aa   : > { %v3106_v42 = vpack.c.bf16 %v6026_v41, %v6023_v40  ;;  %v3139_v40 = vld [vmem:[%s7758_s15 + $0x70] sm:$0xff] }
 0x3ab   : > { %v6028_v63 = vpop.f32.mrf.mxu0 }
 0x3ac   : > { %6357 = vmatprep.mubr.bf16.mxu1 %v3106_v42  ;;  %v6029_v45 = vadd.f32 %v6028_v63, %v6027_v60  ;;  %v3137_v42 = vld [vmem:[%s7758_s15 + $0x60] sm:$0xff]  ;;  %v3140_v63 = vld [vmem:[%s7758_s15 + $0x78] sm:$0xff] }
 0x3ad   : > { %v6030_v43 = vpop.f32.mrf.mxu0 }
 0x3af   : > { %v6031_v44 = vpop.f32.mrf.mxu0 }
 0x3b0   : > { %v6032_v46 = vadd.f32 %v6031_v44, %v6030_v43 }
 0x3b2   : > { %v3107_v47 = vpack.c.bf16 %v6032_v46, %v6029_v45  ;;  %v3138_v45 = vld [vmem:[%s7758_s15 + $0x68] sm:$0xff] }
 0x3b4   : > { %6358 = vmatmul.mubr.bf16.gmra.mxu1 %v3107_v47 }
 0x444   : > { %v6347_v49 = vpop.f32.mrf.mxu1 }
 0x445   : > { %v3232_v52 = vadd.f32 %v6347_v49, %v3127_v48 }
 0x446   : > { %v3223_v50 = vpop.f32.mrf.mxu1 }
 0x447   : > { %v3224_v54 = vadd.f32 %v3223_v50, %v3125_v51  ;;  %v3288_v7 = vmax.f32 %v3232_v52, 0.0 }
 0x448   : > { %v6348_v53 = vpop.f32.mrf.mxu1 }
 0x449   : > { %v3235_v56 = vadd.f32 %v6348_v53, %v3128_v2  ;;  %v3286_v9 = vmax.f32 %v3224_v54, 0.0 }
 0x44a   : > { %v3226_v6 = vpop.f32.mrf.mxu1 }
 0x44b   : > { %v3289_v55 = vmax.f32 %v3235_v56, 0.0  ;;  %v3227_v8 = vadd.f32 %v3226_v6, %v3126_v59 }
 0x44d   : > { %v7765_v10 = vpack.c.bf16 %v3289_v55, %v3288_v7  ;;  %v3287_v1 = vmax.f32 %v3227_v8, 0.0 }
 0x44f   : > { %5745 = vst [vmem:[%s7767_s3 + $0x8] sm:$0xff] %v7765_v10   ;;  %v7771_v11 = vpack.c.bf16 %v3287_v1, %v3286_v9 }
 0x451   : > { %5631 = vst [vmem:[%s7767_s3] sm:$0xff] %v7771_v11  }
 0x454   : > { %v6351_v12 = vpop.f32.mrf.mxu1 }
 0x455   : > { %v3248_v17 = vadd.f32 %v6351_v12, %v3131_v62 }
 0x456   : > { %v3239_v14 = vpop.f32.mrf.mxu1 }
 0x457   : > { %v3240_v20 = vadd.f32 %v3239_v14, %v3129_v15  ;;  %v3292_v22 = vmax.f32 %v3248_v17, 0.0 }
 0x458   : > { %v6352_v18 = vpop.f32.mrf.mxu1 }
 0x459   : > { %v3251_v21 = vadd.f32 %v6352_v18, %v3132_v16  ;;  %v3290_v4 = vmax.f32 %v3240_v20, 0.0 }
 0x45a   : > { %v3242_v58 = vpop.f32.mrf.mxu1 }
 0x45b   : > { %v3293_v23 = vmax.f32 %v3251_v21, 0.0  ;;  %v3243_v24 = vadd.f32 %v3242_v58, %v3130_v5 }
 0x45d   : > { %v7779_v13 = vpack.c.bf16 %v3293_v23, %v3292_v22  ;;  %v3291_v19 = vmax.f32 %v3243_v24, 0.0 }
 0x45f   : > { %5747 = vst [vmem:[%s7767_s3 + $0x18] sm:$0xff] %v7779_v13   ;;  %v7783_v61 = vpack.c.bf16 %v3291_v19, %v3290_v4 }
 0x461   : > { %5746 = vst [vmem:[%s7767_s3 + $0x10] sm:$0xff] %v7783_v61  }
 0x464   : > { %v6355_v26 = vpop.f32.mrf.mxu1 }
 0x465   : > { %v3264_v30 = vadd.f32 %v6355_v26, %v3135_v25 }
 0x466   : > { %v3255_v27 = vpop.f32.mrf.mxu1 }
 0x467   : > { %v3256_v33 = vadd.f32 %v3255_v27, %v3133_v28  ;;  %v3296_v34 = vmax.f32 %v3264_v30, 0.0 }
 0x468   : > { %v6356_v31 = vpop.f32.mrf.mxu1 }
 0x469   : > { %v3267_v0 = vadd.f32 %v6356_v31, %v3136_v29  ;;  %v3294_v37 = vmax.f32 %v3256_v33, 0.0 }
 0x46a   : > { %v3258_v57 = vpop.f32.mrf.mxu1 }
 0x46b   : > { %v3297_v35 = vmax.f32 %v3267_v0, 0.0  ;;  %v3259_v36 = vadd.f32 %v3258_v57, %v3134_v32 }
 0x46d   : > { %v3307_v38 = vpack.c.bf16 %v3297_v35, %v3296_v34  ;;  %v3295_v39 = vmax.f32 %v3259_v36, 0.0 }
 0x46f   : > { %5749 = vst [vmem:[%s7767_s3 + $0x28] sm:$0xff] %v3307_v38   ;;  %v3306_v3 = vpack.c.bf16 %v3295_v39, %v3294_v37 }
 0x471   : > { %5748 = vst [vmem:[%s7767_s3 + $0x20] sm:$0xff] %v3306_v3  }
 0x474   : > { %v6359_v41 = vpop.f32.mrf.mxu1 }
 0x475   : > { %v3280_v43 = vadd.f32 %v6359_v41, %v3139_v40 }
 0x476   : > { %v3271_v60 = vpop.f32.mrf.mxu1 }
 0x477   : > { %v3272_v46 = vadd.f32 %v3271_v60, %v3137_v42  ;;  %v3300_v49 = vmax.f32 %v3280_v43, 0.0 }
 0x478   : > { %v6360_v44 = vpop.f32.mrf.mxu1 }
 0x479   : > { %v3283_v47 = vadd.f32 %v6360_v44, %v3140_v63  ;;  %v3298_v2 = vmax.f32 %v3272_v46, 0.0 }
 0x47a   : > { %v3274_v48 = vpop.f32.mrf.mxu1 }
 0x47b   : > { %v3301_v50 = vmax.f32 %v3283_v47, 0.0  ;;  %v3275_v51 = vadd.f32 %v3274_v48, %v3138_v45 }
 0x47d   : > { %v3309_v52 = vpack.c.bf16 %v3301_v50, %v3300_v49  ;;  %v3299_v53 = vmax.f32 %v3275_v51, 0.0  ;;  %3389 = sbr.rel (%p5217_p0) target bundleno = 1644 (0x66c), region = 112 }
 0x47f   : > { %5751 = vst [vmem:[%s7767_s3 + $0x38] sm:$0xff] %v3309_v52   ;;  %v3308_v59 = vpack.c.bf16 %v3299_v53, %v3298_v2 }
 0x481   : > { %5750 = vst [vmem:[%s7767_s3 + $0x30] sm:$0xff] %v3308_v59  }
 0x482   : > { %v6765_v54 = vld [vmem:[%s8125_s12 + $0x38] sm:$0xff]   ;;  %6377 = vmatprep.mubr.bf16.mxu0 %v7771_v11  ;;  %v6766_v56 = vld [vmem:[%s8125_s12 + $0x30] sm:$0xff]   ;;  %v6767_v6 = vld [vmem:[%s8125_s12 + $0x28] sm:$0xff]   ;;  %v6995_v11 = vmov 0.0   ;;  %vm6996_vm3 = vmmov 0  }
 0x483   : > { %6361 = vmatprep.subr.bf16.mxu0 %v6765_v54  ;;  %v6768_v7 = vld [vmem:[%s8125_s12 + $0x20] sm:$0xff]   ;;  %v6769_v55 = vld [vmem:[%s8125_s12 + $0x18] sm:$0xff]   ;;  %v6770_v8 = vld [vmem:[%s8125_s12 + $0x10] sm:$0xff]   ;;  %6393 = vmatprep.subr.bf16.mxu1 %v6995_v11 }
 0x484   : > { %6362 = vmatpush3.bf16.msra.mxu0 %v6765_v54  ;;  %v6771_v9 = vld [vmem:[%s8125_s12 + $0x8] sm:$0xff]   ;;  %v6772_v1 = vld [vmem:[%s8125_s12] sm:$0xff]   ;;  %6409 = vmatprep.mubr.msk.bf16.mxu1 %vm6996_vm3, %v6995_v11 }
 0x485   : > { %6363 = vmatprep.subr.bf16.mxu0 %v6766_v56  ;;  %v5218_v23 = vld [vmem:[%s8126_s13] ss:$0 sm:$0xff] }
 0x488   : > { %6364 = vmatpush3.bf16.msra.mxu0 %v6766_v56 }
 0x489   : > { %6365 = vmatprep.subr.bf16.mxu0 %v6767_v6 }
 0x48c   : > { %6366 = vmatpush3.bf16.msra.mxu0 %v6767_v6  ;;  %v3574_v6 = vld [vmem:[%s7205_s14] sm:$0x1] }
 0x48d   : > { %6367 = vmatprep.subr.bf16.mxu0 %v6768_v7 }
 0x490   : > { %6368 = vmatpush3.bf16.msra.mxu0 %v6768_v7  ;;  %v3623_v7 = vld [vmem:[#allocation6] sm:$0x3] }
 0x491   : > { %6369 = vmatprep.subr.bf16.mxu0 %v6769_v55 }
 0x494   : > { %6370 = vmatpush3.bf16.msra.mxu0 %v6769_v55 }
 0x495   : > { %6371 = vmatprep.subr.bf16.mxu0 %v6770_v8 }
 0x498   : > { %6372 = vmatpush3.bf16.msra.mxu0 %v6770_v8 }
 0x499   : > { %6373 = vmatprep.subr.bf16.mxu0 %v6771_v9 }
 0x49c   : > { %6374 = vmatpush3.bf16.msra.mxu0 %v6771_v9 }
 0x49d   : > { %6375 = vmatprep.subr.bf16.mxu0 %v6772_v1 }
 0x4a0   : > { %6376 = vmatpush3.bf16.msra.mxu0 %v6772_v1 }
 0x4a3   : > { %6378 = vmatmul.mubr.bf16.vlgmr.msra.gmra.mxu0 %v7765_v10 }
 0x4a4   : > { %6381 = vmatprep.mubr.bf16.mxu0 %v7783_v61 }
 0x4ab   : > { %6382 = vmatmul.mubr.bf16.gmra.mxu0 %v7779_v13 }
 0x4ac   : > { %6385 = vmatprep.mubr.bf16.mxu0 %v3306_v3 }
 0x4b3   : > { %6386 = vmatmul.mubr.bf16.gmra.mxu0 %v3307_v38 }
 0x4b4   : > { %6389 = vmatprep.mubr.bf16.mxu0 %v3308_v59 }
 0x4bb   : > { %6390 = vmatmul.mubr.bf16.gmra.mxu0 %v3309_v52 }
 0x563   : > { %v6379_v62 = vpop.f32.mrf.mxu0 }
 0x564   : > { %v3504_v47 = vadd.f32 %v6379_v62, %v5218_v23 }
 0x565   : > { %v3495_v12 = vpop.f32.mrf.mxu0 }
 0x566   : > { %v3560_v2 = vmax.f32 %v3504_v47, 0.0  ;;  %v3496_v52 = vadd.f32 %v5218_v23, %v3495_v12 }
 0x567   : > { %v6380_v14 = vpop.f32.mrf.mxu0 }
 0x568   : > { %v3507_v44 = vadd.f32 %v6380_v14, %v5218_v23  ;;  %v3558_v54 = vmax.f32 %v3496_v52, 0.0 }
 0x569   : > { %v3498_v15 = vpop.f32.mrf.mxu0 }
 0x56a   : > { %v3561_v49 = vmax.f32 %v3507_v44, 0.0  ;;  %v3499_v50 = vadd.f32 %v5218_v23, %v3498_v15 }
 0x56b   : > { %v6383_v16 = vpop.f32.mrf.mxu0 }
 0x56c   : > { %v3520_v3 = vadd.f32 %v6383_v16, %v5218_v23  ;;  %v3576_v53 = vpack.c.bf16 %v3561_v49, %v3560_v2  ;;  %v3559_v59 = vmax.f32 %v3499_v50, 0.0 }
 0x56d   : > { %v3511_v10 = vpop.f32.mrf.mxu0 }
 0x56e   : > { %v3564_v63 = vmax.f32 %v3520_v3, 0.0  ;;  %v3512_v43 = vadd.f32 %v5218_v23, %v3511_v10  ;;  %v3575_v56 = vpack.c.bf16 %v3559_v59, %v3558_v54 }
 0x56f   : > { %v6384_v17 = vpop.f32.mrf.mxu0 }
 0x570   : > { %v3523_v37 = vadd.f32 %v6384_v17, %v5218_v23  ;;  %v3562_v48 = vmax.f32 %v3512_v43, 0.0 }
 0x571   : > { %v3514_v18 = vpop.f32.mrf.mxu0 }
 0x572   : > { %v3565_v41 = vmax.f32 %v3523_v37, 0.0  ;;  %v3515_v60 = vadd.f32 %v5218_v23, %v3514_v18 }
 0x573   : > { %v6387_v5 = vpop.f32.mrf.mxu0 }
 0x574   : > { %v3536_v32 = vadd.f32 %v6387_v5, %v5218_v23  ;;  %v3578_v45 = vpack.c.bf16 %v3565_v41, %v3564_v63  ;;  %v3563_v46 = vmax.f32 %v3515_v60, 0.0 }
 0x575   : > { %v3527_v20 = vpop.f32.mrf.mxu0 }
 0x576   : > { %v3568_v35 = vmax.f32 %v3536_v32, 0.0  ;;  %v3528_v36 = vadd.f32 %v5218_v23, %v3527_v20  ;;  %v3577_v51 = vpack.c.bf16 %v3563_v46, %v3562_v48 }
 0x577   : > { %v6388_v21 = vpop.f32.mrf.mxu0 }
 0x578   : > { %v3539_v29 = vadd.f32 %v6388_v21, %v5218_v23  ;;  %v3566_v40 = vmax.f32 %v3528_v36, 0.0 }
 0x579   : > { %v3530_v58 = vpop.f32.mrf.mxu0 }
 0x57a   : > { %v3569_v0 = vmax.f32 %v3539_v29, 0.0  ;;  %v3531_v57 = vadd.f32 %v5218_v23, %v3530_v58 }
 0x57b   : > { %v6391_v22 = vpop.f32.mrf.mxu0 }
 0x57c   : > { %v3552_v4 = vadd.f32 %v6391_v22, %v5218_v23  ;;  %v3580_v38 = vpack.c.bf16 %v3569_v0, %v3568_v35  ;;  %v3567_v39 = vmax.f32 %v3531_v57, 0.0 }
 0x57d   : > { %v3543_v24 = vpop.f32.mrf.mxu0 }
 0x57e   : > { %v3572_v25 = vmax.f32 %v3552_v4, 0.0  ;;  %v3544_v26 = vadd.f32 %v5218_v23, %v3543_v24  ;;  %v3579_v42 = vpack.c.bf16 %v3567_v39, %v3566_v40 }
 0x57f   : > { %v6392_v13 = vpop.f32.mrf.mxu0 }
 0x580   : > { %v3555_v19 = vadd.f32 %v6392_v13, %v5218_v23  ;;  %v3570_v33 = vmax.f32 %v3544_v26, 0.0 }
 0x581   : > { %v3546_v61 = vpop.f32.mrf.mxu0 }
 0x582   : > { %v3573_v27 = vmax.f32 %v3555_v19, 0.0  ;;  %v3547_v28 = vadd.f32 %v5218_v23, %v3546_v61 }
 0x584   : > { %v3571_v30 = vmax.f32 %v3547_v28, 0.0  ;;  %v3582_v31 = vpack.c.bf16 %v3573_v27, %v3572_v25 }
 0x586   : > { %6394 = vmatpush3.bf16.msra.mxu1 %v3582_v31  ;;  %v3581_v34 = vpack.c.bf16 %v3571_v30, %v3570_v33 }
 0x587   : > { %6395 = vmatprep.subr.bf16.mxu1 %v6995_v11 }
 0x58a   : > { %6396 = vmatpush3.bf16.msra.mxu1 %v3581_v34 }
 0x58b   : > { %6397 = vmatprep.subr.bf16.mxu1 %v6995_v11 }
 0x58e   : > { %6398 = vmatpush3.bf16.msra.mxu1 %v3580_v38 }
 0x58f   : > { %6399 = vmatprep.subr.bf16.mxu1 %v6995_v11 }
 0x592   : > { %6400 = vmatpush3.bf16.msra.mxu1 %v3579_v42 }
 0x593   : > { %6401 = vmatprep.subr.bf16.mxu1 %v6995_v11 }
 0x596   : > { %6402 = vmatpush3.bf16.msra.mxu1 %v3578_v45 }
 0x597   : > { %6403 = vmatprep.subr.bf16.mxu1 %v6995_v11 }
 0x59a   : > { %6404 = vmatpush3.bf16.msra.mxu1 %v3577_v51 }
 0x59b   : > { %6405 = vmatprep.subr.bf16.mxu1 %v6995_v11 }
 0x59e   : > { %6406 = vmatpush3.bf16.msra.mxu1 %v3576_v53 }
 0x59f   : > { %6407 = vmatprep.subr.bf16.mxu1 %v6995_v11 }
 0x5a2   : > { %6408 = vmatpush3.bf16.msra.mxu1 %v3575_v56 }
 0x5a5   : > { %6410 = vmatmul.mubr.bf16.vlgmr.msra.gmra.mxu1 %v3574_v6 }
 0x665   : > { %v3617_v55 = vpop.f32.mrf.mxu1 }
 0x666   : > { %v3624_v8 = vadd.f32 %v3623_v7, %v3617_v55 }
 0x667   : > { %v6411_v9 = vpop.f32.mrf.mxu1 }
 0x668   : > { %3625 = vst [vmem:[#allocation6] sm:$0x3] %v3624_v8 }
 0x669   : > { %v3620_v1 = vpop.f32.mrf.mxu1 }
 0x66b   : > { %v6412_v62 = vpop.f32.mrf.mxu1 }
 0x66c PF: > { %p3626_p1 = scmp.ge.s32.totalorder %s6977_s22, 2  ;;  %p3627_p2 = scmp.eq.s32.totalorder %s8195_s24, 0 }
 0x66e   : > { %p3628_p4 = pnand %p3627_p2, %p3626_p1 }
 0x66f   : > { %s7884_s27 = scalar_lea.vmem (!%p3628_p4), [#allocation3], %s7179_s25  ;;  %s4219_s24 = sshra.s32 (!%p3628_p4), %s7179_s25, 3 }
 0x670   : > { %3631 = sbr.rel (%p3628_p4) target bundleno = 2641 (0xa51), region = 116  ;;  %s5283_s29 = sshll.u32 (!%p3628_p4), %s4219_s24, 2 }
 0x671   : > { %s7893_s21 = scalar_lea.vmem (!%p3628_p4), [#allocation4], %s5283_s29  ;;  %p5284_p3 = scmp.ne.s32.totalorder (!%p3628_p4), %s6977_s22, 3 }
 0x675   : > { %v6773_v11 = vld [vmem:[#allocation5 + $0x78] sm:$0xff]   ;;  %v6775_v14 = vld [vmem:[#allocation5 + $0x70] sm:$0xff]   ;;  %v6777_v16 = vld [vmem:[#allocation5 + $0x68] sm:$0xff]  }
 0x676   : > { %v6774_v12 = vld [vmem:[#allocation5 + $0x38] sm:$0xff]   ;;  %6074 = vmatprep.subr.bf16.mxu0 %v6773_v11  ;;  %v6776_v15 = vld [vmem:[#allocation5 + $0x30] sm:$0xff]   ;;  %v6778_v10 = vld [vmem:[#allocation5 + $0x28] sm:$0xff]  }
 0x677   : > { %6075 = vmatpush3.bf16.msra.mxu0 %v6774_v12  ;;  %v6779_v17 = vld [vmem:[#allocation5 + $0x60] sm:$0xff]   ;;  %v6781_v5 = vld [vmem:[#allocation5 + $0x58] sm:$0xff]   ;;  %v6783_v21 = vld [vmem:[#allocation5 + $0x50] sm:$0xff]  }
 0x678   : > { %6076 = vmatprep.subr.bf16.mxu0 %v6775_v14  ;;  %v6780_v18 = vld [vmem:[#allocation5 + $0x20] sm:$0xff]   ;;  %v6782_v20 = vld [vmem:[#allocation5 + $0x18] sm:$0xff]   ;;  %v6784_v22 = vld [vmem:[#allocation5 + $0x10] sm:$0xff]  }
 0x679   : > { %v6791_v58 = vld [vmem:[%s7192_s19 + $0x4] ss:$8 sps:$4 sm:$0xff]   ;;  %v6813_v19 = vld [vmem:[%s8123_s10 + $0x38] sm:$0xff]   ;;  %v6789_v61 = vld [vmem:[%s7192_s19] ss:$8 sps:$4 sm:$0xff]  }
 0x67a   : > { %3888 = vmatprep.mubr.bf16.mxu0 %v6791_v58  ;;  %v6785_v23 = vld [vmem:[#allocation5 + $0x48] sm:$0xff]   ;;  %v6787_v4 = vld [vmem:[#allocation5 + $0x40] sm:$0xff]   ;;  %v6814_v25 = vld [vmem:[%s8123_s10 + $0x30] sm:$0xff]   ;;  %6413 = vmatprep.subr.bf16.mxu1 %v6813_v19 }
 0x67b   : > { %6077 = vmatpush3.bf16.msra.mxu0 %v6776_v15  ;;  %v6786_v24 = vld [vmem:[#allocation5 + $0x8] sm:$0xff]   ;;  %v6788_v13 = vld [vmem:[#allocation5] sm:$0xff]   ;;  %v6792_v26 = vld [vmem:[%s7192_s19 + $0x14] ss:$8 sps:$4 sm:$0xff]   ;;  %6414 = vmatpush3.bf16.msra.mxu1 %v6813_v19 }
 0x67c   : > { %6078 = vmatprep.subr.bf16.mxu0 %v6777_v16  ;;  %v6815_v27 = vld [vmem:[%s8123_s10 + $0x28] sm:$0xff]   ;;  %6415 = vmatprep.subr.bf16.mxu1 %v6814_v25  ;;  %v6816_v28 = vld [vmem:[%s8123_s10 + $0x20] sm:$0xff]   ;;  %v6794_v29 = vld [vmem:[%s7192_s19 + $0x10] ss:$8 sps:$4 sm:$0xff]  }
 0x67d   : > { %v6795_v30 = vld [vmem:[%s7192_s19 + $0x24] ss:$8 sps:$4 sm:$0xff]   ;;  %v6797_v31 = vld [vmem:[%s7192_s19 + $0x20] ss:$8 sps:$4 sm:$0xff]   ;;  %v6798_v32 = vld [vmem:[%s7192_s19 + $0x34] ss:$8 sps:$4 sm:$0xff]  }
 0x67e   : > { %v6800_v33 = vld [vmem:[%s7192_s19 + $0x30] ss:$8 sps:$4 sm:$0xff]   ;;  %v6801_v0 = vld [vmem:[%s7192_s19 + $0x44] ss:$8 sps:$4 sm:$0xff]   ;;  %v6803_v57 = vld [vmem:[%s7192_s19 + $0x40] ss:$8 sps:$4 sm:$0xff]  }
 0x67f   : > { %6079 = vmatpush3.bf16.msra.mxu0 %v6778_v10  ;;  %6416 = vmatpush3.bf16.msra.mxu1 %v6814_v25  ;;  %v6804_v34 = vld [vmem:[%s7192_s19 + $0x54] ss:$8 sps:$4 sm:$0xff]   ;;  %v6806_v35 = vld [vmem:[%s7192_s19 + $0x50] ss:$8 sps:$4 sm:$0xff]   ;;  %v6807_v36 = vld [vmem:[%s7192_s19 + $0x64] ss:$8 sps:$4 sm:$0xff]  }
 0x680   : > { %6080 = vmatprep.subr.bf16.mxu0 %v6779_v17  ;;  %6417 = vmatprep.subr.bf16.mxu1 %v6815_v27  ;;  %v6809_v37 = vld [vmem:[%s7192_s19 + $0x60] ss:$8 sps:$4 sm:$0xff]   ;;  %v6810_v38 = vld [vmem:[%s7192_s19 + $0x74] ss:$8 sps:$4 sm:$0xff]   ;;  %v6812_v39 = vld [vmem:[%s7192_s19 + $0x70] ss:$8 sps:$4 sm:$0xff]  }
 0x681   : > { %v6817_v3 = vld [vmem:[%s8123_s10 + $0x18] sm:$0xff]   ;;  %v6818_v40 = vld [vmem:[%s8123_s10 + $0x10] sm:$0xff]   ;;  %v6819_v41 = vld [vmem:[%s8123_s10 + $0x8] sm:$0xff]  }
 0x682   : > { %v6820_v60 = vld [vmem:[%s8123_s10] sm:$0xff]  }
 0x683   : > { %6081 = vmatpush3.bf16.msra.mxu0 %v6780_v18  ;;  %6418 = vmatpush3.bf16.msra.mxu1 %v6815_v27 }
 0x684   : > { %6082 = vmatprep.subr.bf16.mxu0 %v6781_v5  ;;  %6419 = vmatprep.subr.bf16.mxu1 %v6816_v28 }
 0x687   : > { %6083 = vmatpush3.bf16.msra.mxu0 %v6782_v20  ;;  %6420 = vmatpush3.bf16.msra.mxu1 %v6816_v28 }
 0x688   : > { %6084 = vmatprep.subr.bf16.mxu0 %v6783_v21  ;;  %6421 = vmatprep.subr.bf16.mxu1 %v6817_v3 }
 0x68b   : > { %6085 = vmatpush3.bf16.msra.mxu0 %v6784_v22  ;;  %6422 = vmatpush3.bf16.msra.mxu1 %v6817_v3  ;;  %v3981_v3 = vld [vmem:[%s7884_s27 + $0x18] sm:$0xff] }
 0x68c   : > { %6086 = vmatprep.subr.bf16.mxu0 %v6785_v23  ;;  %6423 = vmatprep.subr.bf16.mxu1 %v6818_v40 }
 0x68f   : > { %6087 = vmatpush3.bf16.msra.mxu0 %v6786_v24  ;;  %6424 = vmatpush3.bf16.msra.mxu1 %v6818_v40 }
 0x690   : > { %6088 = vmatprep.subr.bf16.mxu0 %v6787_v4  ;;  %6425 = vmatprep.subr.bf16.mxu1 %v6819_v41 }
 0x693   : > { %6089 = vmatpush3.bf16.msra.mxu0 %v6788_v13  ;;  %6426 = vmatpush3.bf16.msra.mxu1 %v6819_v41 }
 0x694   : > { %6427 = vmatprep.subr.bf16.mxu1 %v6820_v60 }
 0x696   : > { %3889 = vmatmul.mubr.bf16.vlgmr.msra.gmra.mxu0 %v6789_v61 }
 0x697   : > { %3896 = vmatprep.mubr.bf16.mxu0 %v6792_v26  ;;  %6428 = vmatpush3.bf16.msra.mxu1 %v6820_v60  ;;  %v3979_v60 = vld [vmem:[%s7884_s27 + $0x8] sm:$0xff] }
 0x69e   : > { %3897 = vmatmul.mubr.bf16.gmra.mxu0 %v6794_v29 }
 0x69f   : > { %3904 = vmatprep.mubr.bf16.mxu0 %v6795_v30 }
 0x6a6   : > { %3905 = vmatmul.mubr.bf16.gmra.mxu0 %v6797_v31 }
 0x6a7   : > { %3912 = vmatprep.mubr.bf16.mxu0 %v6798_v32 }
 0x6ae   : > { %3913 = vmatmul.mubr.bf16.gmra.mxu0 %v6800_v33 }
 0x6af   : > { %3920 = vmatprep.mubr.bf16.mxu0 %v6801_v0 }
 0x6b6   : > { %3921 = vmatmul.mubr.bf16.gmra.mxu0 %v6803_v57 }
 0x6b7   : > { %3928 = vmatprep.mubr.bf16.mxu0 %v6804_v34 }
 0x6be   : > { %3929 = vmatmul.mubr.bf16.gmra.mxu0 %v6806_v35 }
 0x6bf   : > { %3936 = vmatprep.mubr.bf16.mxu0 %v6807_v36  ;;  %v3980_v36 = vld [vmem:[%s7884_s27 + $0x10] sm:$0xff] }
 0x6c6   : > { %3937 = vmatmul.mubr.bf16.gmra.mxu0 %v6809_v37 }
 0x6c7   : > { %3944 = vmatprep.mubr.bf16.mxu0 %v6810_v38 }
 0x6ce   : > { %3945 = vmatmul.mubr.bf16.gmra.mxu0 %v6812_v39  ;;  %v3978_v39 = vld [vmem:[%s7884_s27] sm:$0xff] }
 0x756   : > { %v6090_v42 = vpop.f32.mrf.mxu0 }
 0x758   : > { %v6091_v63 = vpop.f32.mrf.mxu0 }
 0x759   : > { %v6092_v45 = vadd.f32 %v6091_v63, %v6090_v42 }
 0x75a   : > { %v6093_v43 = vpop.f32.mrf.mxu0 }
 0x75c   : > { %v6094_v44 = vpop.f32.mrf.mxu0 }
 0x75d   : > { %v6095_v46 = vadd.f32 %v6094_v44, %v6093_v43 }
 0x75e   : > { %v6096_v47 = vpop.f32.mrf.mxu0 }
 0x75f   : > { %v3953_v48 = vpack.c.bf16 %v6095_v46, %v6092_v45 }
 0x760   : > { %v6097_v49 = vpop.f32.mrf.mxu0 }
 0x761   : > { %6429 = vmatprep.mubr.bf16.mxu1 %v3953_v48  ;;  %v6098_v2 = vadd.f32 %v6097_v49, %v6096_v47 }
 0x762   : > { %v6099_v50 = vpop.f32.mrf.mxu0 }
 0x764   : > { %v6100_v51 = vpop.f32.mrf.mxu0 }
 0x765   : > { %v6101_v52 = vadd.f32 %v6100_v51, %v6099_v50  ;;  %v3984_v51 = vld [vmem:[%s7884_s27 + $0x30] sm:$0xff] }
 0x766   : > { %v6102_v53 = vpop.f32.mrf.mxu0 }
 0x767   : > { %v3954_v59 = vpack.c.bf16 %v6101_v52, %v6098_v2 }
 0x768   : > { %v6103_v54 = vpop.f32.mrf.mxu0 }
 0x769   : > { %6430 = vmatmul.mubr.bf16.vlgmr.msra.gmra.mxu1 %v3954_v59  ;;  %v6104_v7 = vadd.f32 %v6103_v54, %v6102_v53  ;;  %v3982_v53 = vld [vmem:[%s7884_s27 + $0x20] sm:$0xff]  ;;  %v3985_v59 = vld [vmem:[%s7884_s27 + $0x38] sm:$0xff] }
 0x76a   : > { %v6105_v56 = vpop.f32.mrf.mxu0 }
 0x76c   : > { %v6106_v6 = vpop.f32.mrf.mxu0 }
 0x76d   : > { %v6107_v55 = vadd.f32 %v6106_v6, %v6105_v56  ;;  %v3983_v6 = vld [vmem:[%s7884_s27 + $0x28] sm:$0xff] }
 0x76e   : > { %v6108_v8 = vpop.f32.mrf.mxu0 }
 0x76f   : > { %v3955_v9 = vpack.c.bf16 %v6107_v55, %v6104_v7 }
 0x770   : > { %v6109_v1 = vpop.f32.mrf.mxu0 }
 0x771   : > { %6433 = vmatprep.mubr.bf16.mxu1 %v3955_v9  ;;  %v6110_v12 = vadd.f32 %v6109_v1, %v6108_v8 }
 0x772   : > { %v6111_v62 = vpop.f32.mrf.mxu0 }
 0x774   : > { %v6112_v11 = vpop.f32.mrf.mxu0 }
 0x775   : > { %v6113_v14 = vadd.f32 %v6112_v11, %v6111_v62 }
 0x776   : > { %v6114_v15 = vpop.f32.mrf.mxu0 }
 0x777   : > { %v3956_v16 = vpack.c.bf16 %v6113_v14, %v6110_v12 }
 0x778   : > { %v6115_v10 = vpop.f32.mrf.mxu0 }
 0x779   : > { %6434 = vmatmul.mubr.bf16.gmra.mxu1 %v3956_v16  ;;  %v6116_v5 = vadd.f32 %v6115_v10, %v6114_v15  ;;  %v3988_v16 = vld [vmem:[%s7884_s27 + $0x50] sm:$0xff] }
 0x77a   : > { %v6117_v17 = vpop.f32.mrf.mxu0 }
 0x77c   : > { %v6118_v18 = vpop.f32.mrf.mxu0 }
 0x77d   : > { %v6119_v20 = vadd.f32 %v6118_v18, %v6117_v17  ;;  %v3986_v18 = vld [vmem:[%s7884_s27 + $0x40] sm:$0xff] }
 0x77e   : > { %v6120_v21 = vpop.f32.mrf.mxu0 }
 0x77f   : > { %v3957_v58 = vpack.c.bf16 %v6119_v20, %v6116_v5  ;;  %v3989_v5 = vld [vmem:[%s7884_s27 + $0x58] sm:$0xff] }
 0x780   : > { %v6121_v22 = vpop.f32.mrf.mxu0 }
 0x781   : > { %6437 = vmatprep.mubr.bf16.mxu1 %v3957_v58  ;;  %v6122_v4 = vadd.f32 %v6121_v22, %v6120_v21  ;;  %v3987_v58 = vld [vmem:[%s7884_s27 + $0x48] sm:$0xff] }
 0x782   : > { %v6123_v23 = vpop.f32.mrf.mxu0 }
 0x784   : > { %v6124_v24 = vpop.f32.mrf.mxu0 }
 0x785   : > { %v6125_v13 = vadd.f32 %v6124_v24, %v6123_v23 }
 0x786   : > { %v6126_v19 = vpop.f32.mrf.mxu0 }
 0x787   : > { %v3958_v61 = vpack.c.bf16 %v6125_v13, %v6122_v4 }
 0x788   : > { %v6127_v25 = vpop.f32.mrf.mxu0 }
 0x789   : > { %6438 = vmatmul.mubr.bf16.gmra.mxu1 %v3958_v61  ;;  %v6128_v28 = vadd.f32 %v6127_v25, %v6126_v19 }
 0x78a   : > { %v6129_v26 = vpop.f32.mrf.mxu0 }
 0x78c   : > { %v6130_v27 = vpop.f32.mrf.mxu0 }
 0x78d   : > { %v6131_v29 = vadd.f32 %v6130_v27, %v6129_v26 }
 0x78e   : > { %v6132_v30 = vpop.f32.mrf.mxu0 }
 0x78f   : > { %v3959_v31 = vpack.c.bf16 %v6131_v29, %v6128_v28  ;;  %v3992_v28 = vld [vmem:[%s7884_s27 + $0x70] sm:$0xff] }
 0x790   : > { %v6133_v32 = vpop.f32.mrf.mxu0 }
 0x791   : > { %6441 = vmatprep.mubr.bf16.mxu1 %v3959_v31  ;;  %v6134_v57 = vadd.f32 %v6133_v32, %v6132_v30  ;;  %v3990_v31 = vld [vmem:[%s7884_s27 + $0x60] sm:$0xff]  ;;  %v3993_v32 = vld [vmem:[%s7884_s27 + $0x78] sm:$0xff] }
 0x792   : > { %v6135_v33 = vpop.f32.mrf.mxu0 }
 0x794   : > { %v6136_v0 = vpop.f32.mrf.mxu0 }
 0x795   : > { %v6137_v34 = vadd.f32 %v6136_v0, %v6135_v33 }
 0x797   : > { %v3960_v35 = vpack.c.bf16 %v6137_v34, %v6134_v57  ;;  %v3991_v57 = vld [vmem:[%s7884_s27 + $0x68] sm:$0xff] }
 0x799   : > { %6442 = vmatmul.mubr.bf16.gmra.mxu1 %v3960_v35 }
 0x829   : > { %v6431_v37 = vpop.f32.mrf.mxu1 }
 0x82a   : > { %v4085_v40 = vadd.f32 %v6431_v37, %v3980_v36 }
 0x82b   : > { %v4076_v38 = vpop.f32.mrf.mxu1 }
 0x82c   : > { %v4077_v42 = vadd.f32 %v4076_v38, %v3978_v39  ;;  %v4141_v44 = vmax.f32 %v4085_v40, 0.0 }
 0x82d   : > { %v6432_v41 = vpop.f32.mrf.mxu1 }
 0x82e   : > { %v4088_v63 = vadd.f32 %v6432_v41, %v3981_v3  ;;  %v4139_v47 = vmax.f32 %v4077_v42, 0.0 }
 0x82f   : > { %v4079_v43 = vpop.f32.mrf.mxu1 }
 0x830   : > { %v4142_v45 = vmax.f32 %v4088_v63, 0.0  ;;  %v4080_v46 = vadd.f32 %v4079_v43, %v3979_v60 }
 0x832   : > { %v7891_v48 = vpack.c.bf16 %v4142_v45, %v4141_v44  ;;  %v4140_v49 = vmax.f32 %v4080_v46, 0.0 }
 0x834   : > { %5752 = vst [vmem:[%s7893_s21 + $0x8] sm:$0xff] %v7891_v48   ;;  %v7897_v50 = vpack.c.bf16 %v4140_v49, %v4139_v47 }
 0x836   : > { %5671 = vst [vmem:[%s7893_s21] sm:$0xff] %v7897_v50  }
 0x839   : > { %v6435_v2 = vpop.f32.mrf.mxu1 }
 0x83a   : > { %v4101_v54 = vadd.f32 %v6435_v2, %v3984_v51 }
 0x83b   : > { %v4092_v52 = vpop.f32.mrf.mxu1 }
 0x83c   : > { %v4093_v7 = vadd.f32 %v4092_v52, %v3982_v53  ;;  %v4145_v9 = vmax.f32 %v4101_v54, 0.0 }
 0x83d   : > { %v6436_v56 = vpop.f32.mrf.mxu1 }
 0x83e   : > { %v4104_v55 = vadd.f32 %v6436_v56, %v3985_v59  ;;  %v4143_v11 = vmax.f32 %v4093_v7, 0.0 }
 0x83f   : > { %v4095_v8 = vpop.f32.mrf.mxu1 }
 0x840   : > { %v4146_v1 = vmax.f32 %v4104_v55, 0.0  ;;  %v4096_v62 = vadd.f32 %v4095_v8, %v3983_v6 }
 0x842   : > { %v7905_v12 = vpack.c.bf16 %v4146_v1, %v4145_v9  ;;  %v4144_v14 = vmax.f32 %v4096_v62, 0.0 }
 0x844   : > { %5754 = vst [vmem:[%s7893_s21 + $0x18] sm:$0xff] %v7905_v12   ;;  %v7909_v15 = vpack.c.bf16 %v4144_v14, %v4143_v11 }
 0x846   : > { %5753 = vst [vmem:[%s7893_s21 + $0x10] sm:$0xff] %v7909_v15  }
 0x849   : > { %v6439_v10 = vpop.f32.mrf.mxu1 }
 0x84a   : > { %v4117_v20 = vadd.f32 %v6439_v10, %v3988_v16 }
 0x84b   : > { %v4108_v17 = vpop.f32.mrf.mxu1 }
 0x84c   : > { %v4109_v22 = vadd.f32 %v4108_v17, %v3986_v18  ;;  %v4149_v4 = vmax.f32 %v4117_v20, 0.0 }
 0x84d   : > { %v6440_v21 = vpop.f32.mrf.mxu1 }
 0x84e   : > { %v4120_v23 = vadd.f32 %v6440_v21, %v3989_v5  ;;  %v4147_v61 = vmax.f32 %v4109_v22, 0.0 }
 0x84f   : > { %v4111_v24 = vpop.f32.mrf.mxu1 }
 0x850   : > { %v4150_v13 = vmax.f32 %v4120_v23, 0.0  ;;  %v4112_v19 = vadd.f32 %v4111_v24, %v3987_v58 }
 0x852   : > { %v4160_v25 = vpack.c.bf16 %v4150_v13, %v4149_v4  ;;  %v4148_v26 = vmax.f32 %v4112_v19, 0.0 }
 0x854   : > { %5756 = vst [vmem:[%s7893_s21 + $0x28] sm:$0xff] %v4160_v25   ;;  %v4159_v27 = vpack.c.bf16 %v4148_v26, %v4147_v61 }
 0x856   : > { %5755 = vst [vmem:[%s7893_s21 + $0x20] sm:$0xff] %v4159_v27  }
 0x859   : > { %v6443_v29 = vpop.f32.mrf.mxu1 }
 0x85a   : > { %v4133_v33 = vadd.f32 %v6443_v29, %v3992_v28 }
 0x85b   : > { %v4124_v30 = vpop.f32.mrf.mxu1 }
 0x85c   : > { %v4125_v34 = vadd.f32 %v4124_v30, %v3990_v31  ;;  %v4153_v37 = vmax.f32 %v4133_v33, 0.0 }
 0x85d   : > { %v6444_v0 = vpop.f32.mrf.mxu1 }
 0x85e   : > { %v4136_v35 = vadd.f32 %v6444_v0, %v3993_v32  ;;  %v4151_v3 = vmax.f32 %v4125_v34, 0.0 }
 0x85f   : > { %v4127_v36 = vpop.f32.mrf.mxu1 }
 0x860   : > { %v4154_v38 = vmax.f32 %v4136_v35, 0.0  ;;  %v4128_v39 = vadd.f32 %v4127_v36, %v3991_v57 }
 0x862   : > { %v4162_v40 = vpack.c.bf16 %v4154_v38, %v4153_v37  ;;  %v4152_v41 = vmax.f32 %v4128_v39, 0.0  ;;  %4242 = sbr.rel (%p5284_p3) target bundleno = 2641 (0xa51), region = 120 }
 0x864   : > { %5758 = vst [vmem:[%s7893_s21 + $0x38] sm:$0xff] %v4162_v40   ;;  %v4161_v60 = vpack.c.bf16 %v4152_v41, %v4151_v3 }
 0x866   : > { %5757 = vst [vmem:[%s7893_s21 + $0x30] sm:$0xff] %v4161_v60  }
 0x867   : > { %v6821_v42 = vld [vmem:[%s8125_s12 + $0x38] sm:$0xff]   ;;  %6461 = vmatprep.mubr.bf16.mxu0 %v7897_v50  ;;  %v6822_v63 = vld [vmem:[%s8125_s12 + $0x30] sm:$0xff]   ;;  %v6823_v43 = vld [vmem:[%s8125_s12 + $0x28] sm:$0xff]   ;;  %v6997_v50 = vmov 0.0   ;;  %vm6998_vm4 = vmmov 0  }
 0x868   : > { %6445 = vmatprep.subr.bf16.mxu0 %v6821_v42  ;;  %v6824_v44 = vld [vmem:[%s8125_s12 + $0x20] sm:$0xff]   ;;  %v6825_v45 = vld [vmem:[%s8125_s12 + $0x18] sm:$0xff]   ;;  %v6826_v46 = vld [vmem:[%s8125_s12 + $0x10] sm:$0xff]   ;;  %6477 = vmatprep.subr.bf16.mxu1 %v6997_v50 }
 0x869   : > { %6446 = vmatpush3.bf16.msra.mxu0 %v6821_v42  ;;  %v6827_v47 = vld [vmem:[%s8125_s12 + $0x8] sm:$0xff]   ;;  %v6828_v49 = vld [vmem:[%s8125_s12] sm:$0xff]   ;;  %6493 = vmatprep.mubr.msk.bf16.mxu1 %vm6998_vm4, %v6997_v50 }
 0x86a   : > { %6447 = vmatprep.subr.bf16.mxu0 %v6822_v63  ;;  %v5285_v1 = vld [vmem:[%s8126_s13] ss:$0 sm:$0xff] }
 0x86d   : > { %6448 = vmatpush3.bf16.msra.mxu0 %v6822_v63 }
 0x86e   : > { %6449 = vmatprep.subr.bf16.mxu0 %v6823_v43 }
 0x871   : > { %6450 = vmatpush3.bf16.msra.mxu0 %v6823_v43  ;;  %v4427_v43 = vld [vmem:[%s7205_s14] sm:$0x1] }
 0x872   : > { %6451 = vmatprep.subr.bf16.mxu0 %v6824_v44 }
 0x875   : > { %6452 = vmatpush3.bf16.msra.mxu0 %v6824_v44  ;;  %v4476_v44 = vld [vmem:[#allocation6] sm:$0x3] }
 0x876   : > { %6453 = vmatprep.subr.bf16.mxu0 %v6825_v45 }
 0x879   : > { %6454 = vmatpush3.bf16.msra.mxu0 %v6825_v45 }
 0x87a   : > { %6455 = vmatprep.subr.bf16.mxu0 %v6826_v46 }
 0x87d   : > { %6456 = vmatpush3.bf16.msra.mxu0 %v6826_v46 }
 0x87e   : > { %6457 = vmatprep.subr.bf16.mxu0 %v6827_v47 }
 0x881   : > { %6458 = vmatpush3.bf16.msra.mxu0 %v6827_v47 }
 0x882   : > { %6459 = vmatprep.subr.bf16.mxu0 %v6828_v49 }
 0x885   : > { %6460 = vmatpush3.bf16.msra.mxu0 %v6828_v49 }
 0x888   : > { %6462 = vmatmul.mubr.bf16.vlgmr.msra.gmra.mxu0 %v7891_v48 }
 0x889   : > { %6465 = vmatprep.mubr.bf16.mxu0 %v7909_v15 }
 0x890   : > { %6466 = vmatmul.mubr.bf16.gmra.mxu0 %v7905_v12 }
 0x891   : > { %6469 = vmatprep.mubr.bf16.mxu0 %v4159_v27 }
 0x898   : > { %6470 = vmatmul.mubr.bf16.gmra.mxu0 %v4160_v25 }
 0x899   : > { %6473 = vmatprep.mubr.bf16.mxu0 %v4161_v60 }
 0x8a0   : > { %6474 = vmatmul.mubr.bf16.gmra.mxu0 %v4162_v40 }
 0x948   : > { %v6463_v51 = vpop.f32.mrf.mxu0 }
 0x949   : > { %v4357_v35 = vadd.f32 %v6463_v51, %v5285_v1 }
 0x94a   : > { %v4348_v2 = vpop.f32.mrf.mxu0 }
 0x94b   : > { %v4413_v3 = vmax.f32 %v4357_v35, 0.0  ;;  %v4349_v40 = vadd.f32 %v5285_v1, %v4348_v2 }
 0x94c   : > { %v6464_v52 = vpop.f32.mrf.mxu0 }
 0x94d   : > { %v4360_v0 = vadd.f32 %v6464_v52, %v5285_v1  ;;  %v4411_v42 = vmax.f32 %v4349_v40, 0.0 }
 0x94e   : > { %v4351_v53 = vpop.f32.mrf.mxu0 }
 0x94f   : > { %v4414_v37 = vmax.f32 %v4360_v0, 0.0  ;;  %v4352_v38 = vadd.f32 %v5285_v1, %v4351_v53 }
 0x950   : > { %v6467_v59 = vpop.f32.mrf.mxu0 }
 0x951   : > { %v4373_v27 = vadd.f32 %v6467_v59, %v5285_v1  ;;  %v4429_v41 = vpack.c.bf16 %v4414_v37, %v4413_v3  ;;  %v4412_v60 = vmax.f32 %v4352_v38, 0.0 }
 0x952   : > { %v4364_v48 = vpop.f32.mrf.mxu0 }
 0x953   : > { %v4417_v32 = vmax.f32 %v4373_v27, 0.0  ;;  %v4365_v33 = vadd.f32 %v5285_v1, %v4364_v48  ;;  %v4428_v63 = vpack.c.bf16 %v4412_v60, %v4411_v42 }
 0x954   : > { %v6468_v54 = vpop.f32.mrf.mxu0 }
 0x955   : > { %v4376_v61 = vadd.f32 %v6468_v54, %v5285_v1  ;;  %v4415_v36 = vmax.f32 %v4365_v33, 0.0 }
 0x956   : > { %v4367_v56 = vpop.f32.mrf.mxu0 }
 0x957   : > { %v4418_v29 = vmax.f32 %v4376_v61, 0.0  ;;  %v4368_v30 = vadd.f32 %v5285_v1, %v4367_v56 }
 0x958   : > { %v6471_v6 = vpop.f32.mrf.mxu0 }
 0x959   : > { %v4389_v58 = vadd.f32 %v6471_v6, %v5285_v1  ;;  %v4431_v57 = vpack.c.bf16 %v4418_v29, %v4417_v32  ;;  %v4416_v34 = vmax.f32 %v4368_v30, 0.0 }
 0x95a   : > { %v4380_v7 = vpop.f32.mrf.mxu0 }
 0x95b   : > { %v4421_v13 = vmax.f32 %v4389_v58, 0.0  ;;  %v4381_v19 = vadd.f32 %v5285_v1, %v4380_v7  ;;  %v4430_v39 = vpack.c.bf16 %v4416_v34, %v4415_v36 }
 0x95c   : > { %v6472_v55 = vpop.f32.mrf.mxu0 }
 0x95d   : > { %v4392_v5 = vadd.f32 %v6472_v55, %v5285_v1  ;;  %v4419_v28 = vmax.f32 %v4381_v19, 0.0 }
 0x95e   : > { %v4383_v8 = vpop.f32.mrf.mxu0 }
 0x95f   : > { %v4422_v23 = vmax.f32 %v4392_v5, 0.0  ;;  %v4384_v24 = vadd.f32 %v5285_v1, %v4383_v8 }
 0x960   : > { %v6475_v9 = vpop.f32.mrf.mxu0 }
 0x961   : > { %v4405_v11 = vadd.f32 %v6475_v9, %v5285_v1  ;;  %v4433_v25 = vpack.c.bf16 %v4422_v23, %v4421_v13  ;;  %v4420_v26 = vmax.f32 %v4384_v24, 0.0 }
 0x962   : > { %v4396_v62 = vpop.f32.mrf.mxu0 }
 0x963   : > { %v4425_v16 = vmax.f32 %v4405_v11, 0.0  ;;  %v4397_v10 = vadd.f32 %v5285_v1, %v4396_v62  ;;  %v4432_v31 = vpack.c.bf16 %v4420_v26, %v4419_v28 }
 0x964   : > { %v6476_v12 = vpop.f32.mrf.mxu0 }
 0x965   : > { %v4408_v14 = vadd.f32 %v6476_v12, %v5285_v1  ;;  %v4423_v22 = vmax.f32 %v4397_v10, 0.0 }
 0x966   : > { %v4399_v15 = vpop.f32.mrf.mxu0 }
 0x967   : > { %v4426_v17 = vmax.f32 %v4408_v14, 0.0  ;;  %v4400_v18 = vadd.f32 %v5285_v1, %v4399_v15 }
 0x969   : > { %v4424_v20 = vmax.f32 %v4400_v18, 0.0  ;;  %v4435_v21 = vpack.c.bf16 %v4426_v17, %v4425_v16 }
 0x96b   : > { %6478 = vmatpush3.bf16.msra.mxu1 %v4435_v21  ;;  %v4434_v4 = vpack.c.bf16 %v4424_v20, %v4423_v22 }
 0x96c   : > { %6479 = vmatprep.subr.bf16.mxu1 %v6997_v50 }
 0x96f   : > { %6480 = vmatpush3.bf16.msra.mxu1 %v4434_v4 }
 0x970   : > { %6481 = vmatprep.subr.bf16.mxu1 %v6997_v50 }
 0x973   : > { %6482 = vmatpush3.bf16.msra.mxu1 %v4433_v25 }
 0x974   : > { %6483 = vmatprep.subr.bf16.mxu1 %v6997_v50 }
 0x977   : > { %6484 = vmatpush3.bf16.msra.mxu1 %v4432_v31 }
 0x978   : > { %6485 = vmatprep.subr.bf16.mxu1 %v6997_v50 }
 0x97b   : > { %6486 = vmatpush3.bf16.msra.mxu1 %v4431_v57 }
 0x97c   : > { %6487 = vmatprep.subr.bf16.mxu1 %v6997_v50 }
 0x97f   : > { %6488 = vmatpush3.bf16.msra.mxu1 %v4430_v39 }
 0x980   : > { %6489 = vmatprep.subr.bf16.mxu1 %v6997_v50 }
 0x983   : > { %6490 = vmatpush3.bf16.msra.mxu1 %v4429_v41 }
 0x984   : > { %6491 = vmatprep.subr.bf16.mxu1 %v6997_v50 }
 0x987   : > { %6492 = vmatpush3.bf16.msra.mxu1 %v4428_v63 }
 0x98a   : > { %6494 = vmatmul.mubr.bf16.vlgmr.msra.gmra.mxu1 %v4427_v43 }
 0xa4a   : > { %v4470_v45 = vpop.f32.mrf.mxu1 }
 0xa4b   : > { %v4477_v46 = vadd.f32 %v4476_v44, %v4470_v45 }
 0xa4c   : > { %v6495_v47 = vpop.f32.mrf.mxu1 }
 0xa4d   : > { %4478 = vst [vmem:[#allocation6] sm:$0x3] %v4477_v46 }
 0xa4e   : > { %v4473_v49 = vpop.f32.mrf.mxu1 }
 0xa50   : > { %v6496_v51 = vpop.f32.mrf.mxu1 }
 0xa51 PF: > { %p4480_p7 = scmp.eq.s32.totalorder %s6973_s1, 1 }
 0xa53   : > { %p4481_p5 = pnand %p4480_p7, %p754_p6 }
 0xa54   : > { %s8166_s3 = sld [smem:[#allocation29_spill]] (!%p4481_p5) }
 0xa55   : > { %4484 = sbr.rel (%p4481_p5) target bundleno = 3687 (0xe67), region = 124  ;;  %s8167_s26 = sld [smem:[#allocation30_spill]] (!%p4481_p5) }
 0xa56   : > { %s8168_s29 = sld [smem:[#allocation27_spill]] (!%p4481_p5) }
 0xa5a   : > { %v6829_v50 = vld [vmem:[#allocation7 + $0x38] sm:$0xff]   ;;  %v6999_v2 = vmov 0.0   ;;  %v6830_v52 = vld [vmem:[#allocation7 + $0x30] sm:$0xff]   ;;  %vm7000_vm5 = vmmov 0   ;;  %v6831_v53 = vld [vmem:[#allocation7 + $0x28] sm:$0xff]   ;;  %vm4693_vm6 = vcmask 9216   ;;  %v4725_v41 = vlaneseq }
 0xa5b   : > { %6497 = vmatprep.subr.bf16.mxu0 %v6999_v2  ;;  %6517 = vmatprep.subr.mxu1 %v6999_v2  ;;  %v4615_v59 = vld [vmem:[%s8129_s16 + $0x78] sm:$0xff]  ;;  %v4614_v48 = vld [vmem:[%s8129_s16 + $0x70] sm:$0xff]  ;;  %v6832_v54 = vld [vmem:[#allocation7 + $0x20] sm:$0xff]   ;;  %vm4723_vm8 = vcmask 0   ;;  %vm4743_vm9 = vcmask 1041408  }
 0xa5c   : > { %6498 = vmatpush3.bf16.msra.mxu0 %v6829_v50  ;;  %6513 = vmatprep.mubr.msk.bf16.mxu0 %vm7000_vm5, %v6999_v2  ;;  %v4613_v56 = vld [vmem:[%s8129_s16 + $0x68] sm:$0xff]  ;;  %v4612_v6 = vld [vmem:[%s8129_s16 + $0x60] sm:$0xff]  ;;  %v4611_v55 = vld [vmem:[%s8129_s16 + $0x58] sm:$0xff]  ;;  %v4726_v60 = vand.u32 127, %v4725_v41 }
 0xa5d   : > { %6499 = vmatprep.subr.bf16.mxu0 %v6999_v2  ;;  %6549 = vmatprep.mubr.msk.f32.mxu1 %vm7000_vm5, %v6999_v2  ;;  %v6833_v7 = vld [vmem:[#allocation7 + $0x18] sm:$0xff]   ;;  %v4610_v8 = vld [vmem:[%s8129_s16 + $0x50] sm:$0xff]  ;;  %v4609_v1 = vld [vmem:[%s8129_s16 + $0x48] sm:$0xff] }
 0xa5e   : > { %6518 = vmatpush3.msra.mxu1 %v4615_v59  ;;  %v6834_v9 = vld [vmem:[#allocation7 + $0x10] sm:$0xff]   ;;  %v4608_v62 = vld [vmem:[%s8129_s16 + $0x40] sm:$0xff]  ;;  %v6835_v11 = vld [vmem:[#allocation7 + $0x8] sm:$0xff]   ;;  %v4727_v42 = vcvt.s32.f32 %v4726_v60 }
 0xa5f   : > { %6519 = vmatprep.subr.mxu1 %v6999_v2  ;;  %v4485_v12 = vld [vmem:[#allocation6] sm:$0x3]  ;;  %v4607_v14 = vld [vmem:[%s8129_s16 + $0x38] sm:$0xff]  ;;  %v4606_v15 = vld [vmem:[%s8129_s16 + $0x30] sm:$0xff] }
 0xa60   : > { %6500 = vmatpush3.bf16.msra.mxu0 %v6830_v52  ;;  %6520 = vmatpush3.msra.mxu1 %v4614_v48  ;;  %v4486_v16 = vmax.f32 %v4485_v12, 0.0  ;;  %v6836_v10 = vld [vmem:[#allocation7] sm:$0xff]   ;;  %v4603_v20 = vld [vmem:[%s8129_s16 + $0x18] sm:$0xff]  ;;  %v4602_v21 = vld [vmem:[%s8129_s16 + $0x10] sm:$0xff] }
 0xa61   : > { %6501 = vmatprep.subr.bf16.mxu0 %v6999_v2  ;;  %6521 = vmatprep.subr.mxu1 %v6999_v2  ;;  %v4605_v17 = vld [vmem:[%s8129_s16 + $0x28] sm:$0xff]  ;;  %v4604_v18 = vld [vmem:[%s8129_s16 + $0x20] sm:$0xff] }
 0xa62   : > { %6522 = vmatpush3.msra.mxu1 %v4613_v56  ;;  %v4487_v5 = vpack.c.bf16 %v4486_v16, %v4486_v16  ;;  %v4601_v58 = vld [vmem:[%s8129_s16 + $0x8] sm:$0xff]  ;;  %v4600_v22 = vld [vmem:[%s8129_s16] sm:$0xff] }
 0xa63   : > { %6523 = vmatprep.subr.mxu1 %v6999_v2  ;;  %v5294_v23 = vld [vmem:[%s8166_s3] ss:$0 sm:$0xff] }
 0xa64   : > { %6502 = vmatpush3.bf16.msra.mxu0 %v6831_v53  ;;  %6524 = vmatpush3.msra.mxu1 %v4612_v6  ;;  %v5303_v26 = vld [vmem:[%s8167_s26] ss:$0 sm:$0xff] }
 0xa65   : > { %6503 = vmatprep.subr.bf16.mxu0 %v6999_v2  ;;  %6525 = vmatprep.subr.mxu1 %v6999_v2  ;;  %v4707_v37 = vld [vmem:[%s8168_s29] sm:$0x3] }
 0xa66   : > { %6526 = vmatpush3.msra.mxu1 %v4611_v55  ;;  %v4736_v63 = vmul.f32 %v4727_v42, %v4707_v37 }
 0xa67   : > { %6527 = vmatprep.subr.mxu1 %v6999_v2 }
 0xa68   : > { %6504 = vmatpush3.bf16.msra.mxu0 %v6832_v54  ;;  %6528 = vmatpush3.msra.mxu1 %v4610_v8  ;;  %v4737_v43 = vsel %vm4693_vm6, %v4736_v63, 0.0 }
 0xa69   : > { %6505 = vmatprep.subr.bf16.mxu0 %v6999_v2  ;;  %6529 = vmatprep.subr.mxu1 %v6999_v2 }
 0xa6a   : > { %6530 = vmatpush3.msra.mxu1 %v4609_v1 }
 0xa6b   : > { %6531 = vmatprep.subr.mxu1 %v6999_v2 }
 0xa6c   : > { %6506 = vmatpush3.bf16.msra.mxu0 %v6833_v7  ;;  %6532 = vmatpush3.msra.mxu1 %v4608_v62 }
 0xa6d   : > { %6507 = vmatprep.subr.bf16.mxu0 %v6999_v2  ;;  %6533 = vmatprep.subr.mxu1 %v6999_v2 }
 0xa6e   : > { %6534 = vmatpush3.msra.mxu1 %v4607_v14 }
 0xa6f   : > { %6535 = vmatprep.subr.mxu1 %v6999_v2 }
 0xa70   : > { %6508 = vmatpush3.bf16.msra.mxu0 %v6834_v9  ;;  %6536 = vmatpush3.msra.mxu1 %v4606_v15 }
 0xa71   : > { %6509 = vmatprep.subr.bf16.mxu0 %v6999_v2  ;;  %6537 = vmatprep.subr.mxu1 %v6999_v2 }
 0xa72   : > { %6538 = vmatpush3.msra.mxu1 %v4605_v17 }
 0xa73   : > { %6539 = vmatprep.subr.mxu1 %v6999_v2 }
 0xa74   : > { %6510 = vmatpush3.bf16.msra.mxu0 %v6835_v11  ;;  %6540 = vmatpush3.msra.mxu1 %v4604_v18 }
 0xa75   : > { %6511 = vmatprep.subr.bf16.mxu0 %v6999_v2  ;;  %6541 = vmatprep.subr.mxu1 %v6999_v2 }
 0xa76   : > { %6542 = vmatpush3.msra.mxu1 %v4603_v20 }
 0xa77   : > { %6543 = vmatprep.subr.mxu1 %v6999_v2 }
 0xa78   : > { %6512 = vmatpush3.bf16.msra.mxu0 %v6836_v10  ;;  %6544 = vmatpush3.msra.mxu1 %v4602_v21 }
 0xa79   : > { %6545 = vmatprep.subr.mxu1 %v6999_v2 }
 0xa7a   : > { %6546 = vmatpush3.msra.mxu1 %v4601_v58 }
 0xa7b   : > { %6514 = vmatmul.mubr.bf16.vlgmr.msra.gmra.mxu0 %v4487_v5  ;;  %6547 = vmatprep.subr.mxu1 %v6999_v2 }
 0xa7c   : > { %6548 = vmatpush3.msra.mxu1 %v4600_v22 }
 0xb3b   : > { %v4593_v24 = vpop.f32.mrf.mxu0 }
 0xb3c   : > { %v4594_v4 = vadd.f32 %v5294_v23, %v4593_v24 }
 0xb3d   : > { %v6515_v13 = vpop.f32.mrf.mxu0 }
 0xb3e   : > { %v4599_v19 = vmax.f32 %v4594_v4, 0.0 }
 0xb3f   : > { %v4596_v61 = vpop.f32.mrf.mxu0 }
 0xb40   : > { %6550 = vmatmul.mubr.f32.vlgmr.msra.gmra.mxu1 %v4599_v19 }
 0xb41   : > { %v6516_v25 = vpop.f32.mrf.mxu0 }
 0xc00   : > { %v4689_v27 = vpop.f32.mrf.mxu1 }
 0xc01   : > { %v4690_v28 = vadd.f32 %v5303_v26, %v4689_v27 }
 0xc02   : > { %v6551_v29 = vpop.f32.mrf.mxu1 }
 0xc03   : > { %v4694_v30 = vsel %vm4693_vm6, %v4690_v28, -inf }
 0xc04   : > { %4695 = vmax.xlane.f32.xlu0 %v4694_v30 }
 0xc8d   : > { %v4696_v31 = vpop.xlane.xlu0 %4695 }
 0xc8e   : > { %v4697_v32 = vsub.f32 %v4690_v28, %v4696_v31 }
 0xc90   : > { %v4698_v33 = vmul.f32 1.442695, %v4697_v32 }
 0xc92   : > { %6837 = vpow2.f32 %v4698_v33 }
 0xc9f   : > { %v6838_v0 = vpop.eup %6837 }
 0xca0   : > { %v4700_v57 = vsel %vm4693_vm6, %v6838_v0, 0.0 }
 0xca1   : > { %4701 = vadd.xlane.f32.xlu0 %v4700_v57 }
 0xd2a   : > { %v4702_v34 = vpop.xlane.xlu0 %4701 }
 0xd2b   : > { %6839 = vlog2.f32 %v4702_v34 }
 0xd38   : > { %v6840_v35 = vpop.eup %6839 }
 0xd39   : > { %v4704_v36 = vmul.f32 0.6931472, %v6840_v35 }
 0xd3b   : > { %v4705_v38 = vsub.f32 %v4697_v32, %v4704_v36 }
 0xd3d   : > { %4706 = vst.msk [vmem:[#allocation10] sm:$0x3] %vm4693_vm6, %v4705_v38  ;;  %v4728_v39 = vsel %vm4693_vm6, %v4705_v38, -inf  ;;  %v4708_v3 = vmul.f32 %v4707_v37, %v4705_v38 }
 0xd3e   : > { %4729 = vmax.xlane.f32.xlu1 %v4728_v39 }
 0xd3f   : > { %v4709_v40 = vsel %vm4693_vm6, %v4708_v3, 0.0 }
 0xd42   : > { %4710 = vadd.xlane.f32.xlu1 %v4709_v40 }
 0xd46   : > { %4738 = vadd.xlane.f32.xlu1 %v4737_v43 }
 0xdc7   : > { %v4730_v44 = vpop.xlane.xlu1 %4729 }
 0xdc8   : > { %vm4731_vm7 = vcmp.ge.f32.partialorder %v4705_v38, %v4730_v44 }
 0xdc9   : > { %v4732_v45 = vsel %vm4731_vm7, %v4727_v42, 2.0 }
 0xdca   : > { %v4733_v46 = vsel %vm4693_vm6, %v4732_v45, inf }
 0xdcb   : > { %4734 = vmin.xlane.f32.xlu0 %v4733_v46  ;;  %v4711_v47 = vpop.xlane.xlu1 %4710 }
 0xdcc   : > { %v4712_v49 = vrot.slane %v4711_v47, 4 }
 0xdce   : > { %v4713_v51 = vadd.f32 %v4712_v49, %v4711_v47 }
 0xdcf   : > { %v4739_v6 = vpop.xlane.xlu1 %4738 }
 0xdd0   : > { %v4714_v50 = vrot.slane %v4713_v51, 2 }
 0xdd2   : > { %v4715_v52 = vadd.f32 %v4714_v50, %v4713_v51 }
 0xdd4   : > { %v4716_v53 = vrot.slane %v4715_v52, 1 }
 0xdd6   : > { %v4717_v59 = vadd.f32 %v4716_v53, %v4715_v52 }
 0xdd8   : > { %6554 = vpush %v4717_v59 }
 0xe09   : > { %s6555_s21 = spop %6554 }
 0xe0a   : > { %v4719_v48 = vstv %s6555_s21 }
 0xe0b   : > { %v4720_v54 = vsub.f32 0.0, %v4719_v48 }
 0xe0d   : > { %v4722_v56 = vmul.f32 0.5, %v4720_v54 }
 0xe0f   : > { %4724 = vst.msk [vmem:[#allocation11] sm:$0x1] %vm4723_vm8, %v4722_v56 }
 0xe54   : > { %v4735_v7 = vpop.xlane.xlu0 %4734 }
 0xe55   : > { %vm4740_vm10 = vcmp.eq.f32.partialorder %v4735_v7, %v4739_v6 }
 0xe56   : > { %v5304_v55 = vsel %vm4740_vm10, 1.0, %v6999_v2 }
 0xe57   : > { %v4744_v8 = vsel %vm4743_vm9, %v5304_v55, 0.0 }
 0xe58   : > { %v4745_v9 = vrot.slane %v4744_v8, 4 }
 0xe5a   : > { %v4746_v1 = vadd.f32 %v4745_v9, %v4744_v8 }
 0xe5c   : > { %v4747_v62 = vrot.slane %v4746_v1, 2 }
 0xe5e   : > { %v4748_v11 = vadd.f32 %v4747_v62, %v4746_v1 }
 0xe60   : > { %v4749_v12 = vrot.slane %v4748_v11, 1 }
 0xe62   : > { %v4750_v14 = vadd.f32 %v4749_v12, %v4748_v11 }
 0xe64   : > { %v4751_v15 = vmul.f32 0.5, %v4750_v14 }
 0xe66   : > { %4752 = vst.msk [vmem:[#allocation13] sm:$0x1] %vm4723_vm8, %v4751_v15 }
 0xe67 PF: > { %s8169_s1 = sld [smem:[#allocation19_spill]]  ;;  %s7001_s25 = smov [#allocation11]  }
 0xe68   : > { %s4771_s28 = sshll.u32 %s7001_s25, 4  ;;  %s4772_s28 = int_to_ptr.vmem [resolvable:$true] %s4771_s28 }
 0xe69   : > { %s6867_s30 = scalar_lea.vmem %s4772_s28, 16  ;;  %s6873_s18 = scalar_lea.vmem %s4772_s28, 32 }
 0xe6a   : > { %p6868_p8 = scmp.ne.s32.totalorder %s4772_s28, %s6867_s30  ;;  %p6874_p11 = scmp.lt.s32.totalorder %s4772_s28, %s4772_s28 }
 0xe6b   : > { %p6875_p12 = scmp.lt.s32.totalorder %s6873_s18, %s6867_s30 }
 0xe6d   : > { %s8170_s22 = sadd.s32 4294967295, %s8169_s1   ;;  %p6876_p13 = por %p6875_p12, %p6874_p11 }
 0xe6e   : > { %p8065_p6 = scmp.eq.s32.totalorder %s8170_s22, 7 }
 0xe70   : > { %p6869_p9 = pnand %p6868_p8, %p8065_p6 }
 0xe72   : > { %p6870_p10 = pneg %p6869_p9 }
 0xe74   : > { %p6877_p0 = pnand %p6876_p13, %p6870_p10 }
 0xe76   : > { %6880 = shalt.err (!%p6877_p0)
}
 0xe77   : > { %s8172_s2 = sld [smem:[#allocation32_spill]]  ;;  %s7002_s15 = smov [#allocation10]  }
 0xe78   : > { %s4760_s17 = sshll.u32 %s7002_s15, 4  ;;  %s7003_s5 = smov [#allocation13]   ;;  %s4761_s17 = int_to_ptr.vmem [resolvable:$true] %s4760_s17 }
 0xe79   : > { %s4782_s3 = sshll.u32 %s7003_s5, 4  ;;  %s6891_s0 = scalar_lea.vmem %s4761_s17, 32  ;;  %s4783_s3 = int_to_ptr.vmem [resolvable:$true] %s4782_s3 }
 0xe7a   : > { %p6892_p1 = scmp.ne.s32.totalorder %s4761_s17, %s6891_s0  ;;  %p6898_p3 = scmp.lt.s32.totalorder %s4761_s17, %s4761_s17 }
 0xe7b   : > { %p6899_p7 = scmp.lt.s32.totalorder %s6891_s0, %s6891_s0 }
 0xe7c   : > { %p6893_p2 = pnand %p6892_p1, %p8065_p6 }
 0xe7d   : > { %6563 = dma.vmem_to_hbm [thread:$0]  (%p8065_p6), %s4772_s28, 16, %s8172_s2, [#allocation12]  }
 0xe7e   : > { %p6894_p4 = pneg %p6893_p2  ;;  %p6900_p5 = por %p6899_p7, %p6898_p3 }
 0xe80   : > { %p6901_p8 = pnand %p6900_p5, %p6894_p4 }
 0xe82   : > { %6904 = shalt.err (!%p6901_p8)
}
 0xe83   : > { %s8173_s27 = sld [smem:[#allocation31_spill]]  ;;  %s6915_s24 = scalar_lea.vmem %s4783_s3, 16 }
 0xe84   : > { %p6916_p9 = scmp.ne.s32.totalorder %s4783_s3, %s6915_s24  ;;  %s6921_s29 = scalar_lea.vmem %s4783_s3, 32 }
 0xe85   : > { %p6922_p12 = scmp.lt.s32.totalorder %s4783_s3, %s4783_s3  ;;  %p6923_p13 = scmp.lt.s32.totalorder %s6921_s29, %s6915_s24 }
 0xe86   : > { %p6917_p10 = pnand %p6916_p9, %p8065_p6 }
 0xe87   : > { %p6924_p0 = por %p6923_p13, %p6922_p12 }
 0xe88   : > { %p6918_p11 = pneg %p6917_p10 }
 0xe89   : > { %6561 = dma.vmem_to_hbm [thread:$0]  (%p8065_p6), %s4761_s17, 32, %s8173_s27, [#allocation9]  }
 0xe8a   : > { %p6925_p1 = pnand %p6924_p0, %p6918_p11 }
 0xe8c   : > { %6928 = shalt.err (!%p6925_p1)
}
 0xe8d   : > { %s8174_s22 = sld [smem:[#allocation33_spill]] }
 0xe93   : > { %6565 = dma.vmem_to_hbm [thread:$0]  (%p8065_p6), %s4783_s3, 16, %s8174_s22, [#allocation12]  }
 0xe94   : > { %6964 = dma.done.wait (%p8065_p6), [#allocation9], 32  }
 0xe95   : > { %6966 = vsyncadd (%p8065_p6), [#allocation9], 4294967264 }
 0xe96   : > { %6968 = dma.done.wait (%p8065_p6), [#allocation12], 32  }
 0xe97   : > { %6970 = vsyncadd (%p8065_p6), [#allocation12], 4294967264 }
 0xe98 PF: > { %s8175_s25 = sld [smem:[#allocation19_spill]] }
 0xe99   : > { %s8176_s1 = sld [smem:[#allocation17_spill]] }
 0xe9a   : > { %s8177_s22 = sld [smem:[#allocation18_spill]] }
 0xe9b   : > { %s8178_s23 = sld [smem:[#allocation20_spill]] }
 0xe9c   : > { %s8179_s24 = sld [smem:[#allocation21_spill]] }
 0xe9e   : > { %s34_s2 = sadd.s32 1, %s8175_s25  }
 0xe9f   : > { %p31_p2 = scmp.ge.s32.totalorder %s34_s2, 10  }
 0xea1   :  { %33 = sbr.rel (!%p31_p2) target bundleno = 18 (0x12), region = 183 }
 0xea6   :  { %4803 = vsyncpa [#allocation8], 1 }
 0xea7   :  { %4805 = vsyncpa [#allocation8 + $0x1], 1 }
 0xea8   :  { %4806 = vsyncpa [#allocation9], 1 }
 0xea9   :  { %4808 = vsyncpa [#allocation9 + $0x1], 1 }
 0xeaa   :  { %4809 = vsyncpa [#allocation12], 1 }

</bundles_post_ra>
